<compile_context>
chip_gen: v7x
topology: tpu7x:2x2x1
jax: 0.10.0
libtpu: 0.0.40
codegen_flags: <defaults>
</compile_context>

<pallas_src>
import jax
import jax.numpy as jnp
from jax import lax
from jax.experimental import pallas as pl
from jax.experimental.pallas import tpu as pltpu

INPUT_SIZE = 100
INPUT_PAD = 128          # feature dim zero-padded to a full lane tile
HIDDEN = 64
GATES = 4 * HIDDEN       # 256
FC1 = 16
NUM_CLASSES = 2


def yelp_kernel(x_ref,                       # (TB, TC, 128) bf16, batch-major
                wih0_ref, b0_ref,            # (128, 256) bf16, (1, 256) f32
                whh0_ref,                    # (64, 256) bf16
                w1_ref, b1_ref,              # (128, 256) bf16, (1, 256) f32
                wfc1_ref, bfc1_ref,          # (64, 16), (1, 16) f32
                wfc2_ref, bfc2_ref,          # (16, 2), (1, 2) f32
                out_ref,                     # (TB, 2) f32
                g_sc,                        # (TC, TB, 256) f32  time-major gates
                h0_sc, c0_sc, h1_sc, c1_sc): # (TB, 64) f32 carries
    ti = pl.program_id(1)
    TB, TC, _ = x_ref.shape
    H = HIDDEN

    # ---- reset recurrent state at the start of every sequence -------------
    @pl.when(ti == 0)
    def _init():
        h0_sc[...] = jnp.zeros_like(h0_sc)
        c0_sc[...] = jnp.zeros_like(c0_sc)
        h1_sc[...] = jnp.zeros_like(h1_sc)
        c1_sc[...] = jnp.zeros_like(c1_sc)

    # ---- hoisted layer-0 input projection for the whole time chunk --------
    # MXU matmuls with M = TC (instead of TC tiny matmuls inside the serial
    # loop); bias b0 folded in here.  Repacked time-major so the recurrence
    # reads a contiguous (TB, 256) tile per step.
    wih0 = wih0_ref[...]
    b0 = b0_ref[...]
    for b in range(TB):                         # static unroll, TB is small
        gb = jnp.dot(x_ref[b], wih0, preferred_element_type=jnp.float32) + b0
        g_sc[:, b, :] = gb                      # g_sc[t, b, :] = x[b, t] @ W + b0

    # ---- loop-invariant loads / broadcasts hoisted out of the recurrence --
    whh0 = whh0_ref[...]                        # (64, 256) bf16
    w1 = w1_ref[...]                            # (128, 256) bf16
    b1 = jnp.broadcast_to(b1_ref[...], (TB, GATES))   # broadcast once per chunk

    def gate_tail(gates, c):
        # PyTorch gate ordering [i, f, g, o]; elementwise math in f32.
        i = jax.nn.sigmoid(gates[:, 0 * H:1 * H])
        f = jax.nn.sigmoid(gates[:, 1 * H:2 * H])
        g = jnp.tanh(gates[:, 2 * H:3 * H])
        o = jax.nn.sigmoid(gates[:, 3 * H:4 * H])
        c_new = f * c + i * g
        h_new = o * jnp.tanh(c_new)
        return h_new, c_new

    def step(t, carry):
        h0, c0, h1, c1 = carry
        # layer 0: recurrent half only (input half precomputed above)
        gates0 = g_sc[t] + jnp.dot(h0.astype(jnp.bfloat16), whh0,
                                   preferred_element_type=jnp.float32)
        h0, c0 = gate_tail(gates0, c0)
        # layer 1: fused [h0 | h1] @ [W_ih1 ; W_hh1] -> one 128-deep dot
        hcat = jnp.concatenate([h0, h1], axis=1).astype(jnp.bfloat16)  # (TB,128)
        gates1 = jnp.dot(hcat, w1, preferred_element_type=jnp.float32) + b1
        h1, c1 = gate_tail(gates1, c1)
        return (h0, c0, h1, c1)

    carry0 = (h0_sc[...], c0_sc[...], h1_sc[...], c1_sc[...])
    h0, c0, h1, c1 = lax.fori_loop(0, TC, step, carry0, unroll=min(8, TC))

    h0_sc[...] = h0
    c0_sc[...] = c0
    h1_sc[...] = h1
    c1_sc[...] = c1

    # ---- classifier head on the final hidden state of layer 1 -------------
    @pl.when(ti == pl.num_programs(1) - 1)
    def _head():
        z = jnp.dot(h1, wfc1_ref[...], preferred_element_type=jnp.float32) + bfc1_ref[...]
        z = jnp.maximum(z, 0.0)
        logits = jnp.dot(z, wfc2_ref[...], preferred_element_type=jnp.float32) + bfc2_ref[...]
        out_ref[...] = logits.astype(out_ref.dtype)


def init_params(key):
    """Deterministic PyTorch-style uniform(-1/sqrt(H), 1/sqrt(H)) init.

    Weights are stored transposed as (in, out) so every matmul is act @ W.
    """
    ks = jax.random.split(key, 12)
    k_lstm = 1.0 / jnp.sqrt(jnp.float32(HIDDEN))

    def u(k, shape, bound):
        return jax.random.uniform(k, shape, jnp.float32, -bound, bound)

    wih0 = u(ks[0], (INPUT_SIZE, GATES), k_lstm)
    whh0 = u(ks[1], (HIDDEN, GATES), k_lstm)
    b0 = u(ks[2], (1, GATES), k_lstm) + u(ks[3], (1, GATES), k_lstm)   # b_ih + b_hh
    wih1 = u(ks[4], (HIDDEN, GATES), k_lstm)
    whh1 = u(ks[5], (HIDDEN, GATES), k_lstm)
    b1 = u(ks[6], (1, GATES), k_lstm) + u(ks[7], (1, GATES), k_lstm)
    k1 = 1.0 / jnp.sqrt(jnp.float32(HIDDEN))
    k2 = 1.0 / jnp.sqrt(jnp.float32(FC1))
    wfc1 = u(ks[8], (HIDDEN, FC1), k1)
    bfc1 = u(ks[9], (1, FC1), k1)
    wfc2 = u(ks[10], (FC1, NUM_CLASSES), k2)
    bfc2 = u(ks[11], (1, NUM_CLASSES), k2)
    return dict(wih0=wih0, whh0=whh0, b0=b0, wih1=wih1, whh1=whh1, b1=b1,
                wfc1=wfc1, bfc1=bfc1, wfc2=wfc2, bfc2=bfc2)


def _pack_params(p):
    """Pad/fuse/cast weights into the kernel layout (bf16 on the MXU path)."""
    wih0p = jnp.pad(p["wih0"], ((0, INPUT_PAD - INPUT_SIZE), (0, 0))).astype(jnp.bfloat16)
    whh0 = p["whh0"].astype(jnp.bfloat16)
    w1 = jnp.concatenate([p["wih1"], p["whh1"]], axis=0).astype(jnp.bfloat16)  # (128, 256)
    return (wih0p, p["b0"], whh0, w1, p["b1"],
            p["wfc1"], p["bfc1"], p["wfc2"], p["bfc2"])


def yelp_forward(x, params, *, batch_tile=8, time_chunk=None):
    """x: (B, T, 100) float32 -> logits (B, 2) float32."""
    B, T, D = x.shape
    assert D == INPUT_SIZE

    # Time chunk: a multiple of 8 dividing T (streamed through the grid).
    if time_chunk is None:
        time_chunk = next((c for c in (128, 64, 32, 16, 8) if T % c == 0), T)
    TC = time_chunk
    assert T % TC == 0, "sequence length must be divisible by the time chunk"

    # Pad features 100 -> 128 (full lane tile) and cast the streamed input to
    # bf16; pad batch to a multiple of the batch tile (>= one sublane tile).
    xp = jnp.pad(x, ((0, 0), (0, 0), (0, INPUT_PAD - D))).astype(jnp.bfloat16)
    TB = batch_tile
    BP = ((max(B, TB) + TB - 1) // TB) * TB
    if BP != B:
        xp = jnp.pad(xp, ((0, BP - B), (0, 0), (0, 0)))

    packed = _pack_params(params)
    grid = (BP // TB, T // TC)          # batch tiles (parallel), time chunks (serial)
    const = lambda bi, ti: (0, 0)       # weights: resident, fetched once

    in_specs = [
        pl.BlockSpec((TB, TC, INPUT_PAD), lambda bi, ti: (bi, ti, 0)),  # x
        pl.BlockSpec((INPUT_PAD, GATES), const),       # wih0 (padded, bf16)
        pl.BlockSpec((1, GATES), const),               # b0
        pl.BlockSpec((HIDDEN, GATES), const),          # whh0
        pl.BlockSpec((2 * HIDDEN, GATES), const),      # [wih1; whh1]
        pl.BlockSpec((1, GATES), const),               # b1
        pl.BlockSpec((HIDDEN, FC1), const),            # wfc1
        pl.BlockSpec((1, FC1), const),                 # bfc1
        pl.BlockSpec((FC1, NUM_CLASSES), const),       # wfc2
        pl.BlockSpec((1, NUM_CLASSES), const),         # bfc2
    ]
    out_spec = pl.BlockSpec((TB, NUM_CLASSES), lambda bi, ti: (bi, 0))

    out = pl.pallas_call(
        yelp_kernel,
        out_shape=jax.ShapeDtypeStruct((BP, NUM_CLASSES), jnp.float32),
        grid_spec=pltpu.PrefetchScalarGridSpec(
            num_scalar_prefetch=0,
            grid=grid,
            in_specs=in_specs,
            out_specs=out_spec,
            scratch_shapes=[
                pltpu.VMEM((TC, TB, GATES), jnp.float32),   # time-major gate chunk
                pltpu.VMEM((TB, HIDDEN), jnp.float32),      # h0
                pltpu.VMEM((TB, HIDDEN), jnp.float32),      # c0
                pltpu.VMEM((TB, HIDDEN), jnp.float32),      # h1
                pltpu.VMEM((TB, HIDDEN), jnp.float32),      # c1
            ]),
        compiler_params=pltpu.CompilerParams(
            dimension_semantics=("parallel", "arbitrary")),
    )(xp, *packed)
    return out[:B]


if __name__ == "__main__":
    key = jax.random.PRNGKey(0)
    k_param, k_x = jax.random.split(key)

    B, T = 2, 8                       # small batch / sequence length
    params = init_params(k_param)
    x = jax.random.normal(k_x, (B, T, INPUT_SIZE), jnp.float32)

    logits = jax.jit(yelp_forward)(x, params)
    jax.block_until_ready(logits)
    assert logits.shape == (B, NUM_CLASSES)
    assert bool(jnp.all(jnp.isfinite(logits)))
    print("KERNEL_OK")
</pallas_src>

<mosaic_0001>
module attributes {stable_mosaic.version = 11 : i64} {
  func.func @yelp_kernel(%arg0: i32, %arg1: i32, %arg2: memref<8x8x128xbf16, #tpu.memory_space<vmem>>, %arg3: memref<128x256xbf16, #tpu.memory_space<vmem>>, %arg4: memref<1x256xf32, #tpu.memory_space<vmem>>, %arg5: memref<64x256xbf16, #tpu.memory_space<vmem>>, %arg6: memref<128x256xbf16, #tpu.memory_space<vmem>>, %arg7: memref<1x256xf32, #tpu.memory_space<vmem>>, %arg8: memref<64x16xf32, #tpu.memory_space<vmem>>, %arg9: memref<1x16xf32, #tpu.memory_space<vmem>>, %arg10: memref<16x2xf32, #tpu.memory_space<vmem>>, %arg11: memref<1x2xf32, #tpu.memory_space<vmem>>, %arg12: memref<8x2xf32, #tpu.memory_space<vmem>>, %arg13: memref<8x8x256xf32, #tpu.memory_space<vmem>>, %arg14: memref<8x64xf32, #tpu.memory_space<vmem>>, %arg15: memref<8x64xf32, #tpu.memory_space<vmem>>, %arg16: memref<8x64xf32, #tpu.memory_space<vmem>>, %arg17: memref<8x64xf32, #tpu.memory_space<vmem>>) attributes {dimension_semantics = [#tpu.dimension_semantics<parallel>, #tpu.dimension_semantics<arbitrary>], iteration_bounds = array<i64: 1, 1>, scalar_prefetch = 0 : i64, scratch_operands = 5 : i64, tpu.core_type = #tpu.core_type<tc>, window_params = [{transform_indices = @transform_0, window_bounds = array<i64: 8, 8, 128>}, {pipeline_mode = #tpu.pipeline_mode<synchronous>, transform_indices = @transform_1, window_bounds = array<i64: 128, 256>}, {pipeline_mode = #tpu.pipeline_mode<synchronous>, transform_indices = @transform_2, window_bounds = array<i64: 1, 256>}, {pipeline_mode = #tpu.pipeline_mode<synchronous>, transform_indices = @transform_3, window_bounds = array<i64: 64, 256>}, {pipeline_mode = #tpu.pipeline_mode<synchronous>, transform_indices = @transform_4, window_bounds = array<i64: 128, 256>}, {pipeline_mode = #tpu.pipeline_mode<synchronous>, transform_indices = @transform_5, window_bounds = array<i64: 1, 256>}, {pipeline_mode = #tpu.pipeline_mode<synchronous>, transform_indices = @transform_6, window_bounds = array<i64: 64, 16>}, {pipeline_mode = #tpu.pipeline_mode<synchronous>, transform_indices = @transform_7, window_bounds = array<i64: 1, 16>}, {pipeline_mode = #tpu.pipeline_mode<synchronous>, transform_indices = @transform_8, window_bounds = array<i64: 16, 2>}, {pipeline_mode = #tpu.pipeline_mode<synchronous>, transform_indices = @transform_9, window_bounds = array<i64: 1, 2>}, {transform_indices = @transform_10, window_bounds = array<i64: 8, 2>}]} {
    %c0_i32 = arith.constant 0 : i32
    %0 = arith.cmpi eq, %arg1, %c0_i32 : i32
    %1 = arith.extui %0 : i1 to i32
    %c0_i32_0 = arith.constant 0 : i32
    %2 = arith.cmpi ne, %1, %c0_i32_0 : i32
    scf.if %2 {
      %cst_157 = arith.constant 0.000000e+00 : f32
      %565 = vector.broadcast %cst_157 : f32 to vector<8x64xf32>
      %c0_158 = arith.constant 0 : index
      %c0_159 = arith.constant 0 : index
      %566 = vector.load %arg14[%c0_158, %c0_159] : memref<8x64xf32, #tpu.memory_space<vmem>>, vector<8x64xf32>
      tpu.vector_store %arg14[%c0_158, %c0_159], %565 {strides = array<i32>} : memref<8x64xf32, #tpu.memory_space<vmem>>, vector<8x64xf32>,
      %cst_160 = arith.constant 0.000000e+00 : f32
      %567 = vector.broadcast %cst_160 : f32 to vector<8x64xf32>
      %c0_161 = arith.constant 0 : index
      %c0_162 = arith.constant 0 : index
      %568 = vector.load %arg15[%c0_161, %c0_162] : memref<8x64xf32, #tpu.memory_space<vmem>>, vector<8x64xf32>
      tpu.vector_store %arg15[%c0_161, %c0_162], %567 {strides = array<i32>} : memref<8x64xf32, #tpu.memory_space<vmem>>, vector<8x64xf32>,
      %cst_163 = arith.constant 0.000000e+00 : f32
      %569 = vector.broadcast %cst_163 : f32 to vector<8x64xf32>
      %c0_164 = arith.constant 0 : index
      %c0_165 = arith.constant 0 : index
      %570 = vector.load %arg16[%c0_164, %c0_165] : memref<8x64xf32, #tpu.memory_space<vmem>>, vector<8x64xf32>
      tpu.vector_store %arg16[%c0_164, %c0_165], %569 {strides = array<i32>} : memref<8x64xf32, #tpu.memory_space<vmem>>, vector<8x64xf32>,
      %cst_166 = arith.constant 0.000000e+00 : f32
      %571 = vector.broadcast %cst_166 : f32 to vector<8x64xf32>
      %c0_167 = arith.constant 0 : index
      %c0_168 = arith.constant 0 : index
      %572 = vector.load %arg17[%c0_167, %c0_168] : memref<8x64xf32, #tpu.memory_space<vmem>>, vector<8x64xf32>
      tpu.vector_store %arg17[%c0_167, %c0_168], %571 {strides = array<i32>} : memref<8x64xf32, #tpu.memory_space<vmem>>, vector<8x64xf32>,
    } else {
    }
    %c0 = arith.constant 0 : index
    %c0_1 = arith.constant 0 : index
    %3 = vector.load %arg3[%c0, %c0_1] : memref<128x256xbf16, #tpu.memory_space<vmem>>, vector<128x256xbf16>
    %c0_2 = arith.constant 0 : index
    %c0_3 = arith.constant 0 : index
    %4 = vector.load %arg4[%c0_2, %c0_3] : memref<1x256xf32, #tpu.memory_space<vmem>>, vector<1x256xf32>
    %c0_4 = arith.constant 0 : index
    %c0_5 = arith.constant 0 : index
    %c0_6 = arith.constant 0 : index
    %5 = vector.load %arg2[%c0_4, %c0_5, %c0_6] : memref<8x8x128xbf16, #tpu.memory_space<vmem>>, vector<1x8x128xbf16>
    %6 = vector.shape_cast %5 : vector<1x8x128xbf16> to vector<8x128xbf16>
    %cst = arith.constant dense<0.000000e+00> : vector<8x256xf32>
    %7 = tpu.matmul %6, %3, %cst {dimension_numbers = #tpu.dot_dimension_numbers<[1], [0], [0], [1], [0, 0, 1, 1], [], []>} : vector<8x128xbf16>, vector<128x256xbf16>, vector<8x256xf32> -> vector<8x256xf32>
    %8 = vector.broadcast %4 : vector<1x256xf32> to vector<8x256xf32>
    %9 = arith.addf %7, %8 : vector<8x256xf32>
    %c0_7 = arith.constant 0 : index
    %c0_8 = arith.constant 0 : index
    %c0_9 = arith.constant 0 : index
    %10 = vector.load %arg13[%c0_7, %c0_8, %c0_9] : memref<8x8x256xf32, #tpu.memory_space<vmem>>, vector<8x1x256xf32>
    %11 = vector.shape_cast %10 : vector<8x1x256xf32> to vector<8x256xf32>
    %12 = vector.shape_cast %9 : vector<8x256xf32> to vector<8x1x256xf32>
    tpu.vector_store %arg13[%c0_7, %c0_8, %c0_9], %12 {strides = array<i32>} : memref<8x8x256xf32, #tpu.memory_space<vmem>>, vector<8x1x256xf32>,
    %c1 = arith.constant 1 : index
    %c0_10 = arith.constant 0 : index
    %c0_11 = arith.constant 0 : index
    %13 = vector.load %arg2[%c1, %c0_10, %c0_11] : memref<8x8x128xbf16, #tpu.memory_space<vmem>>, vector<1x8x128xbf16>
    %14 = vector.shape_cast %13 : vector<1x8x128xbf16> to vector<8x128xbf16>
    %cst_12 = arith.constant dense<0.000000e+00> : vector<8x256xf32>
    %15 = tpu.matmul %14, %3, %cst_12 {dimension_numbers = #tpu.dot_dimension_numbers<[1], [0], [0], [1], [0, 0, 1, 1], [], []>} : vector<8x128xbf16>, vector<128x256xbf16>, vector<8x256xf32> -> vector<8x256xf32>
    %16 = vector.broadcast %4 : vector<1x256xf32> to vector<8x256xf32>
    %17 = arith.addf %15, %16 : vector<8x256xf32>
    %c0_13 = arith.constant 0 : index
    %c1_14 = arith.constant 1 : index
    %c0_15 = arith.constant 0 : index
    %18 = vector.load %arg13[%c0_13, %c1_14, %c0_15] : memref<8x8x256xf32, #tpu.memory_space<vmem>>, vector<8x1x256xf32>
    %19 = vector.shape_cast %18 : vector<8x1x256xf32> to vector<8x256xf32>
    %20 = vector.shape_cast %17 : vector<8x256xf32> to vector<8x1x256xf32>
    tpu.vector_store %arg13[%c0_13, %c1_14, %c0_15], %20 {strides = array<i32>} : memref<8x8x256xf32, #tpu.memory_space<vmem>>, vector<8x1x256xf32>,
    %c2 = arith.constant 2 : index
    %c0_16 = arith.constant 0 : index
    %c0_17 = arith.constant 0 : index
    %21 = vector.load %arg2[%c2, %c0_16, %c0_17] : memref<8x8x128xbf16, #tpu.memory_space<vmem>>, vector<1x8x128xbf16>
    %22 = vector.shape_cast %21 : vector<1x8x128xbf16> to vector<8x128xbf16>
    %cst_18 = arith.constant dense<0.000000e+00> : vector<8x256xf32>
    %23 = tpu.matmul %22, %3, %cst_18 {dimension_numbers = #tpu.dot_dimension_numbers<[1], [0], [0], [1], [0, 0, 1, 1], [], []>} : vector<8x128xbf16>, vector<128x256xbf16>, vector<8x256xf32> -> vector<8x256xf32>
    %24 = vector.broadcast %4 : vector<1x256xf32> to vector<8x256xf32>
    %25 = arith.addf %23, %24 : vector<8x256xf32>
    %c0_19 = arith.constant 0 : index
    %c2_20 = arith.constant 2 : index
    %c0_21 = arith.constant 0 : index
    %26 = vector.load %arg13[%c0_19, %c2_20, %c0_21] : memref<8x8x256xf32, #tpu.memory_space<vmem>>, vector<8x1x256xf32>
    %27 = vector.shape_cast %26 : vector<8x1x256xf32> to vector<8x256xf32>
    %28 = vector.shape_cast %25 : vector<8x256xf32> to vector<8x1x256xf32>
    tpu.vector_store %arg13[%c0_19, %c2_20, %c0_21], %28 {strides = array<i32>} : memref<8x8x256xf32, #tpu.memory_space<vmem>>, vector<8x1x256xf32>,
    %c3 = arith.constant 3 : index
    %c0_22 = arith.constant 0 : index
    %c0_23 = arith.constant 0 : index
    %29 = vector.load %arg2[%c3, %c0_22, %c0_23] : memref<8x8x128xbf16, #tpu.memory_space<vmem>>, vector<1x8x128xbf16>
    %30 = vector.shape_cast %29 : vector<1x8x128xbf16> to vector<8x128xbf16>
    %cst_24 = arith.constant dense<0.000000e+00> : vector<8x256xf32>
    %31 = tpu.matmul %30, %3, %cst_24 {dimension_numbers = #tpu.dot_dimension_numbers<[1], [0], [0], [1], [0, 0, 1, 1], [], []>} : vector<8x128xbf16>, vector<128x256xbf16>, vector<8x256xf32> -> vector<8x256xf32>
    %32 = vector.broadcast %4 : vector<1x256xf32> to vector<8x256xf32>
    %33 = arith.addf %31, %32 : vector<8x256xf32>
    %c0_25 = arith.constant 0 : index
    %c3_26 = arith.constant 3 : index
    %c0_27 = arith.constant 0 : index
    %34 = vector.load %arg13[%c0_25, %c3_26, %c0_27] : memref<8x8x256xf32, #tpu.memory_space<vmem>>, vector<8x1x256xf32>
    %35 = vector.shape_cast %34 : vector<8x1x256xf32> to vector<8x256xf32>
    %36 = vector.shape_cast %33 : vector<8x256xf32> to vector<8x1x256xf32>
    tpu.vector_store %arg13[%c0_25, %c3_26, %c0_27], %36 {strides = array<i32>} : memref<8x8x256xf32, #tpu.memory_space<vmem>>, vector<8x1x256xf32>,
    %c4 = arith.constant 4 : index
    %c0_28 = arith.constant 0 : index
    %c0_29 = arith.constant 0 : index
    %37 = vector.load %arg2[%c4, %c0_28, %c0_29] : memref<8x8x128xbf16, #tpu.memory_space<vmem>>, vector<1x8x128xbf16>
    %38 = vector.shape_cast %37 : vector<1x8x128xbf16> to vector<8x128xbf16>
    %cst_30 = arith.constant dense<0.000000e+00> : vector<8x256xf32>
    %39 = tpu.matmul %38, %3, %cst_30 {dimension_numbers = #tpu.dot_dimension_numbers<[1], [0], [0], [1], [0, 0, 1, 1], [], []>} : vector<8x128xbf16>, vector<128x256xbf16>, vector<8x256xf32> -> vector<8x256xf32>
    %40 = vector.broadcast %4 : vector<1x256xf32> to vector<8x256xf32>
    %41 = arith.addf %39, %40 : vector<8x256xf32>
    %c0_31 = arith.constant 0 : index
    %c4_32 = arith.constant 4 : index
    %c0_33 = arith.constant 0 : index
    %42 = vector.load %arg13[%c0_31, %c4_32, %c0_33] : memref<8x8x256xf32, #tpu.memory_space<vmem>>, vector<8x1x256xf32>
    %43 = vector.shape_cast %42 : vector<8x1x256xf32> to vector<8x256xf32>
    %44 = vector.shape_cast %41 : vector<8x256xf32> to vector<8x1x256xf32>
    tpu.vector_store %arg13[%c0_31, %c4_32, %c0_33], %44 {strides = array<i32>} : memref<8x8x256xf32, #tpu.memory_space<vmem>>, vector<8x1x256xf32>,
    %c5 = arith.constant 5 : index
    %c0_34 = arith.constant 0 : index
    %c0_35 = arith.constant 0 : index
    %45 = vector.load %arg2[%c5, %c0_34, %c0_35] : memref<8x8x128xbf16, #tpu.memory_space<vmem>>, vector<1x8x128xbf16>
    %46 = vector.shape_cast %45 : vector<1x8x128xbf16> to vector<8x128xbf16>
    %cst_36 = arith.constant dense<0.000000e+00> : vector<8x256xf32>
    %47 = tpu.matmul %46, %3, %cst_36 {dimension_numbers = #tpu.dot_dimension_numbers<[1], [0], [0], [1], [0, 0, 1, 1], [], []>} : vector<8x128xbf16>, vector<128x256xbf16>, vector<8x256xf32> -> vector<8x256xf32>
    %48 = vector.broadcast %4 : vector<1x256xf32> to vector<8x256xf32>
    %49 = arith.addf %47, %48 : vector<8x256xf32>
    %c0_37 = arith.constant 0 : index
    %c5_38 = arith.constant 5 : index
    %c0_39 = arith.constant 0 : index
    %50 = vector.load %arg13[%c0_37, %c5_38, %c0_39] : memref<8x8x256xf32, #tpu.memory_space<vmem>>, vector<8x1x256xf32>
    %51 = vector.shape_cast %50 : vector<8x1x256xf32> to vector<8x256xf32>
    %52 = vector.shape_cast %49 : vector<8x256xf32> to vector<8x1x256xf32>
    tpu.vector_store %arg13[%c0_37, %c5_38, %c0_39], %52 {strides = array<i32>} : memref<8x8x256xf32, #tpu.memory_space<vmem>>, vector<8x1x256xf32>,
    %c6 = arith.constant 6 : index
    %c0_40 = arith.constant 0 : index
    %c0_41 = arith.constant 0 : index
    %53 = vector.load %arg2[%c6, %c0_40, %c0_41] : memref<8x8x128xbf16, #tpu.memory_space<vmem>>, vector<1x8x128xbf16>
    %54 = vector.shape_cast %53 : vector<1x8x128xbf16> to vector<8x128xbf16>
    %cst_42 = arith.constant dense<0.000000e+00> : vector<8x256xf32>
    %55 = tpu.matmul %54, %3, %cst_42 {dimension_numbers = #tpu.dot_dimension_numbers<[1], [0], [0], [1], [0, 0, 1, 1], [], []>} : vector<8x128xbf16>, vector<128x256xbf16>, vector<8x256xf32> -> vector<8x256xf32>
    %56 = vector.broadcast %4 : vector<1x256xf32> to vector<8x256xf32>
    %57 = arith.addf %55, %56 : vector<8x256xf32>
    %c0_43 = arith.constant 0 : index
    %c6_44 = arith.constant 6 : index
    %c0_45 = arith.constant 0 : index
    %58 = vector.load %arg13[%c0_43, %c6_44, %c0_45] : memref<8x8x256xf32, #tpu.memory_space<vmem>>, vector<8x1x256xf32>
    %59 = vector.shape_cast %58 : vector<8x1x256xf32> to vector<8x256xf32>
    %60 = vector.shape_cast %57 : vector<8x256xf32> to vector<8x1x256xf32>
    tpu.vector_store %arg13[%c0_43, %c6_44, %c0_45], %60 {strides = array<i32>} : memref<8x8x256xf32, #tpu.memory_space<vmem>>, vector<8x1x256xf32>,
    %c7 = arith.constant 7 : index
    %c0_46 = arith.constant 0 : index
    %c0_47 = arith.constant 0 : index
    %61 = vector.load %arg2[%c7, %c0_46, %c0_47] : memref<8x8x128xbf16, #tpu.memory_space<vmem>>, vector<1x8x128xbf16>
    %62 = vector.shape_cast %61 : vector<1x8x128xbf16> to vector<8x128xbf16>
    %cst_48 = arith.constant dense<0.000000e+00> : vector<8x256xf32>
    %63 = tpu.matmul %62, %3, %cst_48 {dimension_numbers = #tpu.dot_dimension_numbers<[1], [0], [0], [1], [0, 0, 1, 1], [], []>} : vector<8x128xbf16>, vector<128x256xbf16>, vector<8x256xf32> -> vector<8x256xf32>
    %64 = vector.broadcast %4 : vector<1x256xf32> to vector<8x256xf32>
    %65 = arith.addf %63, %64 : vector<8x256xf32>
    %c0_49 = arith.constant 0 : index
    %c7_50 = arith.constant 7 : index
    %c0_51 = arith.constant 0 : index
    %66 = vector.load %arg13[%c0_49, %c7_50, %c0_51] : memref<8x8x256xf32, #tpu.memory_space<vmem>>, vector<8x1x256xf32>
    %67 = vector.shape_cast %66 : vector<8x1x256xf32> to vector<8x256xf32>
    %68 = vector.shape_cast %65 : vector<8x256xf32> to vector<8x1x256xf32>
    tpu.vector_store %arg13[%c0_49, %c7_50, %c0_51], %68 {strides = array<i32>} : memref<8x8x256xf32, #tpu.memory_space<vmem>>, vector<8x1x256xf32>,
    %c0_52 = arith.constant 0 : index
    %c0_53 = arith.constant 0 : index
    %69 = vector.load %arg5[%c0_52, %c0_53] : memref<64x256xbf16, #tpu.memory_space<vmem>>, vector<64x256xbf16>
    %c0_54 = arith.constant 0 : index
    %c0_55 = arith.constant 0 : index
    %70 = vector.load %arg6[%c0_54, %c0_55] : memref<128x256xbf16, #tpu.memory_space<vmem>>, vector<128x256xbf16>
    %c0_56 = arith.constant 0 : index
    %c0_57 = arith.constant 0 : index
    %71 = vector.load %arg7[%c0_56, %c0_57] : memref<1x256xf32, #tpu.memory_space<vmem>>, vector<1x256xf32>
    %72 = vector.shape_cast %71 : vector<1x256xf32> to vector<1x256xf32>
    %73 = vector.broadcast %72 : vector<1x256xf32> to vector<8x256xf32>
    %c0_58 = arith.constant 0 : index
    %c0_59 = arith.constant 0 : index
    %74 = vector.load %arg14[%c0_58, %c0_59] : memref<8x64xf32, #tpu.memory_space<vmem>>, vector<8x64xf32>
    %c0_60 = arith.constant 0 : index
    %c0_61 = arith.constant 0 : index
    %75 = vector.load %arg15[%c0_60, %c0_61] : memref<8x64xf32, #tpu.memory_space<vmem>>, vector<8x64xf32>
    %c0_62 = arith.constant 0 : index
    %c0_63 = arith.constant 0 : index
    %76 = vector.load %arg16[%c0_62, %c0_63] : memref<8x64xf32, #tpu.memory_space<vmem>>, vector<8x64xf32>
    %c0_64 = arith.constant 0 : index
    %c0_65 = arith.constant 0 : index
    %77 = vector.load %arg17[%c0_64, %c0_65] : memref<8x64xf32, #tpu.memory_space<vmem>>, vector<8x64xf32>
    %c0_i32_66 = arith.constant 0 : i32
    %78 = arith.index_cast %c0_i32_66 : i32 to index
    %c0_67 = arith.constant 0 : index
    %c0_68 = arith.constant 0 : index
    %79 = vector.load %arg13[%78, %c0_67, %c0_68] : memref<8x8x256xf32, #tpu.memory_space<vmem>>, vector<1x8x256xf32>
    %80 = vector.shape_cast %79 : vector<1x8x256xf32> to vector<8x256xf32>
    %81 = arith.truncf %74 : vector<8x64xf32> to vector<8x64xbf16>
    %cst_69 = arith.constant dense<0.000000e+00> : vector<8x256xf32>
    %82 = tpu.matmul %81, %69, %cst_69 {dimension_numbers = #tpu.dot_dimension_numbers<[1], [0], [0], [1], [0, 0, 1, 1], [], []>} : vector<8x64xbf16>, vector<64x256xbf16>, vector<8x256xf32> -> vector<8x256xf32>
    %83 = arith.addf %80, %82 : vector<8x256xf32>
    %84 = vector.extract_strided_slice %83 {offsets = [0, 0], sizes = [8, 64], strides = [1, 1]} : vector<8x256xf32> to vector<8x64xf32>
    %85 = arith.negf %84 : vector<8x64xf32>
    %86 = math.exp %85 : vector<8x64xf32>
    %cst_70 = arith.constant 1.000000e+00 : f32
    %87 = vector.broadcast %cst_70 : f32 to vector<8x64xf32>
    %88 = arith.addf %87, %86 : vector<8x64xf32>
    %89 = arith.divf %87, %88 : vector<8x64xf32>
    %90 = vector.extract_strided_slice %83 {offsets = [0, 64], sizes = [8, 64], strides = [1, 1]} : vector<8x256xf32> to vector<8x64xf32>
    %91 = arith.negf %90 : vector<8x64xf32>
    %92 = math.exp %91 : vector<8x64xf32>
    %cst_71 = arith.constant 1.000000e+00 : f32
    %93 = vector.broadcast %cst_71 : f32 to vector<8x64xf32>
    %94 = arith.addf %93, %92 : vector<8x64xf32>
    %95 = arith.divf %93, %94 : vector<8x64xf32>
    %96 = vector.extract_strided_slice %83 {offsets = [0, 128], sizes = [8, 64], strides = [1, 1]} : vector<8x256xf32> to vector<8x64xf32>
    %97 = math.tanh %96 : vector<8x64xf32>
    %98 = vector.extract_strided_slice %83 {offsets = [0, 192], sizes = [8, 64], strides = [1, 1]} : vector<8x256xf32> to vector<8x64xf32>
    %99 = arith.negf %98 : vector<8x64xf32>
    %100 = math.exp %99 : vector<8x64xf32>
    %cst_72 = arith.constant 1.000000e+00 : f32
    %101 = vector.broadcast %cst_72 : f32 to vector<8x64xf32>
    %102 = arith.addf %101, %100 : vector<8x64xf32>
    %103 = arith.divf %101, %102 : vector<8x64xf32>
    %104 = arith.mulf %95, %75 : vector<8x64xf32>
    %105 = arith.mulf %89, %97 : vector<8x64xf32>
    %106 = arith.addf %104, %105 : vector<8x64xf32>
    %107 = math.tanh %106 : vector<8x64xf32>
    %108 = arith.mulf %103, %107 : vector<8x64xf32>
    %109 = tpu.concatenate %108, %76 in 1 : vector<8x64xf32>, vector<8x64xf32> -> vector<8x128xf32>
    %110 = arith.truncf %109 : vector<8x128xf32> to vector<8x128xbf16>
    %cst_73 = arith.constant dense<0.000000e+00> : vector<8x256xf32>
    %111 = tpu.matmul %110, %70, %cst_73 {dimension_numbers = #tpu.dot_dimension_numbers<[1], [0], [0], [1], [0, 0, 1, 1], [], []>} : vector<8x128xbf16>, vector<128x256xbf16>, vector<8x256xf32> -> vector<8x256xf32>
    %112 = arith.addf %111, %73 : vector<8x256xf32>
    %113 = vector.extract_strided_slice %112 {offsets = [0, 0], sizes = [8, 64], strides = [1, 1]} : vector<8x256xf32> to vector<8x64xf32>
    %114 = arith.negf %113 : vector<8x64xf32>
    %115 = math.exp %114 : vector<8x64xf32>
    %cst_74 = arith.constant 1.000000e+00 : f32
    %116 = vector.broadcast %cst_74 : f32 to vector<8x64xf32>
    %117 = arith.addf %116, %115 : vector<8x64xf32>
    %118 = arith.divf %116, %117 : vector<8x64xf32>
    %119 = vector.extract_strided_slice %112 {offsets = [0, 64], sizes = [8, 64], strides = [1, 1]} : vector<8x256xf32> to vector<8x64xf32>
    %120 = arith.negf %119 : vector<8x64xf32>
    %121 = math.exp %120 : vector<8x64xf32>
    %cst_75 = arith.constant 1.000000e+00 : f32
    %122 = vector.broadcast %cst_75 : f32 to vector<8x64xf32>
    %123 = arith.addf %122, %121 : vector<8x64xf32>
    %124 = arith.divf %122, %123 : vector<8x64xf32>
    %125 = vector.extract_strided_slice %112 {offsets = [0, 128], sizes = [8, 64], strides = [1, 1]} : vector<8x256xf32> to vector<8x64xf32>
    %126 = math.tanh %125 : vector<8x64xf32>
    %127 = vector.extract_strided_slice %112 {offsets = [0, 192], sizes = [8, 64], strides = [1, 1]} : vector<8x256xf32> to vector<8x64xf32>
    %128 = arith.negf %127 : vector<8x64xf32>
    %129 = math.exp %128 : vector<8x64xf32>
    %cst_76 = arith.constant 1.000000e+00 : f32
    %130 = vector.broadcast %cst_76 : f32 to vector<8x64xf32>
    %131 = arith.addf %130, %129 : vector<8x64xf32>
    %132 = arith.divf %130, %131 : vector<8x64xf32>
    %133 = arith.mulf %124, %77 : vector<8x64xf32>
    %134 = arith.mulf %118, %126 : vector<8x64xf32>
    %135 = arith.addf %133, %134 : vector<8x64xf32>
    %136 = math.tanh %135 : vector<8x64xf32>
    %137 = arith.mulf %132, %136 : vector<8x64xf32>
    %c1_i32 = arith.constant 1 : i32
    %138 = arith.index_cast %c1_i32 : i32 to index
    %c0_77 = arith.constant 0 : index
    %c0_78 = arith.constant 0 : index
    %139 = vector.load %arg13[%138, %c0_77, %c0_78] : memref<8x8x256xf32, #tpu.memory_space<vmem>>, vector<1x8x256xf32>
    %140 = vector.shape_cast %139 : vector<1x8x256xf32> to vector<8x256xf32>
    %141 = arith.truncf %108 : vector<8x64xf32> to vector<8x64xbf16>
    %cst_79 = arith.constant dense<0.000000e+00> : vector<8x256xf32>
    %142 = tpu.matmul %141, %69, %cst_79 {dimension_numbers = #tpu.dot_dimension_numbers<[1], [0], [0], [1], [0, 0, 1, 1], [], []>} : vector<8x64xbf16>, vector<64x256xbf16>, vector<8x256xf32> -> vector<8x256xf32>
    %143 = arith.addf %140, %142 : vector<8x256xf32>
    %144 = vector.extract_strided_slice %143 {offsets = [0, 0], sizes = [8, 64], strides = [1, 1]} : vector<8x256xf32> to vector<8x64xf32>
    %145 = arith.negf %144 : vector<8x64xf32>
    %146 = math.exp %145 : vector<8x64xf32>
    %cst_80 = arith.constant 1.000000e+00 : f32
    %147 = vector.broadcast %cst_80 : f32 to vector<8x64xf32>
    %148 = arith.addf %147, %146 : vector<8x64xf32>
    %149 = arith.divf %147, %148 : vector<8x64xf32>
    %150 = vector.extract_strided_slice %143 {offsets = [0, 64], sizes = [8, 64], strides = [1, 1]} : vector<8x256xf32> to vector<8x64xf32>
    %151 = arith.negf %150 : vector<8x64xf32>
    %152 = math.exp %151 : vector<8x64xf32>
    %cst_81 = arith.constant 1.000000e+00 : f32
    %153 = vector.broadcast %cst_81 : f32 to vector<8x64xf32>
    %154 = arith.addf %153, %152 : vector<8x64xf32>
    %155 = arith.divf %153, %154 : vector<8x64xf32>
    %156 = vector.extract_strided_slice %143 {offsets = [0, 128], sizes = [8, 64], strides = [1, 1]} : vector<8x256xf32> to vector<8x64xf32>
    %157 = math.tanh %156 : vector<8x64xf32>
    %158 = vector.extract_strided_slice %143 {offsets = [0, 192], sizes = [8, 64], strides = [1, 1]} : vector<8x256xf32> to vector<8x64xf32>
    %159 = arith.negf %158 : vector<8x64xf32>
    %160 = math.exp %159 : vector<8x64xf32>
    %cst_82 = arith.constant 1.000000e+00 : f32
    %161 = vector.broadcast %cst_82 : f32 to vector<8x64xf32>
    %162 = arith.addf %161, %160 : vector<8x64xf32>
    %163 = arith.divf %161, %162 : vector<8x64xf32>
    %164 = arith.mulf %155, %106 : vector<8x64xf32>
    %165 = arith.mulf %149, %157 : vector<8x64xf32>
    %166 = arith.addf %164, %165 : vector<8x64xf32>
    %167 = math.tanh %166 : vector<8x64xf32>
    %168 = arith.mulf %163, %167 : vector<8x64xf32>
    %169 = tpu.concatenate %168, %137 in 1 : vector<8x64xf32>, vector<8x64xf32> -> vector<8x128xf32>
    %170 = arith.truncf %169 : vector<8x128xf32> to vector<8x128xbf16>
    %cst_83 = arith.constant dense<0.000000e+00> : vector<8x256xf32>
    %171 = tpu.matmul %170, %70, %cst_83 {dimension_numbers = #tpu.dot_dimension_numbers<[1], [0], [0], [1], [0, 0, 1, 1], [], []>} : vector<8x128xbf16>, vector<128x256xbf16>, vector<8x256xf32> -> vector<8x256xf32>
    %172 = arith.addf %171, %73 : vector<8x256xf32>
    %173 = vector.extract_strided_slice %172 {offsets = [0, 0], sizes = [8, 64], strides = [1, 1]} : vector<8x256xf32> to vector<8x64xf32>
    %174 = arith.negf %173 : vector<8x64xf32>
    %175 = math.exp %174 : vector<8x64xf32>
    %cst_84 = arith.constant 1.000000e+00 : f32
    %176 = vector.broadcast %cst_84 : f32 to vector<8x64xf32>
    %177 = arith.addf %176, %175 : vector<8x64xf32>
    %178 = arith.divf %176, %177 : vector<8x64xf32>
    %179 = vector.extract_strided_slice %172 {offsets = [0, 64], sizes = [8, 64], strides = [1, 1]} : vector<8x256xf32> to vector<8x64xf32>
    %180 = arith.negf %179 : vector<8x64xf32>
    %181 = math.exp %180 : vector<8x64xf32>
    %cst_85 = arith.constant 1.000000e+00 : f32
    %182 = vector.broadcast %cst_85 : f32 to vector<8x64xf32>
    %183 = arith.addf %182, %181 : vector<8x64xf32>
    %184 = arith.divf %182, %183 : vector<8x64xf32>
    %185 = vector.extract_strided_slice %172 {offsets = [0, 128], sizes = [8, 64], strides = [1, 1]} : vector<8x256xf32> to vector<8x64xf32>
    %186 = math.tanh %185 : vector<8x64xf32>
    %187 = vector.extract_strided_slice %172 {offsets = [0, 192], sizes = [8, 64], strides = [1, 1]} : vector<8x256xf32> to vector<8x64xf32>
    %188 = arith.negf %187 : vector<8x64xf32>
    %189 = math.exp %188 : vector<8x64xf32>
    %cst_86 = arith.constant 1.000000e+00 : f32
    %190 = vector.broadcast %cst_86 : f32 to vector<8x64xf32>
    %191 = arith.addf %190, %189 : vector<8x64xf32>
    %192 = arith.divf %190, %191 : vector<8x64xf32>
    %193 = arith.mulf %184, %135 : vector<8x64xf32>
    %194 = arith.mulf %178, %186 : vector<8x64xf32>
    %195 = arith.addf %193, %194 : vector<8x64xf32>
    %196 = math.tanh %195 : vector<8x64xf32>
    %197 = arith.mulf %192, %196 : vector<8x64xf32>
    %c2_i32 = arith.constant 2 : i32
    %198 = arith.index_cast %c2_i32 : i32 to index
    %c0_87 = arith.constant 0 : index
    %c0_88 = arith.constant 0 : index
    %199 = vector.load %arg13[%198, %c0_87, %c0_88] : memref<8x8x256xf32, #tpu.memory_space<vmem>>, vector<1x8x256xf32>
    %200 = vector.shape_cast %199 : vector<1x8x256xf32> to vector<8x256xf32>
    %201 = arith.truncf %168 : vector<8x64xf32> to vector<8x64xbf16>
    %cst_89 = arith.constant dense<0.000000e+00> : vector<8x256xf32>
    %202 = tpu.matmul %201, %69, %cst_89 {dimension_numbers = #tpu.dot_dimension_numbers<[1], [0], [0], [1], [0, 0, 1, 1], [], []>} : vector<8x64xbf16>, vector<64x256xbf16>, vector<8x256xf32> -> vector<8x256xf32>
    %203 = arith.addf %200, %202 : vector<8x256xf32>
    %204 = vector.extract_strided_slice %203 {offsets = [0, 0], sizes = [8, 64], strides = [1, 1]} : vector<8x256xf32> to vector<8x64xf32>
    %205 = arith.negf %204 : vector<8x64xf32>
    %206 = math.exp %205 : vector<8x64xf32>
    %cst_90 = arith.constant 1.000000e+00 : f32
    %207 = vector.broadcast %cst_90 : f32 to vector<8x64xf32>
    %208 = arith.addf %207, %206 : vector<8x64xf32>
    %209 = arith.divf %207, %208 : vector<8x64xf32>
    %210 = vector.extract_strided_slice %203 {offsets = [0, 64], sizes = [8, 64], strides = [1, 1]} : vector<8x256xf32> to vector<8x64xf32>
    %211 = arith.negf %210 : vector<8x64xf32>
    %212 = math.exp %211 : vector<8x64xf32>
    %cst_91 = arith.constant 1.000000e+00 : f32
    %213 = vector.broadcast %cst_91 : f32 to vector<8x64xf32>
    %214 = arith.addf %213, %212 : vector<8x64xf32>
    %215 = arith.divf %213, %214 : vector<8x64xf32>
    %216 = vector.extract_strided_slice %203 {offsets = [0, 128], sizes = [8, 64], strides = [1, 1]} : vector<8x256xf32> to vector<8x64xf32>
    %217 = math.tanh %216 : vector<8x64xf32>
    %218 = vector.extract_strided_slice %203 {offsets = [0, 192], sizes = [8, 64], strides = [1, 1]} : vector<8x256xf32> to vector<8x64xf32>
    %219 = arith.negf %218 : vector<8x64xf32>
    %220 = math.exp %219 : vector<8x64xf32>
    %cst_92 = arith.constant 1.000000e+00 : f32
    %221 = vector.broadcast %cst_92 : f32 to vector<8x64xf32>
    %222 = arith.addf %221, %220 : vector<8x64xf32>
    %223 = arith.divf %221, %222 : vector<8x64xf32>
    %224 = arith.mulf %215, %166 : vector<8x64xf32>
    %225 = arith.mulf %209, %217 : vector<8x64xf32>
    %226 = arith.addf %224, %225 : vector<8x64xf32>
    %227 = math.tanh %226 : vector<8x64xf32>
    %228 = arith.mulf %223, %227 : vector<8x64xf32>
    %229 = tpu.concatenate %228, %197 in 1 : vector<8x64xf32>, vector<8x64xf32> -> vector<8x128xf32>
    %230 = arith.truncf %229 : vector<8x128xf32> to vector<8x128xbf16>
    %cst_93 = arith.constant dense<0.000000e+00> : vector<8x256xf32>
    %231 = tpu.matmul %230, %70, %cst_93 {dimension_numbers = #tpu.dot_dimension_numbers<[1], [0], [0], [1], [0, 0, 1, 1], [], []>} : vector<8x128xbf16>, vector<128x256xbf16>, vector<8x256xf32> -> vector<8x256xf32>
    %232 = arith.addf %231, %73 : vector<8x256xf32>
    %233 = vector.extract_strided_slice %232 {offsets = [0, 0], sizes = [8, 64], strides = [1, 1]} : vector<8x256xf32> to vector<8x64xf32>
    %234 = arith.negf %233 : vector<8x64xf32>
    %235 = math.exp %234 : vector<8x64xf32>
    %cst_94 = arith.constant 1.000000e+00 : f32
    %236 = vector.broadcast %cst_94 : f32 to vector<8x64xf32>
    %237 = arith.addf %236, %235 : vector<8x64xf32>
    %238 = arith.divf %236, %237 : vector<8x64xf32>
    %239 = vector.extract_strided_slice %232 {offsets = [0, 64], sizes = [8, 64], strides = [1, 1]} : vector<8x256xf32> to vector<8x64xf32>
    %240 = arith.negf %239 : vector<8x64xf32>
    %241 = math.exp %240 : vector<8x64xf32>
    %cst_95 = arith.constant 1.000000e+00 : f32
    %242 = vector.broadcast %cst_95 : f32 to vector<8x64xf32>
    %243 = arith.addf %242, %241 : vector<8x64xf32>
    %244 = arith.divf %242, %243 : vector<8x64xf32>
    %245 = vector.extract_strided_slice %232 {offsets = [0, 128], sizes = [8, 64], strides = [1, 1]} : vector<8x256xf32> to vector<8x64xf32>
    %246 = math.tanh %245 : vector<8x64xf32>
    %247 = vector.extract_strided_slice %232 {offsets = [0, 192], sizes = [8, 64], strides = [1, 1]} : vector<8x256xf32> to vector<8x64xf32>
    %248 = arith.negf %247 : vector<8x64xf32>
    %249 = math.exp %248 : vector<8x64xf32>
    %cst_96 = arith.constant 1.000000e+00 : f32
    %250 = vector.broadcast %cst_96 : f32 to vector<8x64xf32>
    %251 = arith.addf %250, %249 : vector<8x64xf32>
    %252 = arith.divf %250, %251 : vector<8x64xf32>
    %253 = arith.mulf %244, %195 : vector<8x64xf32>
    %254 = arith.mulf %238, %246 : vector<8x64xf32>
    %255 = arith.addf %253, %254 : vector<8x64xf32>
    %256 = math.tanh %255 : vector<8x64xf32>
    %257 = arith.mulf %252, %256 : vector<8x64xf32>
    %c3_i32 = arith.constant 3 : i32
    %258 = arith.index_cast %c3_i32 : i32 to index
    %c0_97 = arith.constant 0 : index
    %c0_98 = arith.constant 0 : index
    %259 = vector.load %arg13[%258, %c0_97, %c0_98] : memref<8x8x256xf32, #tpu.memory_space<vmem>>, vector<1x8x256xf32>
    %260 = vector.shape_cast %259 : vector<1x8x256xf32> to vector<8x256xf32>
    %261 = arith.truncf %228 : vector<8x64xf32> to vector<8x64xbf16>
    %cst_99 = arith.constant dense<0.000000e+00> : vector<8x256xf32>
    %262 = tpu.matmul %261, %69, %cst_99 {dimension_numbers = #tpu.dot_dimension_numbers<[1], [0], [0], [1], [0, 0, 1, 1], [], []>} : vector<8x64xbf16>, vector<64x256xbf16>, vector<8x256xf32> -> vector<8x256xf32>
    %263 = arith.addf %260, %262 : vector<8x256xf32>
    %264 = vector.extract_strided_slice %263 {offsets = [0, 0], sizes = [8, 64], strides = [1, 1]} : vector<8x256xf32> to vector<8x64xf32>
    %265 = arith.negf %264 : vector<8x64xf32>
    %266 = math.exp %265 : vector<8x64xf32>
    %cst_100 = arith.constant 1.000000e+00 : f32
    %267 = vector.broadcast %cst_100 : f32 to vector<8x64xf32>
    %268 = arith.addf %267, %266 : vector<8x64xf32>
    %269 = arith.divf %267, %268 : vector<8x64xf32>
    %270 = vector.extract_strided_slice %263 {offsets = [0, 64], sizes = [8, 64], strides = [1, 1]} : vector<8x256xf32> to vector<8x64xf32>
    %271 = arith.negf %270 : vector<8x64xf32>
    %272 = math.exp %271 : vector<8x64xf32>
    %cst_101 = arith.constant 1.000000e+00 : f32
    %273 = vector.broadcast %cst_101 : f32 to vector<8x64xf32>
    %274 = arith.addf %273, %272 : vector<8x64xf32>
    %275 = arith.divf %273, %274 : vector<8x64xf32>
    %276 = vector.extract_strided_slice %263 {offsets = [0, 128], sizes = [8, 64], strides = [1, 1]} : vector<8x256xf32> to vector<8x64xf32>
    %277 = math.tanh %276 : vector<8x64xf32>
    %278 = vector.extract_strided_slice %263 {offsets = [0, 192], sizes = [8, 64], strides = [1, 1]} : vector<8x256xf32> to vector<8x64xf32>
    %279 = arith.negf %278 : vector<8x64xf32>
    %280 = math.exp %279 : vector<8x64xf32>
    %cst_102 = arith.constant 1.000000e+00 : f32
    %281 = vector.broadcast %cst_102 : f32 to vector<8x64xf32>
    %282 = arith.addf %281, %280 : vector<8x64xf32>
    %283 = arith.divf %281, %282 : vector<8x64xf32>
    %284 = arith.mulf %275, %226 : vector<8x64xf32>
    %285 = arith.mulf %269, %277 : vector<8x64xf32>
    %286 = arith.addf %284, %285 : vector<8x64xf32>
    %287 = math.tanh %286 : vector<8x64xf32>
    %288 = arith.mulf %283, %287 : vector<8x64xf32>
    %289 = tpu.concatenate %288, %257 in 1 : vector<8x64xf32>, vector<8x64xf32> -> vector<8x128xf32>
    %290 = arith.truncf %289 : vector<8x128xf32> to vector<8x128xbf16>
    %cst_103 = arith.constant dense<0.000000e+00> : vector<8x256xf32>
    %291 = tpu.matmul %290, %70, %cst_103 {dimension_numbers = #tpu.dot_dimension_numbers<[1], [0], [0], [1], [0, 0, 1, 1], [], []>} : vector<8x128xbf16>, vector<128x256xbf16>, vector<8x256xf32> -> vector<8x256xf32>
    %292 = arith.addf %291, %73 : vector<8x256xf32>
    %293 = vector.extract_strided_slice %292 {offsets = [0, 0], sizes = [8, 64], strides = [1, 1]} : vector<8x256xf32> to vector<8x64xf32>
    %294 = arith.negf %293 : vector<8x64xf32>
    %295 = math.exp %294 : vector<8x64xf32>
    %cst_104 = arith.constant 1.000000e+00 : f32
    %296 = vector.broadcast %cst_104 : f32 to vector<8x64xf32>
    %297 = arith.addf %296, %295 : vector<8x64xf32>
    %298 = arith.divf %296, %297 : vector<8x64xf32>
    %299 = vector.extract_strided_slice %292 {offsets = [0, 64], sizes = [8, 64], strides = [1, 1]} : vector<8x256xf32> to vector<8x64xf32>
    %300 = arith.negf %299 : vector<8x64xf32>
    %301 = math.exp %300 : vector<8x64xf32>
    %cst_105 = arith.constant 1.000000e+00 : f32
    %302 = vector.broadcast %cst_105 : f32 to vector<8x64xf32>
    %303 = arith.addf %302, %301 : vector<8x64xf32>
    %304 = arith.divf %302, %303 : vector<8x64xf32>
    %305 = vector.extract_strided_slice %292 {offsets = [0, 128], sizes = [8, 64], strides = [1, 1]} : vector<8x256xf32> to vector<8x64xf32>
    %306 = math.tanh %305 : vector<8x64xf32>
    %307 = vector.extract_strided_slice %292 {offsets = [0, 192], sizes = [8, 64], strides = [1, 1]} : vector<8x256xf32> to vector<8x64xf32>
    %308 = arith.negf %307 : vector<8x64xf32>
    %309 = math.exp %308 : vector<8x64xf32>
    %cst_106 = arith.constant 1.000000e+00 : f32
    %310 = vector.broadcast %cst_106 : f32 to vector<8x64xf32>
    %311 = arith.addf %310, %309 : vector<8x64xf32>
    %312 = arith.divf %310, %311 : vector<8x64xf32>
    %313 = arith.mulf %304, %255 : vector<8x64xf32>
    %314 = arith.mulf %298, %306 : vector<8x64xf32>
    %315 = arith.addf %313, %314 : vector<8x64xf32>
    %316 = math.tanh %315 : vector<8x64xf32>
    %317 = arith.mulf %312, %316 : vector<8x64xf32>
    %c4_i32 = arith.constant 4 : i32
    %318 = arith.index_cast %c4_i32 : i32 to index
    %c0_107 = arith.constant 0 : index
    %c0_108 = arith.constant 0 : index
    %319 = vector.load %arg13[%318, %c0_107, %c0_108] : memref<8x8x256xf32, #tpu.memory_space<vmem>>, vector<1x8x256xf32>
    %320 = vector.shape_cast %319 : vector<1x8x256xf32> to vector<8x256xf32>
    %321 = arith.truncf %288 : vector<8x64xf32> to vector<8x64xbf16>
    %cst_109 = arith.constant dense<0.000000e+00> : vector<8x256xf32>
    %322 = tpu.matmul %321, %69, %cst_109 {dimension_numbers = #tpu.dot_dimension_numbers<[1], [0], [0], [1], [0, 0, 1, 1], [], []>} : vector<8x64xbf16>, vector<64x256xbf16>, vector<8x256xf32> -> vector<8x256xf32>
    %323 = arith.addf %320, %322 : vector<8x256xf32>
    %324 = vector.extract_strided_slice %323 {offsets = [0, 0], sizes = [8, 64], strides = [1, 1]} : vector<8x256xf32> to vector<8x64xf32>
    %325 = arith.negf %324 : vector<8x64xf32>
    %326 = math.exp %325 : vector<8x64xf32>
    %cst_110 = arith.constant 1.000000e+00 : f32
    %327 = vector.broadcast %cst_110 : f32 to vector<8x64xf32>
    %328 = arith.addf %327, %326 : vector<8x64xf32>
    %329 = arith.divf %327, %328 : vector<8x64xf32>
    %330 = vector.extract_strided_slice %323 {offsets = [0, 64], sizes = [8, 64], strides = [1, 1]} : vector<8x256xf32> to vector<8x64xf32>
    %331 = arith.negf %330 : vector<8x64xf32>
    %332 = math.exp %331 : vector<8x64xf32>
    %cst_111 = arith.constant 1.000000e+00 : f32
    %333 = vector.broadcast %cst_111 : f32 to vector<8x64xf32>
    %334 = arith.addf %333, %332 : vector<8x64xf32>
    %335 = arith.divf %333, %334 : vector<8x64xf32>
    %336 = vector.extract_strided_slice %323 {offsets = [0, 128], sizes = [8, 64], strides = [1, 1]} : vector<8x256xf32> to vector<8x64xf32>
    %337 = math.tanh %336 : vector<8x64xf32>
    %338 = vector.extract_strided_slice %323 {offsets = [0, 192], sizes = [8, 64], strides = [1, 1]} : vector<8x256xf32> to vector<8x64xf32>
    %339 = arith.negf %338 : vector<8x64xf32>
    %340 = math.exp %339 : vector<8x64xf32>
    %cst_112 = arith.constant 1.000000e+00 : f32
    %341 = vector.broadcast %cst_112 : f32 to vector<8x64xf32>
    %342 = arith.addf %341, %340 : vector<8x64xf32>
    %343 = arith.divf %341, %342 : vector<8x64xf32>
    %344 = arith.mulf %335, %286 : vector<8x64xf32>
    %345 = arith.mulf %329, %337 : vector<8x64xf32>
    %346 = arith.addf %344, %345 : vector<8x64xf32>
    %347 = math.tanh %346 : vector<8x64xf32>
    %348 = arith.mulf %343, %347 : vector<8x64xf32>
    %349 = tpu.concatenate %348, %317 in 1 : vector<8x64xf32>, vector<8x64xf32> -> vector<8x128xf32>
    %350 = arith.truncf %349 : vector<8x128xf32> to vector<8x128xbf16>
    %cst_113 = arith.constant dense<0.000000e+00> : vector<8x256xf32>
    %351 = tpu.matmul %350, %70, %cst_113 {dimension_numbers = #tpu.dot_dimension_numbers<[1], [0], [0], [1], [0, 0, 1, 1], [], []>} : vector<8x128xbf16>, vector<128x256xbf16>, vector<8x256xf32> -> vector<8x256xf32>
    %352 = arith.addf %351, %73 : vector<8x256xf32>
    %353 = vector.extract_strided_slice %352 {offsets = [0, 0], sizes = [8, 64], strides = [1, 1]} : vector<8x256xf32> to vector<8x64xf32>
    %354 = arith.negf %353 : vector<8x64xf32>
    %355 = math.exp %354 : vector<8x64xf32>
    %cst_114 = arith.constant 1.000000e+00 : f32
    %356 = vector.broadcast %cst_114 : f32 to vector<8x64xf32>
    %357 = arith.addf %356, %355 : vector<8x64xf32>
    %358 = arith.divf %356, %357 : vector<8x64xf32>
    %359 = vector.extract_strided_slice %352 {offsets = [0, 64], sizes = [8, 64], strides = [1, 1]} : vector<8x256xf32> to vector<8x64xf32>
    %360 = arith.negf %359 : vector<8x64xf32>
    %361 = math.exp %360 : vector<8x64xf32>
    %cst_115 = arith.constant 1.000000e+00 : f32
    %362 = vector.broadcast %cst_115 : f32 to vector<8x64xf32>
    %363 = arith.addf %362, %361 : vector<8x64xf32>
    %364 = arith.divf %362, %363 : vector<8x64xf32>
    %365 = vector.extract_strided_slice %352 {offsets = [0, 128], sizes = [8, 64], strides = [1, 1]} : vector<8x256xf32> to vector<8x64xf32>
    %366 = math.tanh %365 : vector<8x64xf32>
    %367 = vector.extract_strided_slice %352 {offsets = [0, 192], sizes = [8, 64], strides = [1, 1]} : vector<8x256xf32> to vector<8x64xf32>
    %368 = arith.negf %367 : vector<8x64xf32>
    %369 = math.exp %368 : vector<8x64xf32>
    %cst_116 = arith.constant 1.000000e+00 : f32
    %370 = vector.broadcast %cst_116 : f32 to vector<8x64xf32>
    %371 = arith.addf %370, %369 : vector<8x64xf32>
    %372 = arith.divf %370, %371 : vector<8x64xf32>
    %373 = arith.mulf %364, %315 : vector<8x64xf32>
    %374 = arith.mulf %358, %366 : vector<8x64xf32>
    %375 = arith.addf %373, %374 : vector<8x64xf32>
    %376 = math.tanh %375 : vector<8x64xf32>
    %377 = arith.mulf %372, %376 : vector<8x64xf32>
    %c5_i32 = arith.constant 5 : i32
    %378 = arith.index_cast %c5_i32 : i32 to index
    %c0_117 = arith.constant 0 : index
    %c0_118 = arith.constant 0 : index
    %379 = vector.load %arg13[%378, %c0_117, %c0_118] : memref<8x8x256xf32, #tpu.memory_space<vmem>>, vector<1x8x256xf32>
    %380 = vector.shape_cast %379 : vector<1x8x256xf32> to vector<8x256xf32>
    %381 = arith.truncf %348 : vector<8x64xf32> to vector<8x64xbf16>
    %cst_119 = arith.constant dense<0.000000e+00> : vector<8x256xf32>
    %382 = tpu.matmul %381, %69, %cst_119 {dimension_numbers = #tpu.dot_dimension_numbers<[1], [0], [0], [1], [0, 0, 1, 1], [], []>} : vector<8x64xbf16>, vector<64x256xbf16>, vector<8x256xf32> -> vector<8x256xf32>
    %383 = arith.addf %380, %382 : vector<8x256xf32>
    %384 = vector.extract_strided_slice %383 {offsets = [0, 0], sizes = [8, 64], strides = [1, 1]} : vector<8x256xf32> to vector<8x64xf32>
    %385 = arith.negf %384 : vector<8x64xf32>
    %386 = math.exp %385 : vector<8x64xf32>
    %cst_120 = arith.constant 1.000000e+00 : f32
    %387 = vector.broadcast %cst_120 : f32 to vector<8x64xf32>
    %388 = arith.addf %387, %386 : vector<8x64xf32>
    %389 = arith.divf %387, %388 : vector<8x64xf32>
    %390 = vector.extract_strided_slice %383 {offsets = [0, 64], sizes = [8, 64], strides = [1, 1]} : vector<8x256xf32> to vector<8x64xf32>
    %391 = arith.negf %390 : vector<8x64xf32>
    %392 = math.exp %391 : vector<8x64xf32>
    %cst_121 = arith.constant 1.000000e+00 : f32
    %393 = vector.broadcast %cst_121 : f32 to vector<8x64xf32>
    %394 = arith.addf %393, %392 : vector<8x64xf32>
    %395 = arith.divf %393, %394 : vector<8x64xf32>
    %396 = vector.extract_strided_slice %383 {offsets = [0, 128], sizes = [8, 64], strides = [1, 1]} : vector<8x256xf32> to vector<8x64xf32>
    %397 = math.tanh %396 : vector<8x64xf32>
    %398 = vector.extract_strided_slice %383 {offsets = [0, 192], sizes = [8, 64], strides = [1, 1]} : vector<8x256xf32> to vector<8x64xf32>
    %399 = arith.negf %398 : vector<8x64xf32>
    %400 = math.exp %399 : vector<8x64xf32>
    %cst_122 = arith.constant 1.000000e+00 : f32
    %401 = vector.broadcast %cst_122 : f32 to vector<8x64xf32>
    %402 = arith.addf %401, %400 : vector<8x64xf32>
    %403 = arith.divf %401, %402 : vector<8x64xf32>
    %404 = arith.mulf %395, %346 : vector<8x64xf32>
    %405 = arith.mulf %389, %397 : vector<8x64xf32>
    %406 = arith.addf %404, %405 : vector<8x64xf32>
    %407 = math.tanh %406 : vector<8x64xf32>
    %408 = arith.mulf %403, %407 : vector<8x64xf32>
    %409 = tpu.concatenate %408, %377 in 1 : vector<8x64xf32>, vector<8x64xf32> -> vector<8x128xf32>
    %410 = arith.truncf %409 : vector<8x128xf32> to vector<8x128xbf16>
    %cst_123 = arith.constant dense<0.000000e+00> : vector<8x256xf32>
    %411 = tpu.matmul %410, %70, %cst_123 {dimension_numbers = #tpu.dot_dimension_numbers<[1], [0], [0], [1], [0, 0, 1, 1], [], []>} : vector<8x128xbf16>, vector<128x256xbf16>, vector<8x256xf32> -> vector<8x256xf32>
    %412 = arith.addf %411, %73 : vector<8x256xf32>
    %413 = vector.extract_strided_slice %412 {offsets = [0, 0], sizes = [8, 64], strides = [1, 1]} : vector<8x256xf32> to vector<8x64xf32>
    %414 = arith.negf %413 : vector<8x64xf32>
    %415 = math.exp %414 : vector<8x64xf32>
    %cst_124 = arith.constant 1.000000e+00 : f32
    %416 = vector.broadcast %cst_124 : f32 to vector<8x64xf32>
    %417 = arith.addf %416, %415 : vector<8x64xf32>
    %418 = arith.divf %416, %417 : vector<8x64xf32>
    %419 = vector.extract_strided_slice %412 {offsets = [0, 64], sizes = [8, 64], strides = [1, 1]} : vector<8x256xf32> to vector<8x64xf32>
    %420 = arith.negf %419 : vector<8x64xf32>
    %421 = math.exp %420 : vector<8x64xf32>
    %cst_125 = arith.constant 1.000000e+00 : f32
    %422 = vector.broadcast %cst_125 : f32 to vector<8x64xf32>
    %423 = arith.addf %422, %421 : vector<8x64xf32>
    %424 = arith.divf %422, %423 : vector<8x64xf32>
    %425 = vector.extract_strided_slice %412 {offsets = [0, 128], sizes = [8, 64], strides = [1, 1]} : vector<8x256xf32> to vector<8x64xf32>
    %426 = math.tanh %425 : vector<8x64xf32>
    %427 = vector.extract_strided_slice %412 {offsets = [0, 192], sizes = [8, 64], strides = [1, 1]} : vector<8x256xf32> to vector<8x64xf32>
    %428 = arith.negf %427 : vector<8x64xf32>
    %429 = math.exp %428 : vector<8x64xf32>
    %cst_126 = arith.constant 1.000000e+00 : f32
    %430 = vector.broadcast %cst_126 : f32 to vector<8x64xf32>
    %431 = arith.addf %430, %429 : vector<8x64xf32>
    %432 = arith.divf %430, %431 : vector<8x64xf32>
    %433 = arith.mulf %424, %375 : vector<8x64xf32>
    %434 = arith.mulf %418, %426 : vector<8x64xf32>
    %435 = arith.addf %433, %434 : vector<8x64xf32>
    %436 = math.tanh %435 : vector<8x64xf32>
    %437 = arith.mulf %432, %436 : vector<8x64xf32>
    %c6_i32 = arith.constant 6 : i32
    %438 = arith.index_cast %c6_i32 : i32 to index
    %c0_127 = arith.constant 0 : index
    %c0_128 = arith.constant 0 : index
    %439 = vector.load %arg13[%438, %c0_127, %c0_128] : memref<8x8x256xf32, #tpu.memory_space<vmem>>, vector<1x8x256xf32>
    %440 = vector.shape_cast %439 : vector<1x8x256xf32> to vector<8x256xf32>
    %441 = arith.truncf %408 : vector<8x64xf32> to vector<8x64xbf16>
    %cst_129 = arith.constant dense<0.000000e+00> : vector<8x256xf32>
    %442 = tpu.matmul %441, %69, %cst_129 {dimension_numbers = #tpu.dot_dimension_numbers<[1], [0], [0], [1], [0, 0, 1, 1], [], []>} : vector<8x64xbf16>, vector<64x256xbf16>, vector<8x256xf32> -> vector<8x256xf32>
    %443 = arith.addf %440, %442 : vector<8x256xf32>
    %444 = vector.extract_strided_slice %443 {offsets = [0, 0], sizes = [8, 64], strides = [1, 1]} : vector<8x256xf32> to vector<8x64xf32>
    %445 = arith.negf %444 : vector<8x64xf32>
    %446 = math.exp %445 : vector<8x64xf32>
    %cst_130 = arith.constant 1.000000e+00 : f32
    %447 = vector.broadcast %cst_130 : f32 to vector<8x64xf32>
    %448 = arith.addf %447, %446 : vector<8x64xf32>
    %449 = arith.divf %447, %448 : vector<8x64xf32>
    %450 = vector.extract_strided_slice %443 {offsets = [0, 64], sizes = [8, 64], strides = [1, 1]} : vector<8x256xf32> to vector<8x64xf32>
    %451 = arith.negf %450 : vector<8x64xf32>
    %452 = math.exp %451 : vector<8x64xf32>
    %cst_131 = arith.constant 1.000000e+00 : f32
    %453 = vector.broadcast %cst_131 : f32 to vector<8x64xf32>
    %454 = arith.addf %453, %452 : vector<8x64xf32>
    %455 = arith.divf %453, %454 : vector<8x64xf32>
    %456 = vector.extract_strided_slice %443 {offsets = [0, 128], sizes = [8, 64], strides = [1, 1]} : vector<8x256xf32> to vector<8x64xf32>
    %457 = math.tanh %456 : vector<8x64xf32>
    %458 = vector.extract_strided_slice %443 {offsets = [0, 192], sizes = [8, 64], strides = [1, 1]} : vector<8x256xf32> to vector<8x64xf32>
    %459 = arith.negf %458 : vector<8x64xf32>
    %460 = math.exp %459 : vector<8x64xf32>
    %cst_132 = arith.constant 1.000000e+00 : f32
    %461 = vector.broadcast %cst_132 : f32 to vector<8x64xf32>
    %462 = arith.addf %461, %460 : vector<8x64xf32>
    %463 = arith.divf %461, %462 : vector<8x64xf32>
    %464 = arith.mulf %455, %406 : vector<8x64xf32>
    %465 = arith.mulf %449, %457 : vector<8x64xf32>
    %466 = arith.addf %464, %465 : vector<8x64xf32>
    %467 = math.tanh %466 : vector<8x64xf32>
    %468 = arith.mulf %463, %467 : vector<8x64xf32>
    %469 = tpu.concatenate %468, %437 in 1 : vector<8x64xf32>, vector<8x64xf32> -> vector<8x128xf32>
    %470 = arith.truncf %469 : vector<8x128xf32> to vector<8x128xbf16>
    %cst_133 = arith.constant dense<0.000000e+00> : vector<8x256xf32>
    %471 = tpu.matmul %470, %70, %cst_133 {dimension_numbers = #tpu.dot_dimension_numbers<[1], [0], [0], [1], [0, 0, 1, 1], [], []>} : vector<8x128xbf16>, vector<128x256xbf16>, vector<8x256xf32> -> vector<8x256xf32>
    %472 = arith.addf %471, %73 : vector<8x256xf32>
    %473 = vector.extract_strided_slice %472 {offsets = [0, 0], sizes = [8, 64], strides = [1, 1]} : vector<8x256xf32> to vector<8x64xf32>
    %474 = arith.negf %473 : vector<8x64xf32>
    %475 = math.exp %474 : vector<8x64xf32>
    %cst_134 = arith.constant 1.000000e+00 : f32
    %476 = vector.broadcast %cst_134 : f32 to vector<8x64xf32>
    %477 = arith.addf %476, %475 : vector<8x64xf32>
    %478 = arith.divf %476, %477 : vector<8x64xf32>
    %479 = vector.extract_strided_slice %472 {offsets = [0, 64], sizes = [8, 64], strides = [1, 1]} : vector<8x256xf32> to vector<8x64xf32>
    %480 = arith.negf %479 : vector<8x64xf32>
    %481 = math.exp %480 : vector<8x64xf32>
    %cst_135 = arith.constant 1.000000e+00 : f32
    %482 = vector.broadcast %cst_135 : f32 to vector<8x64xf32>
    %483 = arith.addf %482, %481 : vector<8x64xf32>
    %484 = arith.divf %482, %483 : vector<8x64xf32>
    %485 = vector.extract_strided_slice %472 {offsets = [0, 128], sizes = [8, 64], strides = [1, 1]} : vector<8x256xf32> to vector<8x64xf32>
    %486 = math.tanh %485 : vector<8x64xf32>
    %487 = vector.extract_strided_slice %472 {offsets = [0, 192], sizes = [8, 64], strides = [1, 1]} : vector<8x256xf32> to vector<8x64xf32>
    %488 = arith.negf %487 : vector<8x64xf32>
    %489 = math.exp %488 : vector<8x64xf32>
    %cst_136 = arith.constant 1.000000e+00 : f32
    %490 = vector.broadcast %cst_136 : f32 to vector<8x64xf32>
    %491 = arith.addf %490, %489 : vector<8x64xf32>
    %492 = arith.divf %490, %491 : vector<8x64xf32>
    %493 = arith.mulf %484, %435 : vector<8x64xf32>
    %494 = arith.mulf %478, %486 : vector<8x64xf32>
    %495 = arith.addf %493, %494 : vector<8x64xf32>
    %496 = math.tanh %495 : vector<8x64xf32>
    %497 = arith.mulf %492, %496 : vector<8x64xf32>
    %c7_i32 = arith.constant 7 : i32
    %498 = arith.index_cast %c7_i32 : i32 to index
    %c0_137 = arith.constant 0 : index
    %c0_138 = arith.constant 0 : index
    %499 = vector.load %arg13[%498, %c0_137, %c0_138] : memref<8x8x256xf32, #tpu.memory_space<vmem>>, vector<1x8x256xf32>
    %500 = vector.shape_cast %499 : vector<1x8x256xf32> to vector<8x256xf32>
    %501 = arith.truncf %468 : vector<8x64xf32> to vector<8x64xbf16>
    %cst_139 = arith.constant dense<0.000000e+00> : vector<8x256xf32>
    %502 = tpu.matmul %501, %69, %cst_139 {dimension_numbers = #tpu.dot_dimension_numbers<[1], [0], [0], [1], [0, 0, 1, 1], [], []>} : vector<8x64xbf16>, vector<64x256xbf16>, vector<8x256xf32> -> vector<8x256xf32>
    %503 = arith.addf %500, %502 : vector<8x256xf32>
    %504 = vector.extract_strided_slice %503 {offsets = [0, 0], sizes = [8, 64], strides = [1, 1]} : vector<8x256xf32> to vector<8x64xf32>
    %505 = arith.negf %504 : vector<8x64xf32>
    %506 = math.exp %505 : vector<8x64xf32>
    %cst_140 = arith.constant 1.000000e+00 : f32
    %507 = vector.broadcast %cst_140 : f32 to vector<8x64xf32>
    %508 = arith.addf %507, %506 : vector<8x64xf32>
    %509 = arith.divf %507, %508 : vector<8x64xf32>
    %510 = vector.extract_strided_slice %503 {offsets = [0, 64], sizes = [8, 64], strides = [1, 1]} : vector<8x256xf32> to vector<8x64xf32>
    %511 = arith.negf %510 : vector<8x64xf32>
    %512 = math.exp %511 : vector<8x64xf32>
    %cst_141 = arith.constant 1.000000e+00 : f32
    %513 = vector.broadcast %cst_141 : f32 to vector<8x64xf32>
    %514 = arith.addf %513, %512 : vector<8x64xf32>
    %515 = arith.divf %513, %514 : vector<8x64xf32>
    %516 = vector.extract_strided_slice %503 {offsets = [0, 128], sizes = [8, 64], strides = [1, 1]} : vector<8x256xf32> to vector<8x64xf32>
    %517 = math.tanh %516 : vector<8x64xf32>
    %518 = vector.extract_strided_slice %503 {offsets = [0, 192], sizes = [8, 64], strides = [1, 1]} : vector<8x256xf32> to vector<8x64xf32>
    %519 = arith.negf %518 : vector<8x64xf32>
    %520 = math.exp %519 : vector<8x64xf32>
    %cst_142 = arith.constant 1.000000e+00 : f32
    %521 = vector.broadcast %cst_142 : f32 to vector<8x64xf32>
    %522 = arith.addf %521, %520 : vector<8x64xf32>
    %523 = arith.divf %521, %522 : vector<8x64xf32>
    %524 = arith.mulf %515, %466 : vector<8x64xf32>
    %525 = arith.mulf %509, %517 : vector<8x64xf32>
    %526 = arith.addf %524, %525 : vector<8x64xf32>
    %527 = math.tanh %526 : vector<8x64xf32>
    %528 = arith.mulf %523, %527 : vector<8x64xf32>
    %529 = tpu.concatenate %528, %497 in 1 : vector<8x64xf32>, vector<8x64xf32> -> vector<8x128xf32>
    %530 = arith.truncf %529 : vector<8x128xf32> to vector<8x128xbf16>
    %cst_143 = arith.constant dense<0.000000e+00> : vector<8x256xf32>
    %531 = tpu.matmul %530, %70, %cst_143 {dimension_numbers = #tpu.dot_dimension_numbers<[1], [0], [0], [1], [0, 0, 1, 1], [], []>} : vector<8x128xbf16>, vector<128x256xbf16>, vector<8x256xf32> -> vector<8x256xf32>
    %532 = arith.addf %531, %73 : vector<8x256xf32>
    %533 = vector.extract_strided_slice %532 {offsets = [0, 0], sizes = [8, 64], strides = [1, 1]} : vector<8x256xf32> to vector<8x64xf32>
    %534 = arith.negf %533 : vector<8x64xf32>
    %535 = math.exp %534 : vector<8x64xf32>
    %cst_144 = arith.constant 1.000000e+00 : f32
    %536 = vector.broadcast %cst_144 : f32 to vector<8x64xf32>
    %537 = arith.addf %536, %535 : vector<8x64xf32>
    %538 = arith.divf %536, %537 : vector<8x64xf32>
    %539 = vector.extract_strided_slice %532 {offsets = [0, 64], sizes = [8, 64], strides = [1, 1]} : vector<8x256xf32> to vector<8x64xf32>
    %540 = arith.negf %539 : vector<8x64xf32>
    %541 = math.exp %540 : vector<8x64xf32>
    %cst_145 = arith.constant 1.000000e+00 : f32
    %542 = vector.broadcast %cst_145 : f32 to vector<8x64xf32>
    %543 = arith.addf %542, %541 : vector<8x64xf32>
    %544 = arith.divf %542, %543 : vector<8x64xf32>
    %545 = vector.extract_strided_slice %532 {offsets = [0, 128], sizes = [8, 64], strides = [1, 1]} : vector<8x256xf32> to vector<8x64xf32>
    %546 = math.tanh %545 : vector<8x64xf32>
    %547 = vector.extract_strided_slice %532 {offsets = [0, 192], sizes = [8, 64], strides = [1, 1]} : vector<8x256xf32> to vector<8x64xf32>
    %548 = arith.negf %547 : vector<8x64xf32>
    %549 = math.exp %548 : vector<8x64xf32>
    %cst_146 = arith.constant 1.000000e+00 : f32
    %550 = vector.broadcast %cst_146 : f32 to vector<8x64xf32>
    %551 = arith.addf %550, %549 : vector<8x64xf32>
    %552 = arith.divf %550, %551 : vector<8x64xf32>
    %553 = arith.mulf %544, %495 : vector<8x64xf32>
    %554 = arith.mulf %538, %546 : vector<8x64xf32>
    %555 = arith.addf %553, %554 : vector<8x64xf32>
    %556 = math.tanh %555 : vector<8x64xf32>
    %557 = arith.mulf %552, %556 : vector<8x64xf32>
    %c8_i32 = arith.constant 8 : i32
    %c0_147 = arith.constant 0 : index
    %c0_148 = arith.constant 0 : index
    %558 = vector.load %arg14[%c0_147, %c0_148] : memref<8x64xf32, #tpu.memory_space<vmem>>, vector<8x64xf32>
    tpu.vector_store %arg14[%c0_147, %c0_148], %528 {strides = array<i32>} : memref<8x64xf32, #tpu.memory_space<vmem>>, vector<8x64xf32>,
    %c0_149 = arith.constant 0 : index
    %c0_150 = arith.constant 0 : index
    %559 = vector.load %arg15[%c0_149, %c0_150] : memref<8x64xf32, #tpu.memory_space<vmem>>, vector<8x64xf32>
    tpu.vector_store %arg15[%c0_149, %c0_150], %526 {strides = array<i32>} : memref<8x64xf32, #tpu.memory_space<vmem>>, vector<8x64xf32>,
    %c0_151 = arith.constant 0 : index
    %c0_152 = arith.constant 0 : index
    %560 = vector.load %arg16[%c0_151, %c0_152] : memref<8x64xf32, #tpu.memory_space<vmem>>, vector<8x64xf32>
    tpu.vector_store %arg16[%c0_151, %c0_152], %557 {strides = array<i32>} : memref<8x64xf32, #tpu.memory_space<vmem>>, vector<8x64xf32>,
    %c0_153 = arith.constant 0 : index
    %c0_154 = arith.constant 0 : index
    %561 = vector.load %arg17[%c0_153, %c0_154] : memref<8x64xf32, #tpu.memory_space<vmem>>, vector<8x64xf32>
    tpu.vector_store %arg17[%c0_153, %c0_154], %555 {strides = array<i32>} : memref<8x64xf32, #tpu.memory_space<vmem>>, vector<8x64xf32>,
    %c0_i32_155 = arith.constant 0 : i32
    %562 = arith.cmpi eq, %arg1, %c0_i32_155 : i32
    %563 = arith.extui %562 : i1 to i32
    %c0_i32_156 = arith.constant 0 : i32
    %564 = arith.cmpi ne, %563, %c0_i32_156 : i32
    scf.if %564 {
      %c0_157 = arith.constant 0 : index
      %c0_158 = arith.constant 0 : index
      %565 = vector.load %arg8[%c0_157, %c0_158] : memref<64x16xf32, #tpu.memory_space<vmem>>, vector<64x16xf32>
      %cst_159 = arith.constant dense<0.000000e+00> : vector<8x16xf32>
      %566 = tpu.matmul %557, %565, %cst_159 {dimension_numbers = #tpu.dot_dimension_numbers<[1], [0], [0], [1], [0, 0, 1, 1], [], []>} : vector<8x64xf32>, vector<64x16xf32>, vector<8x16xf32> -> vector<8x16xf32>
      %c0_160 = arith.constant 0 : index
      %c0_161 = arith.constant 0 : index
      %567 = vector.load %arg9[%c0_160, %c0_161] : memref<1x16xf32, #tpu.memory_space<vmem>>, vector<1x16xf32>
      %568 = vector.broadcast %567 : vector<1x16xf32> to vector<8x16xf32>
      %569 = arith.addf %566, %568 : vector<8x16xf32>
      %cst_162 = arith.constant 0.000000e+00 : f32
      %570 = vector.broadcast %cst_162 : f32 to vector<8x16xf32>
      %571 = arith.maximumf %569, %570 : vector<8x16xf32>
      %c0_163 = arith.constant 0 : index
      %c0_164 = arith.constant 0 : index
      %572 = vector.load %arg10[%c0_163, %c0_164] : memref<16x2xf32, #tpu.memory_space<vmem>>, vector<16x2xf32>
      %cst_165 = arith.constant dense<0.000000e+00> : vector<8x2xf32>
      %573 = tpu.matmul %571, %572, %cst_165 {dimension_numbers = #tpu.dot_dimension_numbers<[1], [0], [0], [1], [0, 0, 1, 1], [], []>} : vector<8x16xf32>, vector<16x2xf32>, vector<8x2xf32> -> vector<8x2xf32>
      %c0_166 = arith.constant 0 : index
      %c0_167 = arith.constant 0 : index
      %574 = vector.load %arg11[%c0_166, %c0_167] : memref<1x2xf32, #tpu.memory_space<vmem>>, vector<1x2xf32>
      %575 = vector.broadcast %574 : vector<1x2xf32> to vector<8x2xf32>
      %576 = arith.addf %573, %575 : vector<8x2xf32>
      %c0_168 = arith.constant 0 : index
      %c0_169 = arith.constant 0 : index
      %577 = vector.load %arg12[%c0_168, %c0_169] : memref<8x2xf32, #tpu.memory_space<vmem>>, vector<8x2xf32>
      tpu.vector_store %arg12[%c0_168, %c0_169], %576 {strides = array<i32>} : memref<8x2xf32, #tpu.memory_space<vmem>>, vector<8x2xf32>,
    } else {
    }
    return
  }
  func.func @transform_0(%arg0: i32, %arg1: i32) -> (i32, i32, i32) {
    %c0_i32 = arith.constant 0 : i32
    %c0_i32_0 = arith.constant 0 : i32
    return %arg0, %arg1, %c0_i32 : i32, i32, i32
  }
  func.func @transform_1(%arg0: i32, %arg1: i32) -> (i32, i32) {
    %c0_i32 = arith.constant 0 : i32
    %c0_i32_0 = arith.constant 0 : i32
    %c0_i32_1 = arith.constant 0 : i32
    return %c0_i32, %c0_i32_0 : i32, i32
  }
  func.func @transform_2(%arg0: i32, %arg1: i32) -> (i32, i32) {
    %c0_i32 = arith.constant 0 : i32
    %c0_i32_0 = arith.constant 0 : i32
    %c0_i32_1 = arith.constant 0 : i32
    return %c0_i32, %c0_i32_0 : i32, i32
  }
  func.func @transform_3(%arg0: i32, %arg1: i32) -> (i32, i32) {
    %c0_i32 = arith.constant 0 : i32
    %c0_i32_0 = arith.constant 0 : i32
    %c0_i32_1 = arith.constant 0 : i32
    return %c0_i32, %c0_i32_0 : i32, i32
  }
  func.func @transform_4(%arg0: i32, %arg1: i32) -> (i32, i32) {
    %c0_i32 = arith.constant 0 : i32
    %c0_i32_0 = arith.constant 0 : i32
    %c0_i32_1 = arith.constant 0 : i32
    return %c0_i32, %c0_i32_0 : i32, i32
  }
  func.func @transform_5(%arg0: i32, %arg1: i32) -> (i32, i32) {
    %c0_i32 = arith.constant 0 : i32
    %c0_i32_0 = arith.constant 0 : i32
    %c0_i32_1 = arith.constant 0 : i32
    return %c0_i32, %c0_i32_0 : i32, i32
  }
  func.func @transform_6(%arg0: i32, %arg1: i32) -> (i32, i32) {
    %c0_i32 = arith.constant 0 : i32
    %c0_i32_0 = arith.constant 0 : i32
    %c0_i32_1 = arith.constant 0 : i32
    return %c0_i32, %c0_i32_0 : i32, i32
  }
  func.func @transform_7(%arg0: i32, %arg1: i32) -> (i32, i32) {
    %c0_i32 = arith.constant 0 : i32
    %c0_i32_0 = arith.constant 0 : i32
    %c0_i32_1 = arith.constant 0 : i32
    return %c0_i32, %c0_i32_0 : i32, i32
  }
  func.func @transform_8(%arg0: i32, %arg1: i32) -> (i32, i32) {
    %c0_i32 = arith.constant 0 : i32
    %c0_i32_0 = arith.constant 0 : i32
    %c0_i32_1 = arith.constant 0 : i32
    return %c0_i32, %c0_i32_0 : i32, i32
  }
  func.func @transform_9(%arg0: i32, %arg1: i32) -> (i32, i32) {
    %c0_i32 = arith.constant 0 : i32
    %c0_i32_0 = arith.constant 0 : i32
    %c0_i32_1 = arith.constant 0 : i32
    return %c0_i32, %c0_i32_0 : i32, i32
  }
  func.func @transform_10(%arg0: i32, %arg1: i32) -> (i32, i32) {
    %c0_i32 = arith.constant 0 : i32
    %c0_i32_0 = arith.constant 0 : i32
    return %arg0, %c0_i32 : i32, i32
  }
}

</mosaic_0001>

<bundles_post_ra>
// kernel: yelp_forward.1
= control target key start
LH: loop header
LB: loop body
LE: loop exit
PB: predicated region body
PF: predicated region fallthrough
CT: control target
= control target key end

     0   :  { %v3119_v1 = vmov 0   ;;  %vm40_vm0 = vcmask 523264   ;;  %v3120_v8 = vmov 0.0   ;;  %v64_v37 = vlaneseq  ;;  %s4269_s1 = inlined_call_operand.vmem [shape: bf16[128,256], index: 1, kind: input, shape index: {}]   ;;  %s4270_s3 = inlined_call_operand.vmem [shape: bf16[64,256], index: 3, kind: input, shape index: {}]   ;;  %s4271_s0 = inlined_call_operand.vmem [shape: bf16[8,8,128], index: 0, kind: input, shape index: {}]   ;;  %s4272_s2 = inlined_call_operand.vmem [shape: f32[1,256], index: 2, kind: input, shape index: {}]   ;;  %s4273_s4 = inlined_call_operand.vmem [shape: bf16[128,256], index: 4, kind: input, shape index: {}]   ;;  %s4274_s5 = inlined_call_operand.vmem [shape: f32[1,256], index: 5, kind: input, shape index: {}]   ;;  %s4275_s6 = inlined_call_operand.vmem [shape: f32[64,16], index: 6, kind: input, shape index: {}]   ;;  %s4276_s8 = inlined_call_operand.vmem [shape: f32[16,2], index: 8, kind: input, shape index: {}]   ;;  %s4277_s7 = inlined_call_operand.vmem [shape: f32[1,16], index: 7, kind: input, shape index: {}]   ;;  %s4278_s9 = inlined_call_operand.vmem [shape: f32[1,2], index: 9, kind: input, shape index: {}]   ;;  %s4279_s10 = inlined_call_operand.vmem [shape: f32[8,2], index: 10, kind: output, shape index: {}]  }
   0x1   :  { %v3183_v0 = vld [vmem:[%s4269_s1 + $0x4] ss:$8 sps:$4 sm:$0xff]   ;;  %186 = vmatprep.mubr.bf16.mxu0 %v3119_v1  ;;  %316 = vmatprep.mubr.bf16.mxu1 %v3119_v1  ;;  %v3190_v2 = vld [vmem:[%s4269_s1] ss:$8 sps:$4 sm:$0xff]   ;;  %v3197_v3 = vld [vmem:[%s4269_s1 + $0x14] ss:$8 sps:$4 sm:$0xff]  }
   0x2   :  { %154 = vmatprep.subr.bf16.mxu0 %v3183_v0  ;;  %284 = vmatprep.subr.bf16.mxu1 %v3183_v0  ;;  %v3204_v4 = vld [vmem:[%s4269_s1 + $0x10] ss:$8 sps:$4 sm:$0xff]   ;;  %v3211_v5 = vld [vmem:[%s4269_s1 + $0x24] ss:$8 sps:$4 sm:$0xff]   ;;  %v3218_v6 = vld [vmem:[%s4269_s1 + $0x20] ss:$8 sps:$4 sm:$0xff]  }
   0x3   :  { %155 = vmatpush1.bf16.msra.mxu0 %v3190_v2  ;;  %285 = vmatpush1.bf16.msra.mxu1 %v3190_v2  ;;  %v3225_v7 = vld [vmem:[%s4269_s1 + $0x34] ss:$8 sps:$4 sm:$0xff]   ;;  %41 = vst.msk [vmem:[#allocation3] sm:$0xff] %vm40_vm0, %v3120_v8  ;;  %42 = vst.msk [vmem:[#allocation4] sm:$0xff] %vm40_vm0, %v3120_v8  ;;  %v3240_v9 = vld [vmem:[%s4269_s1 + $0x30] ss:$8 sps:$4 sm:$0xff]  }
   0x4   :  { %156 = vmatprep.subr.bf16.mxu0 %v3197_v3  ;;  %286 = vmatprep.subr.bf16.mxu1 %v3197_v3  ;;  %43 = vst.msk [vmem:[#allocation5] sm:$0xff] %vm40_vm0, %v3120_v8  ;;  %44 = vst.msk [vmem:[#allocation6] sm:$0xff] %vm40_vm0, %v3120_v8  ;;  %v3247_v10 = vld [vmem:[%s4269_s1 + $0x44] ss:$8 sps:$4 sm:$0xff]   ;;  %v3254_v11 = vld [vmem:[%s4269_s1 + $0x40] ss:$8 sps:$4 sm:$0xff]  }
   0x5   :  { %v3261_v12 = vld [vmem:[%s4269_s1 + $0x54] ss:$8 sps:$4 sm:$0xff]   ;;  %v3268_v13 = vld [vmem:[%s4269_s1 + $0x50] ss:$8 sps:$4 sm:$0xff]   ;;  %v3275_v14 = vld [vmem:[%s4269_s1 + $0x64] ss:$8 sps:$4 sm:$0xff]  }
   0x6   :  { %v3282_v15 = vld [vmem:[%s4269_s1 + $0x60] ss:$8 sps:$4 sm:$0xff]   ;;  %v3289_v16 = vld [vmem:[%s4269_s1 + $0x74] ss:$8 sps:$4 sm:$0xff]   ;;  %v3296_v17 = vld [vmem:[%s4269_s1 + $0x70] ss:$8 sps:$4 sm:$0xff]  }
   0x7   :  { %157 = vmatpush1.bf16.msra.mxu0 %v3204_v4  ;;  %287 = vmatpush1.bf16.msra.mxu1 %v3204_v4  ;;  %v62_v18 = vld [vmem:[%s4271_s0] sm:$0xf]  ;;  %v2704_v19 = vld [vmem:[%s4271_s0 + $0x4] sm:$0xf]  ;;  %v2705_v20 = vld [vmem:[%s4271_s0 + $0x8] sm:$0xf] }
   0x8   :  { %158 = vmatprep.subr.bf16.mxu0 %v3211_v5  ;;  %288 = vmatprep.subr.bf16.mxu1 %v3211_v5  ;;  %v2706_v21 = vld [vmem:[%s4271_s0 + $0xc] sm:$0xf]  ;;  %v2707_v22 = vld [vmem:[%s4271_s0 + $0x10] sm:$0xf]  ;;  %v2708_v23 = vld [vmem:[%s4271_s0 + $0x14] sm:$0xf] }
   0x9   :  { %v3423_v24 = vld [vmem:[%s4270_s3 + $0x4] ss:$8 sps:$4 sm:$0xff]   ;;  %v2709_v25 = vld [vmem:[%s4271_s0 + $0x18] sm:$0xf]  ;;  %v2710_v26 = vld [vmem:[%s4271_s0 + $0x1c] sm:$0xf] }
   0xa   :  { %v3436_v27 = vld [vmem:[%s4270_s3] ss:$8 sps:$4 sm:$0xff]   ;;  %v3442_v28 = vld [vmem:[%s4270_s3 + $0x14] ss:$8 sps:$4 sm:$0xff]   ;;  %v3448_v29 = vld [vmem:[%s4270_s3 + $0x10] ss:$8 sps:$4 sm:$0xff]  }
   0xb   :  { %159 = vmatpush1.bf16.msra.mxu0 %v3218_v6  ;;  %289 = vmatpush1.bf16.msra.mxu1 %v3218_v6  ;;  %v3455_v30 = vld [vmem:[%s4270_s3 + $0x24] ss:$8 sps:$4 sm:$0xff]   ;;  %s3121_s1 = smov 64   ;;  %v3463_v32 = vld [vmem:[%s4270_s3 + $0x20] ss:$8 sps:$4 sm:$0xff]   ;;  %v3489_v38 = vshrl.u32 %v64_v37, 7 }
   0xc   :  { %160 = vmatprep.subr.bf16.mxu0 %v3225_v7  ;;  %290 = vmatprep.subr.bf16.mxu1 %v3225_v7  ;;  %v1208_v31 = vld [vmem:[#allocation4] sm:$0xff]  ;;  %v3469_v33 = vld [vmem:[%s4270_s3 + $0x34] ss:$8 sps:$4 sm:$0xff]   ;;  %v3475_v34 = vld [vmem:[%s4270_s3 + $0x30] ss:$8 sps:$4 sm:$0xff]   ;;  %vm3515_vm1 = vcmp.lt.s32.totalorder %v64_v37, 256 }
   0xd   :  { %1315 = vrot.lane.b32.xlu0 %v1208_v31, %s3121_s1  ;;  %v1207_v35 = vld [vmem:[#allocation3] sm:$0xff]  ;;  %v66_v39 = vsub.s32 0, %v3489_v38  ;;  %v70_v41 = vsub.s32 1, %v3489_v38  ;;  %v3122_v42 = vmov 1966171168   ;;  %vm3124_vm2 = vmmov 0  }
   0xe   :  { %v1213_v36 = vpack.c.bf16 %v1207_v35, %v1207_v35  ;;  %v61_v40 = vld [vmem:[%s4272_s2] sm:$0x3]  ;;  %v200_v43 = vunpack.c.l.s4 %v3122_v42  ;;  %vm2608_vm3 = vcmask 130048   ;;  %vm2682_vm4 = vcmask 15360  }
   0xf   :  { %161 = vmatpush1.bf16.msra.mxu0 %v3240_v9  ;;  %291 = vmatpush1.bf16.msra.mxu1 %v3240_v9  ;;  %v3498_v44 = vrot.slane %v61_v40, %v66_v39  ;;  %v3502_v45 = vrot.slane %v61_v40, %v70_v41 }
  0x10   :  { %162 = vmatprep.subr.bf16.mxu0 %v3247_v10  ;;  %292 = vmatprep.subr.bf16.mxu1 %v3247_v10  ;;  %v201_v46 = vunpack.c.0.s8 %v200_v43 }
  0x12   :  { %v3508_v54 = vsub.s32 %v201_v46, %v3489_v38 }
  0x13   :  { %163 = vmatpush1.bf16.msra.mxu0 %v3254_v11  ;;  %293 = vmatpush1.bf16.msra.mxu1 %v3254_v11 }
  0x14   :  { %164 = vmatprep.subr.bf16.mxu0 %v3261_v12  ;;  %294 = vmatprep.subr.bf16.mxu1 %v3261_v12 }
  0x17   :  { %165 = vmatpush1.bf16.msra.mxu0 %v3268_v13  ;;  %295 = vmatpush1.bf16.msra.mxu1 %v3268_v13 }
  0x18   :  { %166 = vmatprep.subr.bf16.mxu0 %v3275_v14  ;;  %296 = vmatprep.subr.bf16.mxu1 %v3275_v14 }
  0x1b   :  { %167 = vmatpush1.bf16.msra.mxu0 %v3282_v15  ;;  %297 = vmatpush1.bf16.msra.mxu1 %v3282_v15 }
  0x1c   :  { %168 = vmatprep.subr.bf16.mxu0 %v3289_v16  ;;  %298 = vmatprep.subr.bf16.mxu1 %v3289_v16 }
  0x1f   :  { %169 = vmatpush1.bf16.msra.mxu0 %v3296_v17  ;;  %299 = vmatpush1.bf16.msra.mxu1 %v3296_v17 }
  0x20   :  { %411 = vmatprep.subr.bf16.mxu0 %v3183_v0  ;;  %538 = vmatprep.subr.bf16.mxu1 %v3183_v0 }
  0x22   :  { %187 = vmatmul.mubr.bf16.vlgmr.msra.gmra.mrb[0].mxu0 %v62_v18  ;;  %317 = vmatmul.mubr.bf16.vlgmr.msra.gmra.mrb[0].mxu1 %v2704_v19 }
  0x23   :  { %412 = vmatpush1.bf16.msra.mxu0 %v3190_v2  ;;  %539 = vmatpush1.bf16.msra.mxu1 %v3190_v2 }
  0x24   :  { %413 = vmatprep.subr.bf16.mxu0 %v3197_v3  ;;  %540 = vmatprep.subr.bf16.mxu1 %v3197_v3 }
  0x25   :  { %443 = vmatprep.mubr.bf16.mxu0 %v3119_v1  ;;  %570 = vmatprep.mubr.bf16.mxu1 %v3119_v1 }
  0x27   :  { %414 = vmatpush1.bf16.msra.mxu0 %v3204_v4  ;;  %541 = vmatpush1.bf16.msra.mxu1 %v3204_v4 }
  0x28   :  { %415 = vmatprep.subr.bf16.mxu0 %v3211_v5  ;;  %542 = vmatprep.subr.bf16.mxu1 %v3211_v5 }
  0x2b   :  { %416 = vmatpush1.bf16.msra.mxu0 %v3218_v6  ;;  %543 = vmatpush1.bf16.msra.mxu1 %v3218_v6 }
  0x2c   :  { %417 = vmatprep.subr.bf16.mxu0 %v3225_v7  ;;  %544 = vmatprep.subr.bf16.mxu1 %v3225_v7 }
  0x2f   :  { %418 = vmatpush1.bf16.msra.mxu0 %v3240_v9  ;;  %545 = vmatpush1.bf16.msra.mxu1 %v3240_v9 }
  0x30   :  { %419 = vmatprep.subr.bf16.mxu0 %v3247_v10  ;;  %546 = vmatprep.subr.bf16.mxu1 %v3247_v10 }
  0x33   :  { %420 = vmatpush1.bf16.msra.mxu0 %v3254_v11  ;;  %547 = vmatpush1.bf16.msra.mxu1 %v3254_v11 }
  0x34   :  { %421 = vmatprep.subr.bf16.mxu0 %v3261_v12  ;;  %548 = vmatprep.subr.bf16.mxu1 %v3261_v12 }
  0x37   :  { %422 = vmatpush1.bf16.msra.mxu0 %v3268_v13  ;;  %549 = vmatpush1.bf16.msra.mxu1 %v3268_v13 }
  0x38   :  { %423 = vmatprep.subr.bf16.mxu0 %v3275_v14  ;;  %550 = vmatprep.subr.bf16.mxu1 %v3275_v14 }
  0x3b   :  { %424 = vmatpush1.bf16.msra.mxu0 %v3282_v15  ;;  %551 = vmatpush1.bf16.msra.mxu1 %v3282_v15 }
  0x3c   :  { %425 = vmatprep.subr.bf16.mxu0 %v3289_v16  ;;  %552 = vmatprep.subr.bf16.mxu1 %v3289_v16 }
  0x3f   :  { %426 = vmatpush1.bf16.msra.mxu0 %v3296_v17  ;;  %553 = vmatpush1.bf16.msra.mxu1 %v3296_v17 }
  0x40   :  { %665 = vmatprep.subr.bf16.mxu0 %v3183_v0  ;;  %792 = vmatprep.subr.bf16.mxu1 %v3183_v0 }
  0x42   :  { %444 = vmatmul.mubr.bf16.vlgmr.msra.gmra.mrb[4].mxu0 %v2705_v20  ;;  %571 = vmatmul.mubr.bf16.vlgmr.msra.gmra.mrb[4].mxu1 %v2706_v21 }
  0x43   :  { %666 = vmatpush1.bf16.msra.mxu0 %v3190_v2  ;;  %793 = vmatpush1.bf16.msra.mxu1 %v3190_v2 }
  0x44   :  { %667 = vmatprep.subr.bf16.mxu0 %v3197_v3  ;;  %794 = vmatprep.subr.bf16.mxu1 %v3197_v3 }
  0x45   :  { %697 = vmatprep.mubr.bf16.mxu0 %v3119_v1  ;;  %824 = vmatprep.mubr.bf16.mxu1 %v3119_v1 }
  0x47   :  { %668 = vmatpush1.bf16.msra.mxu0 %v3204_v4  ;;  %795 = vmatpush1.bf16.msra.mxu1 %v3204_v4 }
  0x48   :  { %669 = vmatprep.subr.bf16.mxu0 %v3211_v5  ;;  %796 = vmatprep.subr.bf16.mxu1 %v3211_v5 }
  0x4b   :  { %670 = vmatpush1.bf16.msra.mxu0 %v3218_v6  ;;  %797 = vmatpush1.bf16.msra.mxu1 %v3218_v6 }
  0x4c   :  { %671 = vmatprep.subr.bf16.mxu0 %v3225_v7  ;;  %798 = vmatprep.subr.bf16.mxu1 %v3225_v7 }
  0x4f   :  { %672 = vmatpush1.bf16.msra.mxu0 %v3240_v9  ;;  %799 = vmatpush1.bf16.msra.mxu1 %v3240_v9 }
  0x50   :  { %673 = vmatprep.subr.bf16.mxu0 %v3247_v10  ;;  %800 = vmatprep.subr.bf16.mxu1 %v3247_v10 }
  0x53   :  { %674 = vmatpush1.bf16.msra.mxu0 %v3254_v11  ;;  %801 = vmatpush1.bf16.msra.mxu1 %v3254_v11 }
  0x54   :  { %675 = vmatprep.subr.bf16.mxu0 %v3261_v12  ;;  %802 = vmatprep.subr.bf16.mxu1 %v3261_v12 }
  0x57   :  { %676 = vmatpush1.bf16.msra.mxu0 %v3268_v13  ;;  %803 = vmatpush1.bf16.msra.mxu1 %v3268_v13 }
  0x58   :  { %677 = vmatprep.subr.bf16.mxu0 %v3275_v14  ;;  %804 = vmatprep.subr.bf16.mxu1 %v3275_v14 }
  0x5b   :  { %678 = vmatpush1.bf16.msra.mxu0 %v3282_v15  ;;  %805 = vmatpush1.bf16.msra.mxu1 %v3282_v15 }
  0x5c   :  { %679 = vmatprep.subr.bf16.mxu0 %v3289_v16  ;;  %806 = vmatprep.subr.bf16.mxu1 %v3289_v16 }
  0x5f   :  { %680 = vmatpush1.bf16.msra.mxu0 %v3296_v17  ;;  %807 = vmatpush1.bf16.msra.mxu1 %v3296_v17 }
  0x60   :  { %919 = vmatprep.subr.bf16.mxu0 %v3183_v0  ;;  %1046 = vmatprep.subr.bf16.mxu1 %v3183_v0 }
  0x62   :  { %698 = vmatmul.mubr.bf16.vlgmr.msra.gmra.mrb[8].mxu0 %v2707_v22  ;;  %825 = vmatmul.mubr.bf16.vlgmr.msra.gmra.mrb[8].mxu1 %v2708_v23 }
  0x63   :  { %920 = vmatpush1.bf16.msra.mxu0 %v3190_v2  ;;  %1047 = vmatpush1.bf16.msra.mxu1 %v3190_v2 }
  0x64   :  { %921 = vmatprep.subr.bf16.mxu0 %v3197_v3  ;;  %1048 = vmatprep.subr.bf16.mxu1 %v3197_v3 }
  0x65   :  { %951 = vmatprep.mubr.bf16.mxu0 %v3119_v1  ;;  %1078 = vmatprep.mubr.bf16.mxu1 %v3119_v1 }
  0x67   :  { %922 = vmatpush1.bf16.msra.mxu0 %v3204_v4  ;;  %1049 = vmatpush1.bf16.msra.mxu1 %v3204_v4 }
  0x68   :  { %923 = vmatprep.subr.bf16.mxu0 %v3211_v5  ;;  %1050 = vmatprep.subr.bf16.mxu1 %v3211_v5  ;;  %v3707_v5 = vld [vmem:[%s4273_s4 + $0x4] ss:$8 sps:$4 sm:$0xff]  }
  0x6b   :  { %924 = vmatpush1.bf16.msra.mxu0 %v3218_v6  ;;  %1051 = vmatpush1.bf16.msra.mxu1 %v3218_v6 }
  0x6c   :  { %925 = vmatprep.subr.bf16.mxu0 %v3225_v7  ;;  %1052 = vmatprep.subr.bf16.mxu1 %v3225_v7 }
  0x6f   :  { %926 = vmatpush1.bf16.msra.mxu0 %v3240_v9  ;;  %1053 = vmatpush1.bf16.msra.mxu1 %v3240_v9 }
  0x70   :  { %927 = vmatprep.subr.bf16.mxu0 %v3247_v10  ;;  %1054 = vmatprep.subr.bf16.mxu1 %v3247_v10 }
  0x73   :  { %928 = vmatpush1.bf16.msra.mxu0 %v3254_v11  ;;  %1055 = vmatpush1.bf16.msra.mxu1 %v3254_v11 }
  0x74   :  { %929 = vmatprep.subr.bf16.mxu0 %v3261_v12  ;;  %1056 = vmatprep.subr.bf16.mxu1 %v3261_v12 }
  0x77   :  { %930 = vmatpush1.bf16.msra.mxu0 %v3268_v13  ;;  %1057 = vmatpush1.bf16.msra.mxu1 %v3268_v13 }
  0x78   :  { %931 = vmatprep.subr.bf16.mxu0 %v3275_v14  ;;  %1058 = vmatprep.subr.bf16.mxu1 %v3275_v14 }
  0x7b   :  { %932 = vmatpush1.bf16.msra.mxu0 %v3282_v15  ;;  %1059 = vmatpush1.bf16.msra.mxu1 %v3282_v15 }
  0x7c   :  { %933 = vmatprep.subr.bf16.mxu0 %v3289_v16  ;;  %1060 = vmatprep.subr.bf16.mxu1 %v3289_v16 }
  0x7f   :  { %934 = vmatpush1.bf16.msra.mxu0 %v3296_v17  ;;  %1061 = vmatpush1.bf16.msra.mxu1 %v3296_v17 }
  0x80   :  { %1258 = vmatprep.subr.bf16.mxu0 %v3423_v24  ;;  %1417 = vmatprep.subr.bf16.mxu1 %v3707_v5 }
  0x82   :  { %952 = vmatmul.mubr.bf16.vlgmr.msra.gmra.mrb[12].mxu0 %v2709_v25  ;;  %1079 = vmatmul.mubr.bf16.vlgmr.msra.gmra.mrb[12].mxu1 %v2710_v26 }
  0x83   :  { %1259 = vmatpush1.bf16.msra.mxu0 %v3436_v27  ;;  %1290 = vmatprep.mubr.bf16.mxu0 %v3119_v1 }
  0x84   :  { %1260 = vmatprep.subr.bf16.mxu0 %v3442_v28  ;;  %1449 = vmatprep.mubr.bf16.mxu1 %v3119_v1 }
  0x87   :  { %1261 = vmatpush1.bf16.msra.mxu0 %v3448_v29 }
  0x88   :  { %1262 = vmatprep.subr.bf16.mxu0 %v3455_v30 }
  0x8b   :  { %1263 = vmatpush1.bf16.msra.mxu0 %v3463_v32 }
  0x8c   :  { %1264 = vmatprep.subr.bf16.mxu0 %v3469_v33 }
  0x8f   :  { %1265 = vmatpush1.bf16.msra.mxu0 %v3475_v34 }
  0x90   :  { %1494 = vmatprep.subr.bf16.mxu0 %v3423_v24 }
  0x92   :  { %2719 = vmatmul.mubr.msk.bf16.vlgmr.msra.gmra.mrb[16].mxu0 %vm40_vm0, %v1213_v36 }
  0x93   :  { %1495 = vmatpush1.bf16.msra.mxu0 %v3436_v27  ;;  %1526 = vmatprep.mubr.bf16.mxu0 %v3119_v1 }
  0x94   :  { %1496 = vmatprep.subr.bf16.mxu0 %v3442_v28 }
  0x97   :  { %1497 = vmatpush1.bf16.msra.mxu0 %v3448_v29 }
  0x98   :  { %1498 = vmatprep.subr.bf16.mxu0 %v3455_v30 }
  0x9b   :  { %1499 = vmatpush1.bf16.msra.mxu0 %v3463_v32 }
  0x9c   :  { %1500 = vmatprep.subr.bf16.mxu0 %v3469_v33 }
  0x9f   :  { %1501 = vmatpush1.bf16.msra.mxu0 %v3475_v34 }
  0xa0   :  { %1565 = vmatprep.subr.bf16.mxu0 %v3707_v5 }
  0xf5   :  { %v188_v47 = vpop.f32.mrb[0].mxu0  ;;  %v318_v48 = vpop.f32.mrb[0].mxu1 }
  0xf6   :  { %v189_v49 = vadd.f32 %v188_v47, %v3498_v44  ;;  %v319_v50 = vadd.f32 %v318_v48, %v3498_v44  ;;  %v190_v51 = vpop.f32.mrb[1].mxu0  ;;  %v320_v52 = vpop.f32.mrb[1].mxu1 }
  0xf7   :  { %v191_v53 = vadd.f32 %v190_v51, %v3502_v45  ;;  %v321_v55 = vadd.f32 %v320_v52, %v3502_v45  ;;  %v192_v56 = vpop.f32.mrb[2].mxu0  ;;  %v322_v57 = vpop.f32.mrb[2].mxu1 }
  0xf8   :  { %v193_v58 = vpop.f32.mrb[3].mxu0  ;;  %v323_v59 = vpop.f32.mrb[3].mxu1 }
  0xf9   :  { %v197_v60 = vcombine.low %v189_v49, %v191_v53  ;;  %v198_v61 = vcombine.high %v189_v49, %v191_v53  ;;  %v327_v62 = vcombine.low %v319_v50, %v321_v55  ;;  %v328_v63 = vcombine.high %v319_v50, %v321_v55 }
  0xfb   :  { %v205_v0 = vrot.slane %v197_v60, %v3508_v54  ;;  %v212_v2 = vrot.slane %v198_v61, %v3508_v54  ;;  %v335_v3 = vrot.slane %v327_v62, %v3508_v54  ;;  %v342_v4 = vrot.slane %v328_v63, %v3508_v54 }
  0xfd   :  { %v213_v6 = vcombine.high %v205_v0, %v205_v0  ;;  %v214_v7 = vcombine.high %v212_v2, %v212_v2  ;;  %v221_v9 = vrot.slane %v205_v0, %v3508_v54  ;;  %v228_v10 = vrot.slane %v212_v2, %v3508_v54 }
  0xfe   :  { %v343_v11 = vcombine.high %v335_v3, %v335_v3  ;;  %v344_v12 = vcombine.high %v342_v4, %v342_v4  ;;  %v351_v13 = vrot.slane %v335_v3, %v3508_v54  ;;  %v358_v14 = vrot.slane %v342_v4, %v3508_v54 }
  0xff   :  { %v235_v15 = vrot.slane %v213_v6, %v3508_v54  ;;  %v242_v16 = vrot.slane %v214_v7, %v3508_v54  ;;  %v243_v17 = vcombine.high %v221_v9, %v221_v9  ;;  %v244_v18 = vcombine.high %v228_v10, %v228_v10  ;;  %259 = vst.msk [vmem:[#allocation2] ss:$8 sm:$0x3] %vm3515_vm1, %v221_v9 }
 0x100   :  { %271 = vst.msk [vmem:[#allocation2 + $0x40] ss:$8 sm:$0x3] %vm3515_vm1, %v228_v10  ;;  %v365_v19 = vrot.slane %v343_v11, %v3508_v54  ;;  %v372_v20 = vrot.slane %v344_v12, %v3508_v54  ;;  %v373_v21 = vcombine.high %v351_v13, %v351_v13  ;;  %v374_v22 = vcombine.high %v358_v14, %v358_v14 }
 0x101   :  { %386 = vst.msk [vmem:[#allocation2 + $0x1] ss:$8 sm:$0x3] %vm3515_vm1, %v351_v13  ;;  %398 = vst.msk [vmem:[#allocation2 + $0x41] ss:$8 sm:$0x3] %vm3515_vm1, %v358_v14  ;;  %v245_v23 = vcombine.high %v235_v15, %v235_v15  ;;  %v246_v25 = vcombine.high %v242_v16, %v242_v16 }
 0x102   :  { %262 = vst.msk [vmem:[#allocation2 + $0x10] ss:$8 sm:$0x3] %vm3515_vm1, %v235_v15  ;;  %265 = vst.msk [vmem:[#allocation2 + $0x20] ss:$8 sm:$0x3] %vm3515_vm1, %v243_v17  ;;  %v375_v26 = vcombine.high %v365_v19, %v365_v19  ;;  %v376_v31 = vcombine.high %v372_v20, %v372_v20 }
 0x103   :  { %274 = vst.msk [vmem:[#allocation2 + $0x50] ss:$8 sm:$0x3] %vm3515_vm1, %v242_v16  ;;  %277 = vst.msk [vmem:[#allocation2 + $0x60] ss:$8 sm:$0x3] %vm3515_vm1, %v244_v18 }
 0x104   :  { %389 = vst.msk [vmem:[#allocation2 + $0x11] ss:$8 sm:$0x3] %vm3515_vm1, %v365_v19  ;;  %392 = vst.msk [vmem:[#allocation2 + $0x21] ss:$8 sm:$0x3] %vm3515_vm1, %v373_v21 }
 0x105   :  { %401 = vst.msk [vmem:[#allocation2 + $0x51] ss:$8 sm:$0x3] %vm3515_vm1, %v372_v20  ;;  %404 = vst.msk [vmem:[#allocation2 + $0x61] ss:$8 sm:$0x3] %vm3515_vm1, %v374_v22 }
 0x106   :  { %268 = vst.msk [vmem:[#allocation2 + $0x30] ss:$8 sm:$0x3] %vm3515_vm1, %v245_v23  ;;  %280 = vst.msk [vmem:[#allocation2 + $0x70] ss:$8 sm:$0x3] %vm3515_vm1, %v246_v25 }
 0x107   :  { %395 = vst.msk [vmem:[#allocation2 + $0x31] ss:$8 sm:$0x3] %vm3515_vm1, %v375_v26  ;;  %407 = vst.msk [vmem:[#allocation2 + $0x71] ss:$8 sm:$0x3] %vm3515_vm1, %v376_v31 }
 0x115   :  { %v445_v35 = vpop.f32.mrb[4].mxu0  ;;  %v572_v36 = vpop.f32.mrb[4].mxu1 }
 0x116   :  { %v446_v37 = vadd.f32 %v445_v35, %v3498_v44  ;;  %v573_v40 = vadd.f32 %v572_v36, %v3498_v44  ;;  %v447_v42 = vpop.f32.mrb[5].mxu0  ;;  %v574_v43 = vpop.f32.mrb[5].mxu1 }
 0x117   :  { %v448_v46 = vadd.f32 %v447_v42, %v3502_v45  ;;  %v575_v47 = vadd.f32 %v574_v43, %v3502_v45  ;;  %v449_v48 = vpop.f32.mrb[6].mxu0  ;;  %v576_v49 = vpop.f32.mrb[6].mxu1 }
 0x118   :  { %v450_v50 = vpop.f32.mrb[7].mxu0  ;;  %v577_v51 = vpop.f32.mrb[7].mxu1 }
 0x119   :  { %v454_v52 = vcombine.low %v446_v37, %v448_v46  ;;  %v455_v53 = vcombine.high %v446_v37, %v448_v46  ;;  %v581_v55 = vcombine.low %v573_v40, %v575_v47  ;;  %v582_v56 = vcombine.high %v573_v40, %v575_v47 }
 0x11b   :  { %v462_v57 = vrot.slane %v454_v52, %v3508_v54  ;;  %v469_v58 = vrot.slane %v455_v53, %v3508_v54  ;;  %v589_v59 = vrot.slane %v581_v55, %v3508_v54  ;;  %v596_v60 = vrot.slane %v582_v56, %v3508_v54 }
 0x11d   :  { %v470_v61 = vcombine.high %v462_v57, %v462_v57  ;;  %v471_v62 = vcombine.high %v469_v58, %v469_v58  ;;  %v478_v63 = vrot.slane %v462_v57, %v3508_v54  ;;  %v485_v0 = vrot.slane %v469_v58, %v3508_v54 }
 0x11e   :  { %v597_v2 = vcombine.high %v589_v59, %v589_v59  ;;  %v598_v3 = vcombine.high %v596_v60, %v596_v60  ;;  %v605_v4 = vrot.slane %v589_v59, %v3508_v54  ;;  %v612_v6 = vrot.slane %v596_v60, %v3508_v54 }
 0x11f   :  { %v492_v7 = vrot.slane %v470_v61, %v3508_v54  ;;  %v499_v9 = vrot.slane %v471_v62, %v3508_v54  ;;  %v500_v10 = vcombine.high %v478_v63, %v478_v63  ;;  %v501_v11 = vcombine.high %v485_v0, %v485_v0  ;;  %513 = vst.msk [vmem:[#allocation2 + $0x2] ss:$8 sm:$0x3] %vm3515_vm1, %v478_v63 }
 0x120   :  { %525 = vst.msk [vmem:[#allocation2 + $0x42] ss:$8 sm:$0x3] %vm3515_vm1, %v485_v0  ;;  %v619_v12 = vrot.slane %v597_v2, %v3508_v54  ;;  %v626_v13 = vrot.slane %v598_v3, %v3508_v54  ;;  %v627_v14 = vcombine.high %v605_v4, %v605_v4  ;;  %v628_v15 = vcombine.high %v612_v6, %v612_v6 }
 0x121   :  { %640 = vst.msk [vmem:[#allocation2 + $0x3] ss:$8 sm:$0x3] %vm3515_vm1, %v605_v4  ;;  %652 = vst.msk [vmem:[#allocation2 + $0x43] ss:$8 sm:$0x3] %vm3515_vm1, %v612_v6  ;;  %v502_v16 = vcombine.high %v492_v7, %v492_v7  ;;  %v503_v17 = vcombine.high %v499_v9, %v499_v9 }
 0x122   :  { %516 = vst.msk [vmem:[#allocation2 + $0x12] ss:$8 sm:$0x3] %vm3515_vm1, %v492_v7  ;;  %519 = vst.msk [vmem:[#allocation2 + $0x22] ss:$8 sm:$0x3] %vm3515_vm1, %v500_v10  ;;  %v629_v18 = vcombine.high %v619_v12, %v619_v12  ;;  %v630_v19 = vcombine.high %v626_v13, %v626_v13 }
 0x123   :  { %528 = vst.msk [vmem:[#allocation2 + $0x52] ss:$8 sm:$0x3] %vm3515_vm1, %v499_v9  ;;  %531 = vst.msk [vmem:[#allocation2 + $0x62] ss:$8 sm:$0x3] %vm3515_vm1, %v501_v11 }
 0x124   :  { %643 = vst.msk [vmem:[#allocation2 + $0x13] ss:$8 sm:$0x3] %vm3515_vm1, %v619_v12  ;;  %646 = vst.msk [vmem:[#allocation2 + $0x23] ss:$8 sm:$0x3] %vm3515_vm1, %v627_v14 }
 0x125   :  { %655 = vst.msk [vmem:[#allocation2 + $0x53] ss:$8 sm:$0x3] %vm3515_vm1, %v626_v13  ;;  %658 = vst.msk [vmem:[#allocation2 + $0x63] ss:$8 sm:$0x3] %vm3515_vm1, %v628_v15 }
 0x126   :  { %522 = vst.msk [vmem:[#allocation2 + $0x32] ss:$8 sm:$0x3] %vm3515_vm1, %v502_v16  ;;  %534 = vst.msk [vmem:[#allocation2 + $0x72] ss:$8 sm:$0x3] %vm3515_vm1, %v503_v17 }
 0x127   :  { %649 = vst.msk [vmem:[#allocation2 + $0x33] ss:$8 sm:$0x3] %vm3515_vm1, %v629_v18  ;;  %661 = vst.msk [vmem:[#allocation2 + $0x73] ss:$8 sm:$0x3] %vm3515_vm1, %v630_v19 }
 0x135   :  { %v699_v20 = vpop.f32.mrb[8].mxu0  ;;  %v826_v21 = vpop.f32.mrb[8].mxu1 }
 0x136   :  { %v700_v22 = vadd.f32 %v699_v20, %v3498_v44  ;;  %v827_v23 = vadd.f32 %v826_v21, %v3498_v44  ;;  %v701_v25 = vpop.f32.mrb[9].mxu0  ;;  %v828_v26 = vpop.f32.mrb[9].mxu1 }
 0x137   :  { %v702_v31 = vadd.f32 %v701_v25, %v3502_v45  ;;  %v829_v35 = vadd.f32 %v828_v26, %v3502_v45  ;;  %v703_v36 = vpop.f32.mrb[10].mxu0  ;;  %v830_v37 = vpop.f32.mrb[10].mxu1 }
 0x138   :  { %v704_v40 = vpop.f32.mrb[11].mxu0  ;;  %v831_v42 = vpop.f32.mrb[11].mxu1 }
 0x139   :  { %v708_v43 = vcombine.low %v700_v22, %v702_v31  ;;  %v709_v46 = vcombine.high %v700_v22, %v702_v31  ;;  %v835_v47 = vcombine.low %v827_v23, %v829_v35  ;;  %v836_v48 = vcombine.high %v827_v23, %v829_v35 }
 0x13b   :  { %v716_v49 = vrot.slane %v708_v43, %v3508_v54  ;;  %v723_v50 = vrot.slane %v709_v46, %v3508_v54  ;;  %v843_v51 = vrot.slane %v835_v47, %v3508_v54  ;;  %v850_v52 = vrot.slane %v836_v48, %v3508_v54 }
 0x13d   :  { %v724_v53 = vcombine.high %v716_v49, %v716_v49  ;;  %v725_v55 = vcombine.high %v723_v50, %v723_v50  ;;  %v732_v56 = vrot.slane %v716_v49, %v3508_v54  ;;  %v739_v57 = vrot.slane %v723_v50, %v3508_v54 }
 0x13e   :  { %v851_v58 = vcombine.high %v843_v51, %v843_v51  ;;  %v852_v59 = vcombine.high %v850_v52, %v850_v52  ;;  %v859_v60 = vrot.slane %v843_v51, %v3508_v54  ;;  %v866_v61 = vrot.slane %v850_v52, %v3508_v54 }
 0x13f   :  { %v746_v62 = vrot.slane %v724_v53, %v3508_v54  ;;  %v753_v63 = vrot.slane %v725_v55, %v3508_v54  ;;  %v754_v0 = vcombine.high %v732_v56, %v732_v56  ;;  %v755_v2 = vcombine.high %v739_v57, %v739_v57  ;;  %767 = vst.msk [vmem:[#allocation2 + $0x4] ss:$8 sm:$0x3] %vm3515_vm1, %v732_v56 }
 0x140   :  { %779 = vst.msk [vmem:[#allocation2 + $0x44] ss:$8 sm:$0x3] %vm3515_vm1, %v739_v57  ;;  %v873_v3 = vrot.slane %v851_v58, %v3508_v54  ;;  %v880_v4 = vrot.slane %v852_v59, %v3508_v54  ;;  %v881_v6 = vcombine.high %v859_v60, %v859_v60  ;;  %v882_v7 = vcombine.high %v866_v61, %v866_v61 }
 0x141   :  { %894 = vst.msk [vmem:[#allocation2 + $0x5] ss:$8 sm:$0x3] %vm3515_vm1, %v859_v60  ;;  %906 = vst.msk [vmem:[#allocation2 + $0x45] ss:$8 sm:$0x3] %vm3515_vm1, %v866_v61  ;;  %v756_v9 = vcombine.high %v746_v62, %v746_v62  ;;  %v757_v10 = vcombine.high %v753_v63, %v753_v63 }
 0x142   :  { %770 = vst.msk [vmem:[#allocation2 + $0x14] ss:$8 sm:$0x3] %vm3515_vm1, %v746_v62  ;;  %773 = vst.msk [vmem:[#allocation2 + $0x24] ss:$8 sm:$0x3] %vm3515_vm1, %v754_v0  ;;  %v883_v11 = vcombine.high %v873_v3, %v873_v3  ;;  %v884_v12 = vcombine.high %v880_v4, %v880_v4 }
 0x143   :  { %782 = vst.msk [vmem:[#allocation2 + $0x54] ss:$8 sm:$0x3] %vm3515_vm1, %v753_v63  ;;  %785 = vst.msk [vmem:[#allocation2 + $0x64] ss:$8 sm:$0x3] %vm3515_vm1, %v755_v2 }
 0x144   :  { %897 = vst.msk [vmem:[#allocation2 + $0x15] ss:$8 sm:$0x3] %vm3515_vm1, %v873_v3  ;;  %900 = vst.msk [vmem:[#allocation2 + $0x25] ss:$8 sm:$0x3] %vm3515_vm1, %v881_v6 }
 0x145   :  { %909 = vst.msk [vmem:[#allocation2 + $0x55] ss:$8 sm:$0x3] %vm3515_vm1, %v880_v4  ;;  %912 = vst.msk [vmem:[#allocation2 + $0x65] ss:$8 sm:$0x3] %vm3515_vm1, %v882_v7 }
 0x146   :  { %776 = vst.msk [vmem:[#allocation2 + $0x34] ss:$8 sm:$0x3] %vm3515_vm1, %v756_v9  ;;  %788 = vst.msk [vmem:[#allocation2 + $0x74] ss:$8 sm:$0x3] %vm3515_vm1, %v757_v10 }
 0x147   :  { %903 = vst.msk [vmem:[#allocation2 + $0x35] ss:$8 sm:$0x3] %vm3515_vm1, %v883_v11  ;;  %915 = vst.msk [vmem:[#allocation2 + $0x75] ss:$8 sm:$0x3] %vm3515_vm1, %v884_v12 }
 0x155   :  { %v953_v13 = vpop.f32.mrb[12].mxu0  ;;  %v1080_v14 = vpop.f32.mrb[12].mxu1 }
 0x156   :  { %v954_v15 = vadd.f32 %v953_v13, %v3498_v44  ;;  %v1081_v16 = vadd.f32 %v1080_v14, %v3498_v44  ;;  %v955_v17 = vpop.f32.mrb[13].mxu0  ;;  %v1082_v18 = vpop.f32.mrb[13].mxu1 }
 0x157   :  { %v956_v19 = vadd.f32 %v955_v17, %v3502_v45  ;;  %v1083_v20 = vadd.f32 %v1082_v18, %v3502_v45  ;;  %v957_v21 = vpop.f32.mrb[14].mxu0  ;;  %v1084_v22 = vpop.f32.mrb[14].mxu1  ;;  %v3712_v17 = vld [vmem:[%s4273_s4] ss:$8 sps:$4 sm:$0xff]   ;;  %v3718_v18 = vld [vmem:[%s4273_s4 + $0x14] ss:$8 sps:$4 sm:$0xff]  }
 0x158   :  { %v958_v23 = vpop.f32.mrb[15].mxu0  ;;  %v1085_v25 = vpop.f32.mrb[15].mxu1  ;;  %1418 = vmatpush1.bf16.msra.mxu1 %v3712_v17  ;;  %v3737_v21 = vld [vmem:[%s4273_s4 + $0x20] ss:$8 sps:$4 sm:$0xff]   ;;  %v3743_v22 = vld [vmem:[%s4273_s4 + $0x34] ss:$8 sps:$4 sm:$0xff]  }
 0x159   :  { %v962_v26 = vcombine.low %v954_v15, %v956_v19  ;;  %v963_v31 = vcombine.high %v954_v15, %v956_v19  ;;  %v1089_v35 = vcombine.low %v1081_v16, %v1083_v20  ;;  %v1090_v36 = vcombine.high %v1081_v16, %v1083_v20  ;;  %v3725_v19 = vld [vmem:[%s4273_s4 + $0x10] ss:$8 sps:$4 sm:$0xff]   ;;  %1419 = vmatprep.subr.bf16.mxu1 %v3718_v18  ;;  %v3731_v20 = vld [vmem:[%s4273_s4 + $0x24] ss:$8 sps:$4 sm:$0xff]  }
 0x15a   :  { %v3749_v23 = vld [vmem:[%s4273_s4 + $0x30] ss:$8 sps:$4 sm:$0xff]   ;;  %v3755_v25 = vld [vmem:[%s4273_s4 + $0x44] ss:$8 sps:$4 sm:$0xff]  }
 0x15b   :  { %v970_v37 = vrot.slane %v962_v26, %v3508_v54  ;;  %v977_v40 = vrot.slane %v963_v31, %v3508_v54  ;;  %v1097_v44 = vrot.slane %v1089_v35, %v3508_v54  ;;  %v1104_v42 = vrot.slane %v1090_v36, %v3508_v54  ;;  %v3761_v26 = vld [vmem:[%s4273_s4 + $0x40] ss:$8 sps:$4 sm:$0xff]   ;;  %v3767_v31 = vld [vmem:[%s4273_s4 + $0x54] ss:$8 sps:$4 sm:$0xff]   ;;  %v3773_v35 = vld [vmem:[%s4273_s4 + $0x50] ss:$8 sps:$4 sm:$0xff]  }
 0x15c   :  { %1420 = vmatpush1.bf16.msra.mxu1 %v3725_v19  ;;  %v3779_v36 = vld [vmem:[%s4273_s4 + $0x64] ss:$8 sps:$4 sm:$0xff]  }
 0x15d   :  { %v978_v43 = vcombine.high %v970_v37, %v970_v37  ;;  %v979_v46 = vcombine.high %v977_v40, %v977_v40  ;;  %v986_v45 = vrot.slane %v970_v37, %v3508_v54  ;;  %v993_v47 = vrot.slane %v977_v40, %v3508_v54  ;;  %1421 = vmatprep.subr.bf16.mxu1 %v3731_v20  ;;  %v3785_v37 = vld [vmem:[%s4273_s4 + $0x60] ss:$8 sps:$4 sm:$0xff]  }
 0x15e   :  { %v1105_v48 = vcombine.high %v1097_v44, %v1097_v44  ;;  %v1106_v49 = vcombine.high %v1104_v42, %v1104_v42  ;;  %v1113_v50 = vrot.slane %v1097_v44, %v3508_v54  ;;  %v1120_v51 = vrot.slane %v1104_v42, %v3508_v54  ;;  %v1316_v42 = vpop.permute.xlu0 %1315 }
 0x15f   :  { %v1000_v52 = vrot.slane %v978_v43, %v3508_v54  ;;  %v1007_v53 = vrot.slane %v979_v46, %v3508_v54  ;;  %v1008_v55 = vcombine.high %v986_v45, %v986_v45  ;;  %v1009_v56 = vcombine.high %v993_v47, %v993_v47  ;;  %1021 = vst.msk [vmem:[#allocation2 + $0x6] ss:$8 sm:$0x3] %vm3515_vm1, %v986_v45 }
 0x160   :  { %1033 = vst.msk [vmem:[#allocation2 + $0x46] ss:$8 sm:$0x3] %vm3515_vm1, %v993_v47  ;;  %v1127_v57 = vrot.slane %v1105_v48, %v3508_v54  ;;  %v1134_v58 = vrot.slane %v1106_v49, %v3508_v54  ;;  %v1135_v59 = vcombine.high %v1113_v50, %v1113_v50  ;;  %v1136_v60 = vcombine.high %v1120_v51, %v1120_v51  ;;  %v3795_v48 = vld [vmem:[%s4273_s4 + $0x74] ss:$8 sps:$4 sm:$0xff]  }
 0x161   :  { %1148 = vst.msk [vmem:[#allocation2 + $0x7] ss:$8 sm:$0x3] %vm3515_vm1, %v1113_v50  ;;  %1160 = vst.msk [vmem:[#allocation2 + $0x47] ss:$8 sm:$0x3] %vm3515_vm1, %v1120_v51  ;;  %v1010_v61 = vcombine.high %v1000_v52, %v1000_v52  ;;  %v1011_v62 = vcombine.high %v1007_v53, %v1007_v53  ;;  %1422 = vmatpush1.bf16.msra.mxu1 %v3737_v21 }
 0x162   :  { %1024 = vst.msk [vmem:[#allocation2 + $0x16] ss:$8 sm:$0x3] %vm3515_vm1, %v1000_v52  ;;  %1027 = vst.msk [vmem:[#allocation2 + $0x26] ss:$8 sm:$0x3] %vm3515_vm1, %v1008_v55  ;;  %v1137_v54 = vcombine.high %v1127_v57, %v1127_v57  ;;  %v1138_v63 = vcombine.high %v1134_v58, %v1134_v58  ;;  %1423 = vmatprep.subr.bf16.mxu1 %v3743_v22 }
 0x163   :  { %1036 = vst.msk [vmem:[#allocation2 + $0x56] ss:$8 sm:$0x3] %vm3515_vm1, %v1007_v53  ;;  %1039 = vst.msk [vmem:[#allocation2 + $0x66] ss:$8 sm:$0x3] %vm3515_vm1, %v1009_v56 }
 0x164   :  { %1151 = vst.msk [vmem:[#allocation2 + $0x17] ss:$8 sm:$0x3] %vm3515_vm1, %v1127_v57  ;;  %1154 = vst.msk [vmem:[#allocation2 + $0x27] ss:$8 sm:$0x3] %vm3515_vm1, %v1135_v59 }
 0x165   :  { %1163 = vst.msk [vmem:[#allocation2 + $0x57] ss:$8 sm:$0x3] %vm3515_vm1, %v1134_v58  ;;  %1166 = vst.msk [vmem:[#allocation2 + $0x67] ss:$8 sm:$0x3] %vm3515_vm1, %v1136_v60  ;;  %1424 = vmatpush1.bf16.msra.mxu1 %v3749_v23 }
 0x166   :  { %1030 = vst.msk [vmem:[#allocation2 + $0x36] ss:$8 sm:$0x3] %vm3515_vm1, %v1010_v61  ;;  %1042 = vst.msk [vmem:[#allocation2 + $0x76] ss:$8 sm:$0x3] %vm3515_vm1, %v1011_v62  ;;  %1425 = vmatprep.subr.bf16.mxu1 %v3755_v25 }
 0x167   :  { %1157 = vst.msk [vmem:[#allocation2 + $0x37] ss:$8 sm:$0x3] %vm3515_vm1, %v1137_v54  ;;  %1169 = vst.msk [vmem:[#allocation2 + $0x77] ss:$8 sm:$0x3] %vm3515_vm1, %v1138_v63 }
 0x168   :  { %v1292_v0 = vpop.f32.mrb[16].mxu0  ;;  %v1211_v3 = vld [vmem:[#allocation2] sm:$0xff]  ;;  %v1212_v10 = vld [vmem:[#allocation2 + $0x8] sm:$0xff]  ;;  %v3800_v49 = vld [vmem:[%s4273_s4 + $0x70] ss:$8 sps:$4 sm:$0xff]  }
 0x169   :  { %v1294_v2 = vpop.f32.mrb[17].mxu0  ;;  %v1299_v6 = vadd.f32 %v1292_v0, %v1211_v3  ;;  %1426 = vmatpush1.bf16.msra.mxu1 %v3761_v26  ;;  %v1209_v52 = vld [vmem:[#allocation5] sm:$0xff] }
 0x16a   :  { %v1296_v4 = vpop.f32.mrb[18].mxu0  ;;  %v1300_v11 = vadd.f32 %v1294_v2, %v1212_v10  ;;  %1427 = vmatprep.subr.bf16.mxu1 %v3767_v31 }
 0x16b   :  { %v1297_v7 = vpop.f32.mrb[19].mxu0  ;;  %v2720_v9 = vmul.f32 -1.442695, %v1299_v6 }
 0x16c   :  { %v2721_v40 = vmul.f32 -1.442695, %v1300_v11 }
 0x16d   :  { %2903 = vpow2.f32 %v2720_v9  ;;  %1428 = vmatpush1.bf16.msra.mxu1 %v3773_v35  ;;  %v1486_v9 = vld [vmem:[#allocation2 + $0x18] sm:$0xff] }
 0x16e   :  { %2905 = vtanh.f32 %v1300_v11  ;;  %1429 = vmatprep.subr.bf16.mxu1 %v3779_v36 }
 0x171   :  { %1430 = vmatpush1.bf16.msra.mxu1 %v3785_v37 }
 0x172   :  { %1431 = vmatprep.subr.bf16.mxu1 %v3795_v48 }
 0x175   :  { %1432 = vmatpush1.bf16.msra.mxu1 %v3800_v49 }
 0x176   :  { %1638 = vmatprep.subr.bf16.mxu1 %v3423_v24 }
 0x177   :  { %v2904_v12 = vpop.eup %2903 }
 0x178   :  { %v1304_v13 = vadd.f32 1.0, %v2904_v12  ;;  %v2906_v14 = vpop.eup %2905 }
 0x17a   :  { %2907 = vrcp.f32 %v1304_v13 }
 0x17b   :  { %2909 = vpow2.f32 %v2721_v40 }
 0x184   :  { %v2908_v15 = vpop.eup %2907 }
 0x185   :  { %v1319_v16 = vmul.f32 %v2908_v15, %v2906_v14  ;;  %v2910_v44 = vpop.eup %2909  ;;  %v1318_v46 = vmul.f32 %v2908_v15, %v1316_v42 }
 0x186   :  { %v1311_v43 = vadd.f32 1.0, %v2910_v44 }
 0x187   :  { %1321 = vrot.lane.b32.xlu0 %v1319_v16, %s3121_s1 }
 0x188   :  { %2911 = vrcp.f32 %v1311_v43 }
 0x192   :  { %v2912_v50 = vpop.eup %2911 }
 0x1f9   :  { %v1322_v45 = vpop.permute.xlu0 %1321 }
 0x1fa   :  { %v3789_v47 = vadd.f32 %v1322_v45, %v1318_v46 }
 0x1fc   :  { %2913 = vtanh.f32 %v3789_v47 }
 0x206   :  { %v2914_v51 = vpop.eup %2913 }
 0x207   :  { %v1326_v53 = vmul.f32 %v2914_v51, %v2912_v50 }
 0x209   :  { %v2838_v55 = vpack.i.bf16 %v1209_v52, %v1326_v53  ;;  %v1487_v56 = vpack.c.bf16 %v1326_v53, %v1326_v53  ;;  %v1210_v53 = vld [vmem:[#allocation6] sm:$0xff] }
 0x20b   :  { %2839 = vrot.lane.b32.xlu0 %v2838_v55, %s3121_s1  ;;  %1489 = vrot.lane.b32.xlu1 %v1487_v56, %s3121_s1 }
 0x27d   :  { %v2840_v57 = vpop.permute.xlu0 %2839  ;;  %v1490_v58 = vpop.permute.xlu1 %1489 }
 0x27e   :  { %v2842_v59 = vunpack.i.h.bf16 %v2840_v57  ;;  %v2841_v60 = vunpack.i.l.bf16 %v2840_v57  ;;  %2740 = vmatmul.mubr.msk.bf16.vlgmr.msra.gmra.mrb[20].mxu0 %vm40_vm0, %v1490_v58 }
 0x27f   :  { %1566 = vmatpush1.bf16.msra.mxu0 %v3712_v17  ;;  %1597 = vmatprep.mubr.bf16.mxu0 %v3119_v1 }
 0x280   :  { %v1335_v61 = vsel %vm40_vm0, %v2841_v60, %v2842_v59  ;;  %1567 = vmatprep.subr.bf16.mxu0 %v3718_v18  ;;  %v1629_v59 = vld [vmem:[#allocation2 + $0x20] sm:$0xff] }
 0x281   :  { %v1336_v62 = vpack.c.bf16 %v1335_v61, %v1335_v61 }
 0x283   :  { %1450 = vmatmul.mubr.bf16.vlgmr.msra.gmra.mrb[16].mxu1 %v1336_v62  ;;  %1568 = vmatpush1.bf16.msra.mxu0 %v3725_v19 }
 0x284   :  { %1639 = vmatpush1.bf16.msra.mxu1 %v3436_v27  ;;  %1670 = vmatprep.mubr.bf16.mxu1 %v3119_v1  ;;  %v1485_v27 = vld [vmem:[#allocation2 + $0x10] sm:$0xff] }
 0x285   :  { %1640 = vmatprep.subr.bf16.mxu1 %v3442_v28  ;;  %1569 = vmatprep.subr.bf16.mxu0 %v3731_v20 }
 0x287   :  { %1570 = vmatpush1.bf16.msra.mxu0 %v3737_v21 }
 0x288   :  { %1641 = vmatpush1.bf16.msra.mxu1 %v3448_v29  ;;  %1571 = vmatprep.subr.bf16.mxu0 %v3743_v22 }
 0x289   :  { %1642 = vmatprep.subr.bf16.mxu1 %v3455_v30 }
 0x28b   :  { %1572 = vmatpush1.bf16.msra.mxu0 %v3749_v23 }
 0x28c   :  { %1643 = vmatpush1.bf16.msra.mxu1 %v3463_v32  ;;  %1573 = vmatprep.subr.bf16.mxu0 %v3755_v25 }
 0x28d   :  { %1644 = vmatprep.subr.bf16.mxu1 %v3469_v33 }
 0x28f   :  { %1574 = vmatpush1.bf16.msra.mxu0 %v3761_v26 }
 0x290   :  { %1645 = vmatpush1.bf16.msra.mxu1 %v3475_v34  ;;  %1575 = vmatprep.subr.bf16.mxu0 %v3767_v31 }
 0x291   :  { %1709 = vmatprep.subr.bf16.mxu1 %v3707_v5 }
 0x293   :  { %1576 = vmatpush1.bf16.msra.mxu0 %v3773_v35 }
 0x294   :  { %1577 = vmatprep.subr.bf16.mxu0 %v3779_v36 }
 0x297   :  { %1578 = vmatpush1.bf16.msra.mxu0 %v3785_v37 }
 0x298   :  { %1579 = vmatprep.subr.bf16.mxu0 %v3795_v48 }
 0x29b   :  { %1580 = vmatpush1.bf16.msra.mxu0 %v3800_v49 }
 0x29c   :  { %1782 = vmatprep.subr.bf16.mxu0 %v3423_v24 }
 0x351   :  { %v1528_v28 = vpop.f32.mrb[20].mxu0 }
 0x352   :  { %v1535_v29 = vadd.f32 %v1528_v28, %v1485_v27  ;;  %v1530_v54 = vpop.f32.mrb[21].mxu0 }
 0x353   :  { %v1532_v63 = vpop.f32.mrb[22].mxu0  ;;  %v1536_v10 = vadd.f32 %v1530_v54, %v1486_v9 }
 0x354   :  { %v2741_v0 = vmul.f32 -1.442695, %v1535_v29  ;;  %v1533_v2 = vpop.f32.mrb[23].mxu0 }
 0x355   :  { %v2742_v16 = vmul.f32 -1.442695, %v1536_v10 }
 0x356   :  { %2915 = vpow2.f32 %v2741_v0  ;;  %v1451_v3 = vpop.f32.mrb[16].mxu1 }
 0x357   :  { %v3835_v4 = vpop.f32.mrb[17].mxu1  ;;  %2917 = vtanh.f32 %v1536_v10 }
 0x358   :  { %v1455_v6 = vpop.f32.mrb[18].mxu1 }
 0x359   :  { %v1456_v7 = vpop.f32.mrb[19].mxu1 }
 0x360   :  { %v2916_v11 = vpop.eup %2915 }
 0x361   :  { %v1540_v12 = vadd.f32 1.0, %v2916_v11  ;;  %v2918_v13 = vpop.eup %2917 }
 0x363   :  { %2919 = vrcp.f32 %v1540_v12 }
 0x364   :  { %2921 = vpow2.f32 %v2742_v16 }
 0x36d   :  { %v2920_v14 = vpop.eup %2919 }
 0x36e   :  { %v1551_v15 = vmul.f32 %v2920_v14, %v2918_v13  ;;  %v2922_v40 = vpop.eup %2921  ;;  %v1550_v42 = vmul.f32 %v2920_v14, %v3789_v47  ;;  %v1195_v47 = vld [vmem:[%s4274_s5] sm:$0x3] }
 0x36f   :  { %v1547_v44 = vadd.f32 1.0, %v2922_v40  ;;  %v3868_v56 = vrot.slane %v1195_v47, %v66_v39  ;;  %v3873_v0 = vrot.slane %v1195_v47, %v70_v41 }
 0x370   :  { %1553 = vrot.lane.b32.xlu1 %v1551_v15, %s3121_s1 }
 0x371   :  { %2923 = vrcp.f32 %v1547_v44  ;;  %v1452_v57 = vadd.f32 %v1451_v3, %v3868_v56  ;;  %v1454_v6 = vadd.f32 %v3835_v4, %v3873_v0 }
 0x373   :  { %v2738_v58 = vmul.f32 -1.442695, %v1452_v57  ;;  %v2739_v13 = vmul.f32 -1.442695, %v1454_v6 }
 0x37b   :  { %v2924_v45 = vpop.eup %2923 }
 0x3e2   :  { %v1554_v43 = vpop.permute.xlu1 %1553 }
 0x3e3   :  { %v3839_v46 = vadd.f32 %v1554_v43, %v1550_v42 }
 0x3e5   :  { %2925 = vtanh.f32 %v3839_v46 }
 0x3e6   :  { %2927 = vpow2.f32 %v2738_v58 }
 0x3ef   :  { %v2926_v50 = vpop.eup %2925 }
 0x3f0   :  { %v1558_v51 = vmul.f32 %v2926_v50, %v2924_v45  ;;  %v2928_v54 = vpop.eup %2927 }
 0x3f1   :  { %v1461_v2 = vadd.f32 1.0, %v2928_v54 }
 0x3f2   :  { %v1631_v52 = vpack.c.bf16 %v1558_v51, %v1558_v51 }
 0x3f4   :  { %1633 = vrot.lane.b32.xlu1 %v1631_v52, %s3121_s1 }
 0x3f8   :  { %1472 = vrot.lane.b32.xlu1 %v1210_v53, %s3121_s1 }
 0x3fc   :  { %1560 = vrot.lane.b32.xlu1 %v1558_v51, %s3121_s1 }
 0x466   :  { %v1634_v55 = vpop.permute.xlu1 %1633 }
 0x467   :  { %2745 = vmatmul.mubr.msk.bf16.vlgmr.msra.gmra.mrb[20].mxu1 %vm40_vm0, %v1634_v55 }
 0x468   :  { %1710 = vmatpush1.bf16.msra.mxu1 %v3712_v17  ;;  %1741 = vmatprep.mubr.bf16.mxu1 %v3119_v1 }
 0x469   :  { %1711 = vmatprep.subr.bf16.mxu1 %v3718_v18 }
 0x46a   :  { %v1473_v40 = vpop.permute.xlu1 %1472 }
 0x46c   :  { %1712 = vmatpush1.bf16.msra.mxu1 %v3725_v19 }
 0x46d   :  { %1713 = vmatprep.subr.bf16.mxu1 %v3731_v20 }
 0x470   :  { %1714 = vmatpush1.bf16.msra.mxu1 %v3737_v21 }
 0x471   :  { %1715 = vmatprep.subr.bf16.mxu1 %v3743_v22 }
 0x474   :  { %1716 = vmatpush1.bf16.msra.mxu1 %v3749_v23 }
 0x475   :  { %1717 = vmatprep.subr.bf16.mxu1 %v3755_v25 }
 0x478   :  { %1718 = vmatpush1.bf16.msra.mxu1 %v3761_v26 }
 0x479   :  { %1719 = vmatprep.subr.bf16.mxu1 %v3767_v31 }
 0x47c   :  { %1720 = vmatpush1.bf16.msra.mxu1 %v3773_v35 }
 0x47d   :  { %1721 = vmatprep.subr.bf16.mxu1 %v3779_v36 }
 0x480   :  { %1722 = vmatpush1.bf16.msra.mxu1 %v3785_v37 }
 0x481   :  { %1723 = vmatprep.subr.bf16.mxu1 %v3795_v48 }
 0x484   :  { %1724 = vmatpush1.bf16.msra.mxu1 %v3800_v49 }
 0x485   :  { %1926 = vmatprep.subr.bf16.mxu1 %v3423_v24  ;;  %v1630_v24 = vld [vmem:[#allocation2 + $0x28] sm:$0xff] }
 0x53a   :  { %v1672_v60 = vpop.f32.mrb[20].mxu1 }
 0x53b   :  { %v1679_v61 = vadd.f32 %v1672_v60, %v1629_v59  ;;  %v1674_v62 = vpop.f32.mrb[21].mxu1  ;;  %v1561_v59 = vpop.permute.xlu1 %1560 }
 0x53c   :  { %v1676_v27 = vpop.f32.mrb[22].mxu1  ;;  %v1680_v63 = vadd.f32 %v1674_v62, %v1630_v24  ;;  %v3892_v62 = vld [vmem:[%s4270_s3] ss:$8 sps:$4 sm:$0xff]  }
 0x53d   :  { %v2746_v28 = vmul.f32 -1.442695, %v1679_v61  ;;  %v1677_v29 = vpop.f32.mrb[23].mxu1  ;;  %v3899_v27 = vld [vmem:[%s4270_s3 + $0x14] ss:$8 sps:$4 sm:$0xff]  }
 0x53e   :  { %v2747_v41 = vmul.f32 -1.442695, %v1680_v63 }
 0x53f   :  { %2929 = vpow2.f32 %v2746_v28  ;;  %v3905_v28 = vld [vmem:[%s4270_s3 + $0x10] ss:$8 sps:$4 sm:$0xff]  }
 0x540   :  { %2931 = vtanh.f32 %v1680_v63 }
 0x549   :  { %v2930_v39 = vpop.eup %2929 }
 0x54a   :  { %v1684_v3 = vadd.f32 1.0, %v2930_v39  ;;  %v2932_v7 = vpop.eup %2931 }
 0x54c   :  { %2933 = vrcp.f32 %v1684_v3 }
 0x54d   :  { %2935 = vrcp.f32 %v1461_v2 }
 0x54e   :  { %2937 = vtanh.f32 %v1454_v6 }
 0x54f   :  { %2939 = vpow2.f32 %v2747_v41 }
 0x550   :  { %2941 = vpow2.f32 %v2739_v13 }
 0x556   :  { %v2934_v9 = vpop.eup %2933 }
 0x557   :  { %v1695_v10 = vmul.f32 %v2934_v9, %v2932_v7  ;;  %v2936_v11 = vpop.eup %2935  ;;  %v1694_v16 = vmul.f32 %v2934_v9, %v3839_v46 }
 0x558   :  { %v2938_v12 = vpop.eup %2937  ;;  %v1475_v45 = vmul.f32 %v2936_v11, %v1473_v40 }
 0x559   :  { %1697 = vrot.lane.b32.xlu0 %v1695_v10, %s3121_s1  ;;  %v1476_v38 = vmul.f32 %v2938_v12, %v2936_v11  ;;  %v2940_v14 = vpop.eup %2939  ;;  %v1773_v10 = vld [vmem:[#allocation2 + $0x30] sm:$0xff] }
 0x55a   :  { %v1691_v15 = vadd.f32 1.0, %v2940_v14  ;;  %v2942_v4 = vpop.eup %2941 }
 0x55b   :  { %v1468_v43 = vadd.f32 1.0, %v2942_v4 }
 0x55c   :  { %2943 = vrcp.f32 %v1691_v15  ;;  %v1774_v15 = vld [vmem:[#allocation2 + $0x38] sm:$0xff] }
 0x55d   :  { %1478 = vrot.lane.b32.xlu0 %v1476_v38, %s3121_s1 }
 0x566   :  { %v2944_v52 = vpop.eup %2943 }
 0x5cb   :  { %v1698_v44 = vpop.permute.xlu0 %1697 }
 0x5cc   :  { %v3880_v42 = vadd.f32 %v1698_v44, %v1694_v16 }
 0x5ce   :  { %2945 = vtanh.f32 %v3880_v42 }
 0x5cf   :  { %v1479_v50 = vpop.permute.xlu0 %1478  ;;  %2947 = vrcp.f32 %v1468_v43 }
 0x5d0   :  { %v3883_v51 = vadd.f32 %v1479_v50, %v1475_v45 }
 0x5d2   :  { %2949 = vtanh.f32 %v3883_v51 }
 0x5d8   :  { %v2946_v53 = vpop.eup %2945 }
 0x5d9   :  { %v1702_v55 = vmul.f32 %v2946_v53, %v2944_v52  ;;  %v2948_v47 = vpop.eup %2947 }
 0x5db   :  { %v1775_v46 = vpack.c.bf16 %v1702_v55, %v1702_v55 }
 0x5dc   :  { %v2950_v57 = vpop.eup %2949 }
 0x5dd   :  { %1777 = vrot.lane.b32.xlu0 %v1775_v46, %s3121_s1  ;;  %v1483_v58 = vmul.f32 %v2950_v57, %v2948_v47 }
 0x5df   :  { %v1563_v60 = vsel %vm40_vm0, %v1561_v59, %v1483_v58 }
 0x5e0   :  { %v1564_v61 = vpack.c.bf16 %v1563_v60, %v1563_v60 }
 0x5e1   :  { %1704 = vrot.lane.b32.xlu0 %v1702_v55, %s3121_s1 }
 0x5e2   :  { %1598 = vmatmul.mubr.bf16.vlgmr.msra.gmra.mrb[24].mxu0 %v1564_v61 }
 0x5e3   :  { %1783 = vmatpush1.bf16.msra.mxu0 %v3892_v62  ;;  %1814 = vmatprep.mubr.bf16.mxu0 %v3119_v1 }
 0x5e4   :  { %1784 = vmatprep.subr.bf16.mxu0 %v3899_v27 }
 0x5e7   :  { %1785 = vmatpush1.bf16.msra.mxu0 %v3905_v28 }
 0x5e8   :  { %1786 = vmatprep.subr.bf16.mxu0 %v3455_v30  ;;  %v3933_v30 = vld [vmem:[%s4270_s3 + $0x4] ss:$8 sps:$4 sm:$0xff]  }
 0x5eb   :  { %1787 = vmatpush1.bf16.msra.mxu0 %v3463_v32 }
 0x5ec   :  { %1788 = vmatprep.subr.bf16.mxu0 %v3469_v33 }
 0x5ef   :  { %1789 = vmatpush1.bf16.msra.mxu0 %v3475_v34 }
 0x5f0   :  { %1853 = vmatprep.subr.bf16.mxu0 %v3707_v5 }
 0x64f   :  { %v1778_v29 = vpop.permute.xlu0 %1777 }
 0x650   :  { %2750 = vmatmul.mubr.msk.bf16.vlgmr.msra.gmra.mrb[28].mxu0 %vm40_vm0, %v1778_v29 }
 0x651   :  { %1854 = vmatpush1.bf16.msra.mxu0 %v3712_v17  ;;  %1885 = vmatprep.mubr.bf16.mxu0 %v3119_v1 }
 0x652   :  { %1855 = vmatprep.subr.bf16.mxu0 %v3718_v18 }
 0x653   :  { %v1705_v60 = vpop.permute.xlu0 %1704 }
 0x655   :  { %1856 = vmatpush1.bf16.msra.mxu0 %v3725_v19 }
 0x656   :  { %1857 = vmatprep.subr.bf16.mxu0 %v3731_v20 }
 0x659   :  { %1858 = vmatpush1.bf16.msra.mxu0 %v3737_v21 }
 0x65a   :  { %1859 = vmatprep.subr.bf16.mxu0 %v3743_v22 }
 0x65d   :  { %1860 = vmatpush1.bf16.msra.mxu0 %v3749_v23 }
 0x65e   :  { %1861 = vmatprep.subr.bf16.mxu0 %v3755_v25 }
 0x661   :  { %1862 = vmatpush1.bf16.msra.mxu0 %v3761_v26 }
 0x662   :  { %1863 = vmatprep.subr.bf16.mxu0 %v3767_v31 }
 0x665   :  { %1864 = vmatpush1.bf16.msra.mxu0 %v3773_v35 }
 0x666   :  { %1865 = vmatprep.subr.bf16.mxu0 %v3779_v36 }
 0x669   :  { %1866 = vmatpush1.bf16.msra.mxu0 %v3785_v37 }
 0x66a   :  { %1867 = vmatprep.subr.bf16.mxu0 %v3795_v48 }
 0x66d   :  { %1868 = vmatpush1.bf16.msra.mxu0 %v3800_v49 }
 0x66e   :  { %2070 = vmatprep.subr.bf16.mxu0 %v3933_v30 }
 0x6b5   :  { %v1599_v32 = vpop.f32.mrb[24].mxu0 }
 0x6b6   :  { %v1600_v33 = vadd.f32 %v1599_v32, %v3868_v56  ;;  %v1601_v34 = vpop.f32.mrb[25].mxu0  ;;  %v3958_v32 = vld [vmem:[%s4270_s3 + $0x20] ss:$8 sps:$4 sm:$0xff]  }
 0x6b7   :  { %v1603_v24 = vpop.f32.mrb[26].mxu0  ;;  %v1602_v39 = vadd.f32 %v1601_v34, %v3873_v0  ;;  %v3970_v34 = vld [vmem:[%s4270_s3 + $0x30] ss:$8 sps:$4 sm:$0xff]  }
 0x6b8   :  { %v2743_v54 = vmul.f32 -1.442695, %v1600_v33  ;;  %v1604_v63 = vpop.f32.mrb[27].mxu0  ;;  %v3964_v33 = vld [vmem:[%s4270_s3 + $0x34] ss:$8 sps:$4 sm:$0xff]  }
 0x6b9   :  { %v2744_v40 = vmul.f32 -1.442695, %v1602_v39 }
 0x6ba   :  { %2951 = vpow2.f32 %v2743_v54 }
 0x6bb   :  { %2953 = vtanh.f32 %v1602_v39 }
 0x6c4   :  { %v2952_v2 = vpop.eup %2951 }
 0x6c5   :  { %v1609_v3 = vadd.f32 1.0, %v2952_v2  ;;  %v2954_v6 = vpop.eup %2953 }
 0x6c7   :  { %2955 = vrcp.f32 %v1609_v3 }
 0x6d1   :  { %v2956_v7 = vpop.eup %2955 }
 0x6d2   :  { %v1620_v9 = vmul.f32 %v2956_v7, %v2954_v6  ;;  %v1619_v55 = vmul.f32 %v2956_v7, %v3883_v51  ;;  %v3952_v51 = vld [vmem:[%s4270_s3 + $0x24] ss:$8 sps:$4 sm:$0xff]  }
 0x6d4   :  { %1622 = vrot.lane.b32.xlu1 %v1620_v9, %s3121_s1 }
 0x723   :  { %v1816_v11 = vpop.f32.mrb[28].mxu0 }
 0x724   :  { %v1823_v12 = vadd.f32 %v1816_v11, %v1773_v10  ;;  %v1818_v38 = vpop.f32.mrb[29].mxu0 }
 0x725   :  { %v1820_v41 = vpop.f32.mrb[30].mxu0  ;;  %v1824_v4 = vadd.f32 %v1818_v38, %v1774_v15 }
 0x726   :  { %v2751_v13 = vmul.f32 -1.442695, %v1823_v12  ;;  %v1821_v14 = vpop.f32.mrb[31].mxu0 }
 0x727   :  { %v2752_v24 = vmul.f32 -1.442695, %v1824_v4 }
 0x728   :  { %2957 = vpow2.f32 %v2751_v13 }
 0x729   :  { %2959 = vtanh.f32 %v1824_v4 }
 0x732   :  { %v2958_v16 = vpop.eup %2957 }
 0x733   :  { %v1828_v44 = vadd.f32 1.0, %v2958_v16  ;;  %v2960_v43 = vpop.eup %2959 }
 0x735   :  { %2961 = vrcp.f32 %v1828_v44 }
 0x736   :  { %2963 = vpow2.f32 %v2744_v40 }
 0x73f   :  { %v2962_v45 = vpop.eup %2961 }
 0x740   :  { %v1839_v50 = vmul.f32 %v2962_v45, %v2960_v43  ;;  %v2964_v52 = vpop.eup %2963  ;;  %v1838_v39 = vmul.f32 %v2962_v45, %v3880_v42 }
 0x741   :  { %v1616_v53 = vadd.f32 1.0, %v2964_v52 }
 0x742   :  { %1841 = vrot.lane.b32.xlu1 %v1839_v50, %s3121_s1 }
 0x743   :  { %2965 = vrcp.f32 %v1616_v53 }
 0x746   :  { %v1623_v47 = vpop.permute.xlu1 %1622 }
 0x747   :  { %v3941_v46 = vadd.f32 %v1623_v47, %v1619_v55 }
 0x749   :  { %2967 = vtanh.f32 %v3941_v46 }
 0x74a   :  { %2969 = vpow2.f32 %v2752_v24 }
 0x74d   :  { %v2966_v57 = vpop.eup %2965 }
 0x753   :  { %v2968_v58 = vpop.eup %2967 }
 0x754   :  { %v1627_v59 = vmul.f32 %v2968_v58, %v2966_v57  ;;  %v2970_v54 = vpop.eup %2969 }
 0x755   :  { %v1835_v63 = vadd.f32 1.0, %v2970_v54 }
 0x756   :  { %v1707_v61 = vsel %vm40_vm0, %v1705_v60, %v1627_v59 }
 0x757   :  { %v1708_v29 = vpack.c.bf16 %v1707_v61, %v1707_v61  ;;  %2971 = vrcp.f32 %v1835_v63 }
 0x759   :  { %1742 = vmatmul.mubr.bf16.vlgmr.msra.gmra.mrb[24].mxu1 %v1708_v29 }
 0x75a   :  { %1927 = vmatpush1.bf16.msra.mxu1 %v3892_v62  ;;  %1958 = vmatprep.mubr.bf16.mxu1 %v3119_v1 }
 0x75b   :  { %1928 = vmatprep.subr.bf16.mxu1 %v3899_v27 }
 0x75e   :  { %1929 = vmatpush1.bf16.msra.mxu1 %v3905_v28 }
 0x75f   :  { %1930 = vmatprep.subr.bf16.mxu1 %v3952_v51 }
 0x761   :  { %v2972_v6 = vpop.eup %2971 }
 0x762   :  { %1931 = vmatpush1.bf16.msra.mxu1 %v3958_v32 }
 0x763   :  { %1932 = vmatprep.subr.bf16.mxu1 %v3964_v33 }
 0x766   :  { %1933 = vmatpush1.bf16.msra.mxu1 %v3970_v34 }
 0x767   :  { %1997 = vmatprep.subr.bf16.mxu1 %v3707_v5 }
 0x7b4   :  { %v1842_v2 = vpop.permute.xlu1 %1841 }
 0x7b5   :  { %v3975_v3 = vadd.f32 %v1842_v2, %v1838_v39 }
 0x7b7   :  { %2973 = vtanh.f32 %v3975_v3 }
 0x7c1   :  { %v2974_v7 = vpop.eup %2973 }
 0x7c2   :  { %v1846_v9 = vmul.f32 %v2974_v7, %v2972_v6  ;;  %v1918_v7 = vld [vmem:[#allocation2 + $0x48] sm:$0xff] }
 0x7c4   :  { %v1919_v10 = vpack.c.bf16 %v1846_v9, %v1846_v9 }
 0x7c6   :  { %1921 = vrot.lane.b32.xlu0 %v1919_v10, %s3121_s1 }
 0x7ca   :  { %1848 = vrot.lane.b32.xlu0 %v1846_v9, %s3121_s1 }
 0x82c   :  { %v1743_v11 = vpop.f32.mrb[24].mxu1 }
 0x82d   :  { %v1744_v12 = vadd.f32 %v1743_v11, %v3868_v56  ;;  %v1745_v38 = vpop.f32.mrb[25].mxu1 }
 0x82e   :  { %v1747_v41 = vpop.f32.mrb[26].mxu1  ;;  %v1746_v15 = vadd.f32 %v1745_v38, %v3873_v0 }
 0x82f   :  { %v2748_v42 = vmul.f32 -1.442695, %v1744_v12  ;;  %v1748_v13 = vpop.f32.mrb[27].mxu1 }
 0x830   :  { %v2749_v45 = vmul.f32 -1.442695, %v1746_v15 }
 0x831   :  { %2975 = vpow2.f32 %v2748_v42 }
 0x832   :  { %2977 = vtanh.f32 %v1746_v15 }
 0x838   :  { %v1922_v14 = vpop.permute.xlu0 %1921 }
 0x839   :  { %2755 = vmatmul.mubr.msk.bf16.vlgmr.msra.gmra.mrb[28].mxu1 %vm40_vm0, %v1922_v14 }
 0x83a   :  { %1998 = vmatpush1.bf16.msra.mxu1 %v3712_v17  ;;  %2029 = vmatprep.mubr.bf16.mxu1 %v3119_v1 }
 0x83b   :  { %v2976_v4 = vpop.eup %2975  ;;  %1999 = vmatprep.subr.bf16.mxu1 %v3718_v18 }
 0x83c   :  { %v1753_v16 = vadd.f32 1.0, %v2976_v4  ;;  %v2978_v40 = vpop.eup %2977  ;;  %v1849_v60 = vpop.permute.xlu0 %1848 }
 0x83e   :  { %2979 = vrcp.f32 %v1753_v16  ;;  %2000 = vmatpush1.bf16.msra.mxu1 %v3725_v19 }
 0x83f   :  { %2001 = vmatprep.subr.bf16.mxu1 %v3731_v20  ;;  %2981 = vpow2.f32 %v2749_v45 }
 0x842   :  { %2002 = vmatpush1.bf16.msra.mxu1 %v3737_v21 }
 0x843   :  { %2003 = vmatprep.subr.bf16.mxu1 %v3743_v22 }
 0x846   :  { %2004 = vmatpush1.bf16.msra.mxu1 %v3749_v23 }
 0x847   :  { %2005 = vmatprep.subr.bf16.mxu1 %v3755_v25 }
 0x848   :  { %v2980_v44 = vpop.eup %2979 }
 0x849   :  { %v1764_v43 = vmul.f32 %v2980_v44, %v2978_v40  ;;  %v2982_v50 = vpop.eup %2981  ;;  %v1763_v53 = vmul.f32 %v2980_v44, %v3941_v46  ;;  %v1917_v46 = vld [vmem:[#allocation2 + $0x40] sm:$0xff] }
 0x84a   :  { %2006 = vmatpush1.bf16.msra.mxu1 %v3761_v26  ;;  %v1760_v52 = vadd.f32 1.0, %v2982_v50 }
 0x84b   :  { %1766 = vrot.lane.b32.xlu1 %v1764_v43, %s3121_s1  ;;  %2007 = vmatprep.subr.bf16.mxu1 %v3767_v31 }
 0x84c   :  { %2983 = vrcp.f32 %v1760_v52 }
 0x84e   :  { %2008 = vmatpush1.bf16.msra.mxu1 %v3773_v35 }
 0x84f   :  { %2009 = vmatprep.subr.bf16.mxu1 %v3779_v36 }
 0x852   :  { %2010 = vmatpush1.bf16.msra.mxu1 %v3785_v37 }
 0x853   :  { %2011 = vmatprep.subr.bf16.mxu1 %v3795_v48 }
 0x856   :  { %2012 = vmatpush1.bf16.msra.mxu1 %v3800_v49  ;;  %v2984_v57 = vpop.eup %2983 }
 0x857   :  { %2214 = vmatprep.subr.bf16.mxu1 %v3933_v30 }
 0x8bd   :  { %v1767_v55 = vpop.permute.xlu1 %1766 }
 0x8be   :  { %v4002_v47 = vadd.f32 %v1767_v55, %v1763_v53 }
 0x8c0   :  { %2985 = vtanh.f32 %v4002_v47 }
 0x8ca   :  { %v2986_v58 = vpop.eup %2985 }
 0x8cb   :  { %v1771_v59 = vmul.f32 %v2986_v58, %v2984_v57 }
 0x8cd   :  { %v1851_v61 = vsel %vm40_vm0, %v1849_v60, %v1771_v59 }
 0x8ce   :  { %v1852_v29 = vpack.c.bf16 %v1851_v61, %v1851_v61 }
 0x8d0   :  { %1886 = vmatmul.mubr.bf16.vlgmr.msra.gmra.mrb[32].mxu0 %v1852_v29 }
 0x8d1   :  { %2071 = vmatpush1.bf16.msra.mxu0 %v3892_v62  ;;  %2102 = vmatprep.mubr.bf16.mxu0 %v3119_v1 }
 0x8d2   :  { %2072 = vmatprep.subr.bf16.mxu0 %v3899_v27 }
 0x8d5   :  { %2073 = vmatpush1.bf16.msra.mxu0 %v3905_v28 }
 0x8d6   :  { %2074 = vmatprep.subr.bf16.mxu0 %v3952_v51 }
 0x8d9   :  { %2075 = vmatpush1.bf16.msra.mxu0 %v3958_v32 }
 0x8da   :  { %2076 = vmatprep.subr.bf16.mxu0 %v3964_v33 }
 0x8dd   :  { %2077 = vmatpush1.bf16.msra.mxu0 %v3970_v34 }
 0x8de   :  { %2141 = vmatprep.subr.bf16.mxu0 %v3707_v5 }
 0x90c   :  { %v1960_v24 = vpop.f32.mrb[28].mxu1 }
 0x90d   :  { %v1967_v54 = vadd.f32 %v1960_v24, %v1917_v46  ;;  %v1962_v63 = vpop.f32.mrb[29].mxu1 }
 0x90e   :  { %v1964_v39 = vpop.f32.mrb[30].mxu1  ;;  %v1968_v9 = vadd.f32 %v1962_v63, %v1918_v7 }
 0x90f   :  { %v2756_v2 = vmul.f32 -1.442695, %v1967_v54  ;;  %v1965_v6 = vpop.f32.mrb[31].mxu1 }
 0x910   :  { %v2757_v42 = vmul.f32 -1.442695, %v1968_v9 }
 0x911   :  { %2987 = vpow2.f32 %v2756_v2 }
 0x912   :  { %2989 = vtanh.f32 %v1968_v9 }
 0x91b   :  { %v2988_v10 = vpop.eup %2987 }
 0x91c   :  { %v1972_v11 = vadd.f32 1.0, %v2988_v10  ;;  %v2990_v12 = vpop.eup %2989 }
 0x91e   :  { %2991 = vrcp.f32 %v1972_v11 }
 0x91f   :  { %2993 = vpow2.f32 %v2757_v42 }
 0x928   :  { %v2992_v38 = vpop.eup %2991 }
 0x929   :  { %v1983_v41 = vmul.f32 %v2992_v38, %v2990_v12  ;;  %v2994_v13 = vpop.eup %2993  ;;  %v1982_v15 = vmul.f32 %v2992_v38, %v3975_v3 }
 0x92a   :  { %v1979_v14 = vadd.f32 1.0, %v2994_v13 }
 0x92b   :  { %1985 = vrot.lane.b32.xlu1 %v1983_v41, %s3121_s1 }
 0x92c   :  { %2995 = vrcp.f32 %v1979_v14 }
 0x936   :  { %v2996_v53 = vpop.eup %2995 }
 0x99d   :  { %v1986_v4 = vpop.permute.xlu1 %1985 }
 0x99e   :  { %v4017_v16 = vadd.f32 %v1986_v4, %v1982_v15 }
 0x9a0   :  { %2997 = vtanh.f32 %v4017_v16 }
 0x9a3   :  { %v1887_v40 = vpop.f32.mrb[32].mxu0 }
 0x9a4   :  { %v1888_v44 = vadd.f32 %v1887_v40, %v3868_v56  ;;  %v1889_v43 = vpop.f32.mrb[33].mxu0 }
 0x9a5   :  { %v1891_v45 = vpop.f32.mrb[34].mxu0  ;;  %v1890_v3 = vadd.f32 %v1889_v43, %v3873_v0 }
 0x9a6   :  { %v2753_v50 = vmul.f32 -1.442695, %v1888_v44  ;;  %v1892_v52 = vpop.f32.mrb[35].mxu0 }
 0x9a7   :  { %v2754_v24 = vmul.f32 -1.442695, %v1890_v3 }
 0x9a8   :  { %2999 = vpow2.f32 %v2753_v50 }
 0x9a9   :  { %3001 = vtanh.f32 %v1890_v3 }
 0x9aa   :  { %v2998_v55 = vpop.eup %2997 }
 0x9ab   :  { %v1990_v57 = vmul.f32 %v2998_v55, %v2996_v53 }
 0x9ad   :  { %v2063_v58 = vpack.c.bf16 %v1990_v57, %v1990_v57 }
 0x9af   :  { %2065 = vrot.lane.b32.xlu0 %v2063_v58, %s3121_s1 }
 0x9b2   :  { %v3000_v59 = vpop.eup %2999 }
 0x9b3   :  { %v1897_v60 = vadd.f32 1.0, %v3000_v59  ;;  %1992 = vrot.lane.b32.xlu0 %v1990_v57, %s3121_s1  ;;  %v3002_v61 = vpop.eup %3001 }
 0x9b5   :  { %3003 = vrcp.f32 %v1897_v60 }
 0x9b6   :  { %3005 = vpow2.f32 %v2754_v24 }
 0x9bf   :  { %v3004_v29 = vpop.eup %3003 }
 0x9c0   :  { %v1908_v46 = vmul.f32 %v3004_v29, %v3002_v61  ;;  %v3006_v63 = vpop.eup %3005 }
 0x9c1   :  { %v1904_v39 = vadd.f32 1.0, %v3006_v63 }
 0x9c2   :  { %1910 = vrot.lane.b32.xlu1 %v1908_v46, %s3121_s1 }
 0x9c3   :  { %3007 = vrcp.f32 %v1904_v39 }
 0xa21   :  { %v2066_v54 = vpop.permute.xlu0 %2065 }
 0xa22   :  { %2760 = vmatmul.mubr.msk.bf16.vlgmr.msra.gmra.mrb[36].mxu0 %vm40_vm0, %v2066_v54 }
 0xa23   :  { %2142 = vmatpush1.bf16.msra.mxu0 %v3712_v17  ;;  %2173 = vmatprep.mubr.bf16.mxu0 %v3119_v1  ;;  %v1907_v17 = vmul.f32 %v3004_v29, %v4002_v47  ;;  %v2062_v47 = vld [vmem:[#allocation2 + $0x58] sm:$0xff] }
 0xa24   :  { %2143 = vmatprep.subr.bf16.mxu0 %v3718_v18 }
 0xa27   :  { %2144 = vmatpush1.bf16.msra.mxu0 %v3725_v19 }
 0xa28   :  { %2145 = vmatprep.subr.bf16.mxu0 %v3731_v20  ;;  %v3008_v20 = vpop.eup %3007 }
 0xa2b   :  { %2146 = vmatpush1.bf16.msra.mxu0 %v3737_v21 }
 0xa2c   :  { %2147 = vmatprep.subr.bf16.mxu0 %v3743_v22 }
 0xa2f   :  { %2148 = vmatpush1.bf16.msra.mxu0 %v3749_v23  ;;  %v1993_v23 = vpop.permute.xlu0 %1992 }
 0xa30   :  { %2149 = vmatprep.subr.bf16.mxu0 %v3755_v25 }
 0xa33   :  { %2150 = vmatpush1.bf16.msra.mxu0 %v3761_v26 }
 0xa34   :  { %v1911_v18 = vpop.permute.xlu1 %1910  ;;  %2151 = vmatprep.subr.bf16.mxu0 %v3767_v31  ;;  %v2061_v31 = vld [vmem:[#allocation2 + $0x50] sm:$0xff] }
 0xa35   :  { %v4038_v19 = vadd.f32 %v1911_v18, %v1907_v17  ;;  %v4075_v18 = vld [vmem:[%s4273_s4] ss:$8 sps:$4 sm:$0xff]  }
 0xa37   :  { %3009 = vtanh.f32 %v4038_v19  ;;  %2152 = vmatpush1.bf16.msra.mxu0 %v3773_v35 }
 0xa38   :  { %2153 = vmatprep.subr.bf16.mxu0 %v3779_v36 }
 0xa3b   :  { %2154 = vmatpush1.bf16.msra.mxu0 %v3785_v37 }
 0xa3c   :  { %2155 = vmatprep.subr.bf16.mxu0 %v3795_v48 }
 0xa3f   :  { %2156 = vmatpush1.bf16.msra.mxu0 %v3800_v49 }
 0xa40   :  { %2358 = vmatprep.subr.bf16.mxu0 %v3933_v30 }
 0xa41   :  { %v3010_v21 = vpop.eup %3009 }
 0xa42   :  { %v1915_v22 = vmul.f32 %v3010_v21, %v3008_v20  ;;  %v4082_v20 = vld [vmem:[%s4273_s4 + $0x14] ss:$8 sps:$4 sm:$0xff]  }
 0xa44   :  { %v1995_v25 = vsel %vm40_vm0, %v1993_v23, %v1915_v22 }
 0xa45   :  { %v1996_v26 = vpack.c.bf16 %v1995_v25, %v1995_v25  ;;  %v4089_v25 = vld [vmem:[%s4273_s4 + $0x10] ss:$8 sps:$4 sm:$0xff]  }
 0xa47   :  { %2030 = vmatmul.mubr.bf16.vlgmr.msra.gmra.mrb[32].mxu1 %v1996_v26  ;;  %v4095_v26 = vld [vmem:[%s4273_s4 + $0x24] ss:$8 sps:$4 sm:$0xff]  }
 0xa48   :  { %2215 = vmatpush1.bf16.msra.mxu1 %v3892_v62  ;;  %2246 = vmatprep.mubr.bf16.mxu1 %v3119_v1 }
 0xa49   :  { %2216 = vmatprep.subr.bf16.mxu1 %v3899_v27 }
 0xa4c   :  { %2217 = vmatpush1.bf16.msra.mxu1 %v3905_v28 }
 0xa4d   :  { %2218 = vmatprep.subr.bf16.mxu1 %v3952_v51 }
 0xa50   :  { %2219 = vmatpush1.bf16.msra.mxu1 %v3958_v32 }
 0xa51   :  { %2220 = vmatprep.subr.bf16.mxu1 %v3964_v33 }
 0xa54   :  { %2221 = vmatpush1.bf16.msra.mxu1 %v3970_v34 }
 0xa55   :  { %2285 = vmatprep.subr.bf16.mxu1 %v3707_v5 }
 0xaf5   :  { %v2104_v35 = vpop.f32.mrb[36].mxu0 }
 0xaf6   :  { %v2111_v36 = vadd.f32 %v2104_v35, %v2061_v31  ;;  %v2106_v37 = vpop.f32.mrb[37].mxu0  ;;  %v4103_v31 = vld [vmem:[%s4273_s4 + $0x20] ss:$8 sps:$4 sm:$0xff]   ;;  %v4110_v35 = vld [vmem:[%s4273_s4 + $0x34] ss:$8 sps:$4 sm:$0xff]  }
 0xaf7   :  { %v2108_v48 = vpop.f32.mrb[38].mxu0  ;;  %v2112_v2 = vadd.f32 %v2106_v37, %v2062_v47  ;;  %v4166_v37 = vld [vmem:[%s4273_s4 + $0x74] ss:$8 sps:$4 sm:$0xff]  }
 0xaf8   :  { %v2761_v49 = vmul.f32 -1.442695, %v2111_v36  ;;  %v2109_v30 = vpop.f32.mrb[39].mxu0  ;;  %v4154_v36 = vld [vmem:[%s4273_s4 + $0x64] ss:$8 sps:$4 sm:$0xff]  }
 0xaf9   :  { %v2762_v45 = vmul.f32 -1.442695, %v2112_v2  ;;  %v4172_v48 = vld [vmem:[%s4273_s4 + $0x70] ss:$8 sps:$4 sm:$0xff]  }
 0xafa   :  { %3011 = vpow2.f32 %v2761_v49  ;;  %v2205_v49 = vld [vmem:[#allocation2 + $0x60] sm:$0xff] }
 0xafb   :  { %3013 = vtanh.f32 %v2112_v2 }
 0xb04   :  { %v3012_v6 = vpop.eup %3011 }
 0xb05   :  { %v2116_v7 = vadd.f32 1.0, %v3012_v6  ;;  %v3014_v9 = vpop.eup %3013 }
 0xb07   :  { %3015 = vrcp.f32 %v2116_v7 }
 0xb11   :  { %v3016_v10 = vpop.eup %3015 }
 0xb12   :  { %v2127_v11 = vmul.f32 %v3016_v10, %v3014_v9  ;;  %v2126_v53 = vmul.f32 %v3016_v10, %v4017_v16 }
 0xb14   :  { %2129 = vrot.lane.b32.xlu1 %v2127_v11, %s3121_s1 }
 0xb1a   :  { %v2031_v5 = vpop.f32.mrb[32].mxu1 }
 0xb1b   :  { %v2032_v12 = vadd.f32 %v2031_v5, %v3868_v56  ;;  %v2033_v38 = vpop.f32.mrb[33].mxu1 }
 0xb1c   :  { %v2035_v41 = vpop.f32.mrb[34].mxu1  ;;  %v2034_v14 = vadd.f32 %v2033_v38, %v3873_v0 }
 0xb1d   :  { %v2758_v42 = vmul.f32 -1.442695, %v2032_v12  ;;  %v2036_v13 = vpop.f32.mrb[35].mxu1 }
 0xb1e   :  { %v2759_v61 = vmul.f32 -1.442695, %v2034_v14 }
 0xb1f   :  { %3017 = vpow2.f32 %v2758_v42  ;;  %v2206_v42 = vld [vmem:[#allocation2 + $0x68] sm:$0xff] }
 0xb20   :  { %3019 = vtanh.f32 %v2034_v14 }
 0xb29   :  { %v3018_v15 = vpop.eup %3017 }
 0xb2a   :  { %v2041_v4 = vadd.f32 1.0, %v3018_v15  ;;  %v3020_v40 = vpop.eup %3019 }
 0xb2c   :  { %3021 = vrcp.f32 %v2041_v4 }
 0xb2d   :  { %3023 = vpow2.f32 %v2762_v45 }
 0xb36   :  { %v3022_v44 = vpop.eup %3021 }
 0xb37   :  { %v2052_v43 = vmul.f32 %v3022_v44, %v3020_v40  ;;  %v3024_v50 = vpop.eup %3023  ;;  %v2051_v46 = vmul.f32 %v3022_v44, %v4038_v19 }
 0xb38   :  { %v2123_v52 = vadd.f32 1.0, %v3024_v50 }
 0xb39   :  { %2054 = vrot.lane.b32.xlu1 %v2052_v43, %s3121_s1 }
 0xb3a   :  { %3025 = vrcp.f32 %v2123_v52 }
 0xb44   :  { %v3026_v58 = vpop.eup %3025 }
 0xb86   :  { %v2130_v55 = vpop.permute.xlu1 %2129 }
 0xb87   :  { %v4062_v57 = vadd.f32 %v2130_v55, %v2126_v53 }
 0xb89   :  { %3027 = vtanh.f32 %v4062_v57 }
 0xb8a   :  { %3029 = vpow2.f32 %v2759_v61 }
 0xb93   :  { %v3028_v3 = vpop.eup %3027 }
 0xb94   :  { %v2134_v59 = vmul.f32 %v3028_v3, %v3026_v58  ;;  %v3030_v16 = vpop.eup %3029 }
 0xb95   :  { %v2048_v54 = vadd.f32 1.0, %v3030_v16 }
 0xb96   :  { %v2207_v60 = vpack.c.bf16 %v2134_v59, %v2134_v59 }
 0xb98   :  { %2209 = vrot.lane.b32.xlu0 %v2207_v60, %s3121_s1 }
 0xb9c   :  { %2136 = vrot.lane.b32.xlu0 %v2134_v59, %s3121_s1 }
 0xbab   :  { %v2055_v29 = vpop.permute.xlu1 %2054 }
 0xbac   :  { %v4068_v24 = vadd.f32 %v2055_v29, %v2051_v46 }
 0xbae   :  { %3031 = vtanh.f32 %v4068_v24 }
 0xbaf   :  { %3033 = vrcp.f32 %v2048_v54 }
 0xbb8   :  { %v3032_v63 = vpop.eup %3031 }
 0xbb9   :  { %v3034_v17 = vpop.eup %3033 }
 0xbba   :  { %v2059_v19 = vmul.f32 %v3034_v17, %v3032_v63 }
 0xc0a   :  { %v2210_v39 = vpop.permute.xlu0 %2209 }
 0xc0b   :  { %2765 = vmatmul.mubr.msk.bf16.vlgmr.msra.gmra.mrb[36].mxu1 %vm40_vm0, %v2210_v39 }
 0xc0c   :  { %2286 = vmatpush1.bf16.msra.mxu1 %v4075_v18  ;;  %2317 = vmatprep.mubr.bf16.mxu1 %v3119_v1 }
 0xc0d   :  { %2287 = vmatprep.subr.bf16.mxu1 %v4082_v20 }
 0xc0e   :  { %v2137_v21 = vpop.permute.xlu0 %2136 }
 0xc0f   :  { %v2139_v22 = vsel %vm40_vm0, %v2137_v21, %v2059_v19 }
 0xc10   :  { %v2140_v23 = vpack.c.bf16 %v2139_v22, %v2139_v22  ;;  %2288 = vmatpush1.bf16.msra.mxu1 %v4089_v25 }
 0xc11   :  { %2289 = vmatprep.subr.bf16.mxu1 %v4095_v26 }
 0xc12   :  { %2174 = vmatmul.mubr.bf16.vlgmr.msra.gmra.mrb[40].mxu0 %v2140_v23 }
 0xc13   :  { %2359 = vmatpush1.bf16.msra.mxu0 %v3892_v62  ;;  %2390 = vmatprep.mubr.bf16.mxu0 %v3119_v1  ;;  %v4117_v62 = vld [vmem:[%s4273_s4 + $0x30] ss:$8 sps:$4 sm:$0xff]  }
 0xc14   :  { %2290 = vmatpush1.bf16.msra.mxu1 %v4103_v31  ;;  %2360 = vmatprep.subr.bf16.mxu0 %v3899_v27  ;;  %v4124_v27 = vld [vmem:[%s4273_s4 + $0x44] ss:$8 sps:$4 sm:$0xff]  }
 0xc15   :  { %2291 = vmatprep.subr.bf16.mxu1 %v4110_v35 }
 0xc17   :  { %2361 = vmatpush1.bf16.msra.mxu0 %v3905_v28  ;;  %v4131_v28 = vld [vmem:[%s4273_s4 + $0x40] ss:$8 sps:$4 sm:$0xff]  }
 0xc18   :  { %2292 = vmatpush1.bf16.msra.mxu1 %v4117_v62  ;;  %2362 = vmatprep.subr.bf16.mxu0 %v3952_v51  ;;  %v4138_v51 = vld [vmem:[%s4273_s4 + $0x54] ss:$8 sps:$4 sm:$0xff]  }
 0xc19   :  { %2293 = vmatprep.subr.bf16.mxu1 %v4124_v27 }
 0xc1b   :  { %2363 = vmatpush1.bf16.msra.mxu0 %v3958_v32  ;;  %v4145_v32 = vld [vmem:[%s4273_s4 + $0x50] ss:$8 sps:$4 sm:$0xff]  }
 0xc1c   :  { %2294 = vmatpush1.bf16.msra.mxu1 %v4131_v28  ;;  %2364 = vmatprep.subr.bf16.mxu0 %v3964_v33  ;;  %v3114_v33 = vld [vmem:[%s4273_s4 + $0x4] ss:$8 sps:$4 sm:$0xff]  }
 0xc1d   :  { %2295 = vmatprep.subr.bf16.mxu1 %v4138_v51 }
 0xc1f   :  { %2365 = vmatpush1.bf16.msra.mxu0 %v3970_v34  ;;  %v4160_v34 = vld [vmem:[%s4273_s4 + $0x60] ss:$8 sps:$4 sm:$0xff]  }
 0xc20   :  { %2296 = vmatpush1.bf16.msra.mxu1 %v4145_v32  ;;  %2429 = vmatprep.subr.bf16.mxu0 %v3114_v33 }
 0xc21   :  { %2297 = vmatprep.subr.bf16.mxu1 %v4154_v36 }
 0xc24   :  { %2298 = vmatpush1.bf16.msra.mxu1 %v4160_v34 }
 0xc25   :  { %2299 = vmatprep.subr.bf16.mxu1 %v4166_v37 }
 0xc28   :  { %2300 = vmatpush1.bf16.msra.mxu1 %v4172_v48 }
 0xcde   :  { %v2248_v30 = vpop.f32.mrb[36].mxu1 }
 0xcdf   :  { %v2255_v47 = vadd.f32 %v2248_v30, %v2205_v49  ;;  %v2250_v2 = vpop.f32.mrb[37].mxu1 }
 0xce0   :  { %v2252_v6 = vpop.f32.mrb[38].mxu1  ;;  %v2256_v13 = vadd.f32 %v2250_v2, %v2206_v42 }
 0xce1   :  { %v2766_v7 = vmul.f32 -1.442695, %v2255_v47  ;;  %v2253_v9 = vpop.f32.mrb[39].mxu1 }
 0xce2   :  { %v2767_v58 = vmul.f32 -1.442695, %v2256_v13 }
 0xce3   :  { %3035 = vpow2.f32 %v2766_v7 }
 0xce5   :  { %v2175_v10 = vpop.f32.mrb[40].mxu0 }
 0xce6   :  { %v2176_v11 = vadd.f32 %v2175_v10, %v3868_v56  ;;  %v2177_v5 = vpop.f32.mrb[41].mxu0 }
 0xce7   :  { %v2179_v12 = vpop.f32.mrb[42].mxu0  ;;  %v2178_v4 = vadd.f32 %v2177_v5, %v3873_v0 }
 0xce8   :  { %v2763_v38 = vmul.f32 -1.442695, %v2176_v11  ;;  %v2180_v41 = vpop.f32.mrb[43].mxu0 }
 0xce9   :  { %v2764_v39 = vmul.f32 -1.442695, %v2178_v4 }
 0xcea   :  { %3037 = vpow2.f32 %v2763_v38 }
 0xceb   :  { %3039 = vtanh.f32 %v2256_v13 }
 0xced   :  { %v3036_v14 = vpop.eup %3035 }
 0xcee   :  { %v2260_v15 = vadd.f32 1.0, %v3036_v14 }
 0xcf0   :  { %3041 = vrcp.f32 %v2260_v15 }
 0xcf1   :  { %3043 = vtanh.f32 %v2178_v4 }
 0xcf4   :  { %v3038_v40 = vpop.eup %3037 }
 0xcf5   :  { %v2185_v44 = vadd.f32 1.0, %v3038_v40  ;;  %v3040_v43 = vpop.eup %3039 }
 0xcf7   :  { %3045 = vrcp.f32 %v2185_v44 }
 0xcf8   :  { %3047 = vpow2.f32 %v2767_v58 }
 0xcfa   :  { %v3042_v45 = vpop.eup %3041 }
 0xcfb   :  { %v2271_v50 = vmul.f32 %v3042_v45, %v3040_v43  ;;  %v3044_v52 = vpop.eup %3043  ;;  %v2270_v60 = vmul.f32 %v3042_v45, %v4062_v57 }
 0xcfd   :  { %2273 = vrot.lane.b32.xlu1 %v2271_v50, %s3121_s1 }
 0xd01   :  { %v3046_v53 = vpop.eup %3045 }
 0xd02   :  { %v2196_v55 = vmul.f32 %v3046_v53, %v3044_v52  ;;  %v3048_v3 = vpop.eup %3047  ;;  %v2195_v19 = vmul.f32 %v3046_v53, %v4068_v24 }
 0xd03   :  { %v2267_v59 = vadd.f32 1.0, %v3048_v3 }
 0xd04   :  { %2198 = vrot.lane.b32.xlu1 %v2196_v55, %s3121_s1 }
 0xd05   :  { %3049 = vrcp.f32 %v2267_v59 }
 0xd0f   :  { %v3050_v46 = vpop.eup %3049 }
 0xd6f   :  { %v2274_v61 = vpop.permute.xlu1 %2273 }
 0xd70   :  { %v4180_v29 = vadd.f32 %v2274_v61, %v2270_v60 }
 0xd72   :  { %3051 = vtanh.f32 %v4180_v29 }
 0xd73   :  { %3053 = vpow2.f32 %v2764_v39 }
 0xd76   :  { %v2199_v17 = vpop.permute.xlu1 %2198 }
 0xd77   :  { %v4186_v21 = vadd.f32 %v2199_v17, %v2195_v19 }
 0xd79   :  { %3055 = vtanh.f32 %v4186_v21 }
 0xd7c   :  { %v3052_v16 = vpop.eup %3051 }
 0xd7d   :  { %v2278_v54 = vmul.f32 %v3052_v16, %v3050_v46  ;;  %v3054_v57 = vpop.eup %3053 }
 0xd7e   :  { %v2192_v22 = vadd.f32 1.0, %v3054_v57 }
 0xd7f   :  { %v2351_v63 = vpack.c.bf16 %v2278_v54, %v2278_v54 }
 0xd80   :  { %3057 = vrcp.f32 %v2192_v22 }
 0xd81   :  { %2353 = vrot.lane.b32.xlu0 %v2351_v63, %s3121_s1 }
 0xd83   :  { %v3056_v23 = vpop.eup %3055 }
 0xd85   :  { %2280 = vrot.lane.b32.xlu0 %v2278_v54, %s3121_s1 }
 0xd8a   :  { %v3058_v49 = vpop.eup %3057 }
 0xd8b   :  { %v2203_v30 = vmul.f32 %v3058_v49, %v3056_v23 }
 0xdf3   :  { %v2354_v33 = vpop.permute.xlu0 %2353 }
 0xdf4   :  { %2770 = vmatmul.mubr.msk.bf16.vlgmr.msra.gmra.mrb[44].mxu0 %vm40_vm0, %v2354_v33 }
 0xdf5   :  { %2430 = vmatpush1.bf16.msra.mxu0 %v4075_v18  ;;  %2461 = vmatprep.mubr.bf16.mxu0 %v3119_v1  ;;  %v2349_v1 = vld [vmem:[#allocation2 + $0x70] sm:$0xff] }
 0xdf6   :  { %2431 = vmatprep.subr.bf16.mxu0 %v4082_v20 }
 0xdf7   :  { %v2281_v24 = vpop.permute.xlu0 %2280 }
 0xdf8   :  { %v2283_v47 = vsel %vm40_vm0, %v2281_v24, %v2203_v30 }
 0xdf9   :  { %v2284_v2 = vpack.c.bf16 %v2283_v47, %v2283_v47  ;;  %2432 = vmatpush1.bf16.msra.mxu0 %v4089_v25  ;;  %v3123_v47 = vmov 0.0|0.0  }
 0xdfa   :  { %2433 = vmatprep.subr.bf16.mxu0 %v4095_v26  ;;  %2817 = vmatprep.subr.bf16.mxu1 %v3123_v47 }
 0xdfb   :  { %2318 = vmatmul.mubr.bf16.vlgmr.msra.gmra.mrb[40].mxu1 %v2284_v2  ;;  %v2513_v2 = vld [vmem:[%s4275_s6 + $0x10] sm:$0xff] }
 0xdfc   :  { %2807 = vmatprep.mubr.msk.f32.mxu1 %vm3124_vm2, %v3120_v8 }
 0xdfd   :  { %2434 = vmatpush1.bf16.msra.mxu0 %v4103_v31 }
 0xdfe   :  { %2435 = vmatprep.subr.bf16.mxu0 %v4110_v35 }
 0xe01   :  { %2436 = vmatpush1.bf16.msra.mxu0 %v4117_v62 }
 0xe02   :  { %2437 = vmatprep.subr.bf16.mxu0 %v4124_v27 }
 0xe05   :  { %2438 = vmatpush1.bf16.msra.mxu0 %v4131_v28 }
 0xe06   :  { %2439 = vmatprep.subr.bf16.mxu0 %v4138_v51 }
 0xe09   :  { %2440 = vmatpush1.bf16.msra.mxu0 %v4145_v32 }
 0xe0a   :  { %2441 = vmatprep.subr.bf16.mxu0 %v4154_v36 }
 0xe0d   :  { %2442 = vmatpush1.bf16.msra.mxu0 %v4160_v34  ;;  %v2350_v34 = vld [vmem:[#allocation2 + $0x78] sm:$0xff] }
 0xe0e   :  { %2443 = vmatprep.subr.bf16.mxu0 %v4166_v37 }
 0xe11   :  { %2444 = vmatpush1.bf16.msra.mxu0 %v4172_v48 }
 0xec7   :  { %v2392_v18 = vpop.f32.mrb[44].mxu0 }
 0xec8   :  { %v2399_v20 = vadd.f32 %v2392_v18, %v2349_v1  ;;  %v2394_v25 = vpop.f32.mrb[45].mxu0  ;;  %v2514_v18 = vld [vmem:[%s4275_s6 + $0x18] sm:$0xff] }
 0xec9   :  { %v2396_v26 = vpop.f32.mrb[46].mxu0  ;;  %v2400_v37 = vadd.f32 %v2394_v25, %v2350_v34  ;;  %v2515_v25 = vld [vmem:[%s4275_s6 + $0x20] sm:$0xff] }
 0xeca   :  { %v2771_v31 = vmul.f32 -1.442695, %v2399_v20  ;;  %v2397_v35 = vpop.f32.mrb[47].mxu0  ;;  %v2821_v20 = vpack.c.bf16 %v2514_v18, %v2513_v2  ;;  %v2516_v26 = vld [vmem:[%s4275_s6 + $0x28] sm:$0xff] }
 0xecb   :  { %v2772_v13 = vmul.f32 -1.442695, %v2400_v37  ;;  %v2517_v35 = vld [vmem:[%s4275_s6 + $0x30] sm:$0xff] }
 0xecc   :  { %3059 = vpow2.f32 %v2771_v31  ;;  %v2824_v31 = vpack.c.bf16 %v2516_v26, %v2515_v25 }
 0xece   :  { %v2319_v62 = vpop.f32.mrb[40].mxu1 }
 0xecf   :  { %v2320_v27 = vadd.f32 %v2319_v62, %v3868_v56  ;;  %v2321_v28 = vpop.f32.mrb[41].mxu1  ;;  %v2518_v62 = vld [vmem:[%s4275_s6 + $0x38] sm:$0xff] }
 0xed0   :  { %v2323_v51 = vpop.f32.mrb[42].mxu1  ;;  %v2322_v7 = vadd.f32 %v2321_v28, %v3873_v0 }
 0xed1   :  { %v2768_v32 = vmul.f32 -1.442695, %v2320_v27  ;;  %v2324_v36 = vpop.f32.mrb[43].mxu1  ;;  %v2827_v27 = vpack.c.bf16 %v2518_v62, %v2517_v35 }
 0xed2   :  { %v2769_v52 = vmul.f32 -1.442695, %v2322_v7 }
 0xed3   :  { %3061 = vpow2.f32 %v2768_v32 }
 0xed4   :  { %3063 = vtanh.f32 %v2400_v37 }
 0xed6   :  { %v3060_v6 = vpop.eup %3059 }
 0xed7   :  { %v2404_v48 = vadd.f32 1.0, %v3060_v6 }
 0xed9   :  { %3065 = vrcp.f32 %v2404_v48 }
 0xeda   :  { %3067 = vtanh.f32 %v2322_v7 }
 0xedd   :  { %v3062_v9 = vpop.eup %3061 }
 0xede   :  { %v2329_v10 = vadd.f32 1.0, %v3062_v9  ;;  %v3064_v11 = vpop.eup %3063 }
 0xee0   :  { %3069 = vrcp.f32 %v2329_v10 }
 0xee1   :  { %3071 = vpow2.f32 %v2772_v13 }
 0xee3   :  { %v3066_v5 = vpop.eup %3065 }
 0xee4   :  { %v2415_v12 = vmul.f32 %v3066_v5, %v3064_v11  ;;  %v3068_v38 = vpop.eup %3067  ;;  %v2414_v4 = vmul.f32 %v3066_v5, %v4180_v29  ;;  %v2599_v5 = vld [vmem:[%s4276_s8] sm:$0xff] }
 0xee6   :  { %2417 = vrot.lane.b32.xlu1 %v2415_v12, %s3121_s1  ;;  %v2600_v12 = vld [vmem:[%s4276_s8 + $0x8] sm:$0xff] }
 0xeea   :  { %v3070_v41 = vpop.eup %3069 }
 0xeeb   :  { %v2340_v42 = vmul.f32 %v3070_v41, %v3068_v38  ;;  %v3072_v14 = vpop.eup %3071  ;;  %v2339_v55 = vmul.f32 %v3070_v41, %v4186_v21  ;;  %v2830_v38 = vpack.c.bf16 %v2600_v12, %v2599_v5  ;;  %v2775_v41 = vld [vmem:[%s4277_s7] ss:$0 sm:$0xff] }
 0xeec   :  { %v2411_v15 = vadd.f32 1.0, %v3072_v14 }
 0xeed   :  { %2342 = vrot.lane.b32.xlu0 %v2340_v42, %s3121_s1 }
 0xeee   :  { %3073 = vrcp.f32 %v2411_v15  ;;  %v2777_v15 = vld [vmem:[%s4278_s9] ss:$0 sm:$0xff] }
 0xef8   :  { %v3074_v43 = vpop.eup %3073 }
 0xf58   :  { %v2418_v40 = vpop.permute.xlu1 %2417 }
 0xf59   :  { %v2420_v44 = vadd.f32 %v2418_v40, %v2414_v4 }
 0xf5b   :  { %3075 = vtanh.f32 %v2420_v44 }
 0xf5c   :  { %3077 = vpow2.f32 %v2769_v52 }
 0xf5f   :  { %v2343_v53 = vpop.permute.xlu0 %2342 }
 0xf60   :  { %v2345_v3 = vadd.f32 %v2343_v53, %v2339_v55 }
 0xf62   :  { %3079 = vtanh.f32 %v2345_v3 }
 0xf65   :  { %v3076_v45 = vpop.eup %3075 }
 0xf66   :  { %v2422_v50 = vmul.f32 %v3076_v45, %v3074_v43  ;;  %v3078_v58 = vpop.eup %3077 }
 0xf67   :  { %v2336_v59 = vadd.f32 1.0, %v3078_v58 }
 0xf68   :  { %2424 = vrot.lane.b32.xlu1 %v2422_v50, %s3121_s1 }
 0xf69   :  { %3081 = vrcp.f32 %v2336_v59 }
 0xf6c   :  { %v3080_v60 = vpop.eup %3079 }
 0xf73   :  { %v3082_v61 = vpop.eup %3081 }
 0xf74   :  { %v2347_v29 = vmul.f32 %v3082_v61, %v3080_v60 }
 0xfda   :  { %v2425_v46 = vpop.permute.xlu1 %2424 }
 0xfdb   :  { %v2427_v16 = vsel %vm40_vm0, %v2425_v46, %v2347_v29  ;;  %2492 = vst.msk [vmem:[#allocation3] sm:$0xff] %vm40_vm0, %v2425_v46 }
 0xfdc   :  { %v2428_v54 = vpack.c.bf16 %v2427_v16, %v2427_v16 }
 0xfde   :  { %2462 = vmatmul.mubr.bf16.vlgmr.msra.gmra.mrb[48].mxu0 %v2428_v54 }
0x10b1   :  { %v2463_v63 = vpop.f32.mrb[48].mxu0 }
0x10b2   :  { %v2464_v39 = vadd.f32 %v2463_v63, %v3868_v56  ;;  %v2465_v17 = vpop.f32.mrb[49].mxu0  ;;  %v2511_v56 = vld [vmem:[%s4275_s6] sm:$0xff] }
0x10b3   :  { %v2467_v19 = vpop.f32.mrb[50].mxu0  ;;  %v2466_v22 = vadd.f32 %v2465_v17, %v3873_v0  ;;  %v2512_v0 = vld [vmem:[%s4275_s6 + $0x8] sm:$0xff] }
0x10b4   :  { %v2773_v57 = vmul.f32 -1.442695, %v2464_v39  ;;  %v2468_v21 = vpop.f32.mrb[51].mxu0  ;;  %v2818_v1 = vpack.c.bf16 %v2512_v0, %v2511_v56 }
0x10b5   :  { %v2774_v28 = vmul.f32 -1.442695, %v2466_v22 }
0x10b6   :  { %3083 = vpow2.f32 %v2773_v57  ;;  %2819 = vmatpush3.bf16.msra.mxu1 %v2818_v1 }
0x10b7   :  { %3085 = vtanh.f32 %v2466_v22  ;;  %2820 = vmatprep.subr.bf16.mxu1 %v3123_v47 }
0x10ba   :  { %2822 = vmatpush3.bf16.msra.mxu1 %v2821_v20 }
0x10bb   :  { %2823 = vmatprep.subr.bf16.mxu1 %v3123_v47 }
0x10be   :  { %2825 = vmatpush3.bf16.msra.mxu1 %v2824_v31 }
0x10bf   :  { %2826 = vmatprep.subr.bf16.mxu1 %v3123_v47 }
0x10c0   :  { %v3084_v23 = vpop.eup %3083 }
0x10c1   :  { %v2473_v33 = vadd.f32 1.0, %v3084_v23  ;;  %v3086_v49 = vpop.eup %3085 }
0x10c2   :  { %2828 = vmatpush3.bf16.msra.mxu1 %v2827_v27 }
0x10c3   :  { %3087 = vrcp.f32 %v2473_v33  ;;  %2829 = vmatprep.subr.bf16.mxu1 %v3123_v47 }
0x10c4   :  { %3089 = vpow2.f32 %v2774_v28 }
0x10cd   :  { %v3088_v30 = vpop.eup %3087 }
0x10ce   :  { %v2484_v24 = vmul.f32 %v3088_v30, %v3086_v49  ;;  %v3090_v51 = vpop.eup %3089  ;;  %v2483_v36 = vmul.f32 %v3088_v30, %v2345_v3 }
0x10cf   :  { %v2480_v32 = vadd.f32 1.0, %v3090_v51 }
0x10d0   :  { %2486 = vrot.lane.b32.xlu0 %v2484_v24, %s3121_s1 }
0x10d1   :  { %3091 = vrcp.f32 %v2480_v32 }
0x10d4   :  { %2494 = vrot.lane.b32.xlu0 %v2420_v44, %s3121_s1 }
0x10db   :  { %v3092_v48 = vpop.eup %3091 }
0x1142   :  { %v2487_v34 = vpop.permute.xlu0 %2486 }
0x1143   :  { %v2489_v37 = vadd.f32 %v2487_v34, %v2483_v36 }
0x1145   :  { %3093 = vtanh.f32 %v2489_v37 }
0x1146   :  { %v2495_v6 = vpop.permute.xlu0 %2494 }
0x1147   :  { %2497 = vst.msk [vmem:[#allocation4] sm:$0xff] %vm40_vm0, %v2495_v6 }
0x114f   :  { %v3094_v7 = vpop.eup %3093 }
0x1150   :  { %v2491_v9 = vmul.f32 %v3094_v7, %v3092_v48 }
0x1152   :  { %2499 = vrot.lane.b32.xlu1 %v2491_v9, %s3121_s1 }
0x1156   :  { %2504 = vrot.lane.b32.xlu1 %v2489_v37, %s3121_s1 }
0x11c4   :  { %v2500_v10 = vpop.permute.xlu1 %2499 }
0x11c5   :  { %2502 = vst.msk [vmem:[#allocation5] sm:$0xff] %vm40_vm0, %v2500_v10  ;;  %2808 = vmatmul.mubr.msk.f32.vlgmr.msra.gmra.mrb[44].mxu1 %vm40_vm0, %v2500_v10 }
0x11c6   :  { %2814 = vmatprep.mubr.msk.f32.mxu1 %vm3124_vm2, %v3120_v8  ;;  %2831 = vmatpush3.bf16.msra.mxu1 %v2830_v38 }
0x11c8   :  { %v2505_v11 = vpop.permute.xlu1 %2504 }
0x11c9   :  { %2507 = vst.msk [vmem:[#allocation6] sm:$0xff] %vm40_vm0, %v2505_v11 }
0x1298   :  { %v2594_v42 = vpop.f32.mrb[44].mxu1 }
0x1299   :  { %v2595_v13 = vadd.f32 %v2775_v41, %v2594_v42  ;;  %v2809_v8 = vpop.f32.mrb[45].mxu1 }
0x129b   :  { %v2598_v14 = vmax.f32 %v2595_v13, 0.0 }
0x129d   :  { %2815 = vmatmul.mubr.msk.f32.vlgmr.msra.gmra.mrb[46].mxu1 %vm2608_vm3, %v2598_v14 }
0x1370   :  { %v2678_v4 = vpop.f32.mrb[46].mxu1 }
0x1371   :  { %v2679_v40 = vadd.f32 %v2777_v15, %v2678_v4  ;;  %v2816_v44 = vpop.f32.mrb[47].mxu1 }
0x1373   :  { %2683 = vst.msk [vmem:[%s4279_s10] sm:$0xff] %vm2682_vm4, %v2679_v40 }

</bundles_post_ra>
